<compile_context>
chip_gen: v7x
topology: tpu7x:2x2x1
jax: 0.10.0
libtpu: 0.0.40
codegen_flags: <defaults>
</compile_context>

<pallas_src>
import jax
import jax.numpy as jnp
from jax import lax
from jax.experimental import pallas as pl
from jax.experimental.pallas import tpu as pltpu

LEARNING_RATE = 0.01
ITERATIONS = 10


def sgd_solver_kernel(x_ref, a_ref, y_ref, o_ref):
    a = a_ref[...]            # (bb, M, N) f32
    y = y_ref[...]            # (bb, M)    f32
    x = x_ref[...]            # (bb, N)    f32

    # Fold the constant 2*lr into A once (a single (bb,M,N) VPU pass); both
    # hoisted dots below then produce already-scaled G and c.
    a_s = a * (2.0 * LEARNING_RATE)

    # ---- hoisted, one-shot MXU work (outside the iteration loop) ------------
    # G_b = (2*lr) * A_b^T A_b : contract over M, batch over b -> (bb, N, N)
    g = lax.dot_general(
        a_s, a,
        dimension_numbers=(((1,), (1,)), ((0,), (0,))),
        preferred_element_type=jnp.float32,
    )
    # c_b = (2*lr) * A_b^T y_b : (bb, 1, M) x (bb, M, N) -> (bb, 1, N)
    c = lax.dot_general(
        y[:, None, :], a_s,
        dimension_numbers=(((2,), (1,)), ((0,), (0,))),
        preferred_element_type=jnp.float32,
    )

    # ---- fully-unrolled SGD iteration loop (batched matvec on the MXU) ------
    # State stays (bb, 1, N) for the whole chain: no per-iteration reshapes.
    xm = x[:, None, :]        # (bb, 1, N)
    for _ in range(ITERATIONS):
        gx = lax.dot_general(
            xm, g,
            dimension_numbers=(((2,), (1,)), ((0,), (0,))),
            preferred_element_type=jnp.float32,
        )                     # (bb, 1, N) == x_b @ G_b  (G_b symmetric)
        xm = xm - gx + c      # x <- x - lr * 2 * (A^T A x - A^T y)

    o_ref[...] = xm[:, 0, :]


def _pick_batch_block(b_padded: int, requested: int) -> int:
    """Largest multiple of 8 that divides b_padded and is <= requested."""
    bb = max(8, (requested // 8) * 8)
    bb = min(bb, b_padded)
    while b_padded % bb != 0:
        bb -= 8
    return bb


def _vmem_limit_bytes(bb: int, m: int, n: int) -> int:
    f32 = 4
    # double-buffered A tile + double-buffered small I/O tiles
    io_bytes = 2 * (bb * m * n + bb * m + 2 * bb * n) * f32
    # resident in-kernel values: a_s, g, c, xm (+ slack for temporaries)
    live_bytes = (bb * m * n + bb * n * n + 2 * bb * n) * f32
    est = 2 * (io_bytes + live_bytes)
    # Floor for pipelining headroom; cap at 48 MiB so the rule is v7x-safe.
    return int(min(max(est, 16 * 1024 * 1024), 48 * 1024 * 1024))


def sgd_solver(params, a, y, *, batch_block=8):
    B, N = params.shape
    _, M, _ = a.shape

    # Pad batch to a multiple of 8 (f32 sublane granule). Padded rows have
    # A = 0, y = 0 so they are fixed points of the iteration and get sliced off.
    B_pad = ((B + 7) // 8) * 8
    if B_pad != B:
        pad = B_pad - B
        params = jnp.pad(params, ((0, pad), (0, 0)))
        a = jnp.pad(a, ((0, pad), (0, 0), (0, 0)))
        y = jnp.pad(y, ((0, pad), (0, 0)))

    # >= 2 parallel batch blocks whenever B allows (v7x two-TC split); on
    # single-core v5e/v6e pass a larger batch_block to trade grid overhead for
    # a fatter block, as long as the VMEM formula above still fits.
    bb = _pick_batch_block(B_pad, batch_block)
    grid = (B_pad // bb,)

    out = pl.pallas_call(
        sgd_solver_kernel,
        out_shape=jax.ShapeDtypeStruct((B_pad, N), jnp.float32),
        grid_spec=pltpu.PrefetchScalarGridSpec(
            num_scalar_prefetch=0,
            grid=grid,
            in_specs=[
                pl.BlockSpec((bb, N), lambda i: (i, 0)),
                pl.BlockSpec((bb, M, N), lambda i: (i, 0, 0)),
                pl.BlockSpec((bb, M), lambda i: (i, 0)),
            ],
            out_specs=pl.BlockSpec((bb, N), lambda i: (i, 0)),
        ),
        compiler_params=pltpu.CompilerParams(
            dimension_semantics=("parallel",),
            vmem_limit_bytes=_vmem_limit_bytes(bb, M, N),
        ),
    )(params, a, y)

    return out[:B]


# ---- pure-JAX reference (mirrors the PyTorch autograd loop exactly) ---------
def _error_function(x, a, y):
    r = jnp.einsum("bmn,bn->bm", a, x) - y
    return jnp.sum(r * r, axis=-1)          # per-batch error, shape (B,)


@jax.jit
def _reference_solver(x, a, y):
    for _ in range(ITERATIONS):
        grad = jax.grad(lambda p: _error_function(p, a, y).sum())(x)
        x = x - LEARNING_RATE * grad
    return x


if __name__ == "__main__":
    B, M, N = 16, 128, 128
    key = jax.random.PRNGKey(0)
    k1, k2, k3 = jax.random.split(key, 3)
    params = jax.random.normal(k1, (B, N), dtype=jnp.float32)
    a = 0.1 * jax.random.normal(k2, (B, M, N), dtype=jnp.float32)
    y = jax.random.normal(k3, (B, M), dtype=jnp.float32)

    out = jax.block_until_ready(sgd_solver(params, a, y))
    ref = jax.block_until_ready(_reference_solver(params, a, y))

    assert out.shape == (B, N) and out.dtype == jnp.float32
    assert jnp.allclose(out, ref, atol=1e-4, rtol=1e-4), "mismatch vs autograd reference"
    print("KERNEL_OK")
</pallas_src>

<mosaic_0001>
module attributes {stable_mosaic.version = 11 : i64} {
  func.func @sgd_solver_kernel(%arg0: i32, %arg1: memref<8x128xf32, #tpu.memory_space<vmem>>, %arg2: memref<8x128x128xf32, #tpu.memory_space<vmem>>, %arg3: memref<8x128xf32, #tpu.memory_space<vmem>>, %arg4: memref<8x128xf32, #tpu.memory_space<vmem>>) attributes {dimension_semantics = [#tpu.dimension_semantics<parallel>], iteration_bounds = array<i64: 2>, scalar_prefetch = 0 : i64, scratch_operands = 0 : i64, tpu.core_type = #tpu.core_type<tc>, window_params = [{transform_indices = @transform_0, window_bounds = array<i64: 8, 128>}, {transform_indices = @transform_1, window_bounds = array<i64: 8, 128, 128>}, {transform_indices = @transform_2, window_bounds = array<i64: 8, 128>}, {transform_indices = @transform_3, window_bounds = array<i64: 8, 128>}]} {
    %c0 = arith.constant 0 : index
    %c0_0 = arith.constant 0 : index
    %c0_1 = arith.constant 0 : index
    %0 = vector.load %arg2[%c0, %c0_0, %c0_1] : memref<8x128x128xf32, #tpu.memory_space<vmem>>, vector<8x128x128xf32>
    %c0_2 = arith.constant 0 : index
    %c0_3 = arith.constant 0 : index
    %1 = vector.load %arg3[%c0_2, %c0_3] : memref<8x128xf32, #tpu.memory_space<vmem>>, vector<8x128xf32>
    %c0_4 = arith.constant 0 : index
    %c0_5 = arith.constant 0 : index
    %2 = vector.load %arg1[%c0_4, %c0_5] : memref<8x128xf32, #tpu.memory_space<vmem>>, vector<8x128xf32>
    %cst = arith.constant 2.000000e-02 : f32
    %3 = vector.broadcast %cst : f32 to vector<8x128x128xf32>
    %4 = arith.mulf %0, %3 : vector<8x128x128xf32>
    %cst_6 = arith.constant dense<0.000000e+00> : vector<8x128x128xf32>
    %5 = tpu.matmul %4, %0, %cst_6 {dimension_numbers = #tpu.dot_dimension_numbers<[1], [1], [2], [2], [0, 0, 0, 2, 1, 2], [0], [0]>} : vector<8x128x128xf32>, vector<8x128x128xf32>, vector<8x128x128xf32> -> vector<8x128x128xf32>
    %6 = vector.shape_cast %1 : vector<8x128xf32> to vector<8x1x128xf32>
    %cst_7 = arith.constant dense<0.000000e+00> : vector<8x1x128xf32>
    %7 = tpu.matmul %6, %4, %cst_7 {dimension_numbers = #tpu.dot_dimension_numbers<[2], [1], [1], [2], [0, 0, 0, 1, 1, 2], [0], [0]>} : vector<8x1x128xf32>, vector<8x128x128xf32>, vector<8x1x128xf32> -> vector<8x1x128xf32>
    %8 = vector.shape_cast %2 : vector<8x128xf32> to vector<8x1x128xf32>
    %cst_8 = arith.constant dense<0.000000e+00> : vector<8x1x128xf32>
    %9 = tpu.matmul %8, %5, %cst_8 {dimension_numbers = #tpu.dot_dimension_numbers<[2], [1], [1], [2], [0, 0, 0, 1, 1, 2], [0], [0]>} : vector<8x1x128xf32>, vector<8x128x128xf32>, vector<8x1x128xf32> -> vector<8x1x128xf32>
    %10 = arith.subf %8, %9 : vector<8x1x128xf32>
    %11 = arith.addf %10, %7 : vector<8x1x128xf32>
    %cst_9 = arith.constant dense<0.000000e+00> : vector<8x1x128xf32>
    %12 = tpu.matmul %11, %5, %cst_9 {dimension_numbers = #tpu.dot_dimension_numbers<[2], [1], [1], [2], [0, 0, 0, 1, 1, 2], [0], [0]>} : vector<8x1x128xf32>, vector<8x128x128xf32>, vector<8x1x128xf32> -> vector<8x1x128xf32>
    %13 = arith.subf %11, %12 : vector<8x1x128xf32>
    %14 = arith.addf %13, %7 : vector<8x1x128xf32>
    %cst_10 = arith.constant dense<0.000000e+00> : vector<8x1x128xf32>
    %15 = tpu.matmul %14, %5, %cst_10 {dimension_numbers = #tpu.dot_dimension_numbers<[2], [1], [1], [2], [0, 0, 0, 1, 1, 2], [0], [0]>} : vector<8x1x128xf32>, vector<8x128x128xf32>, vector<8x1x128xf32> -> vector<8x1x128xf32>
    %16 = arith.subf %14, %15 : vector<8x1x128xf32>
    %17 = arith.addf %16, %7 : vector<8x1x128xf32>
    %cst_11 = arith.constant dense<0.000000e+00> : vector<8x1x128xf32>
    %18 = tpu.matmul %17, %5, %cst_11 {dimension_numbers = #tpu.dot_dimension_numbers<[2], [1], [1], [2], [0, 0, 0, 1, 1, 2], [0], [0]>} : vector<8x1x128xf32>, vector<8x128x128xf32>, vector<8x1x128xf32> -> vector<8x1x128xf32>
    %19 = arith.subf %17, %18 : vector<8x1x128xf32>
    %20 = arith.addf %19, %7 : vector<8x1x128xf32>
    %cst_12 = arith.constant dense<0.000000e+00> : vector<8x1x128xf32>
    %21 = tpu.matmul %20, %5, %cst_12 {dimension_numbers = #tpu.dot_dimension_numbers<[2], [1], [1], [2], [0, 0, 0, 1, 1, 2], [0], [0]>} : vector<8x1x128xf32>, vector<8x128x128xf32>, vector<8x1x128xf32> -> vector<8x1x128xf32>
    %22 = arith.subf %20, %21 : vector<8x1x128xf32>
    %23 = arith.addf %22, %7 : vector<8x1x128xf32>
    %cst_13 = arith.constant dense<0.000000e+00> : vector<8x1x128xf32>
    %24 = tpu.matmul %23, %5, %cst_13 {dimension_numbers = #tpu.dot_dimension_numbers<[2], [1], [1], [2], [0, 0, 0, 1, 1, 2], [0], [0]>} : vector<8x1x128xf32>, vector<8x128x128xf32>, vector<8x1x128xf32> -> vector<8x1x128xf32>
    %25 = arith.subf %23, %24 : vector<8x1x128xf32>
    %26 = arith.addf %25, %7 : vector<8x1x128xf32>
    %cst_14 = arith.constant dense<0.000000e+00> : vector<8x1x128xf32>
    %27 = tpu.matmul %26, %5, %cst_14 {dimension_numbers = #tpu.dot_dimension_numbers<[2], [1], [1], [2], [0, 0, 0, 1, 1, 2], [0], [0]>} : vector<8x1x128xf32>, vector<8x128x128xf32>, vector<8x1x128xf32> -> vector<8x1x128xf32>
    %28 = arith.subf %26, %27 : vector<8x1x128xf32>
    %29 = arith.addf %28, %7 : vector<8x1x128xf32>
    %cst_15 = arith.constant dense<0.000000e+00> : vector<8x1x128xf32>
    %30 = tpu.matmul %29, %5, %cst_15 {dimension_numbers = #tpu.dot_dimension_numbers<[2], [1], [1], [2], [0, 0, 0, 1, 1, 2], [0], [0]>} : vector<8x1x128xf32>, vector<8x128x128xf32>, vector<8x1x128xf32> -> vector<8x1x128xf32>
    %31 = arith.subf %29, %30 : vector<8x1x128xf32>
    %32 = arith.addf %31, %7 : vector<8x1x128xf32>
    %cst_16 = arith.constant dense<0.000000e+00> : vector<8x1x128xf32>
    %33 = tpu.matmul %32, %5, %cst_16 {dimension_numbers = #tpu.dot_dimension_numbers<[2], [1], [1], [2], [0, 0, 0, 1, 1, 2], [0], [0]>} : vector<8x1x128xf32>, vector<8x128x128xf32>, vector<8x1x128xf32> -> vector<8x1x128xf32>
    %34 = arith.subf %32, %33 : vector<8x1x128xf32>
    %35 = arith.addf %34, %7 : vector<8x1x128xf32>
    %cst_17 = arith.constant dense<0.000000e+00> : vector<8x1x128xf32>
    %36 = tpu.matmul %35, %5, %cst_17 {dimension_numbers = #tpu.dot_dimension_numbers<[2], [1], [1], [2], [0, 0, 0, 1, 1, 2], [0], [0]>} : vector<8x1x128xf32>, vector<8x128x128xf32>, vector<8x1x128xf32> -> vector<8x1x128xf32>
    %37 = arith.subf %35, %36 : vector<8x1x128xf32>
    %38 = arith.addf %37, %7 : vector<8x1x128xf32>
    %39 = vector.shape_cast %38 : vector<8x1x128xf32> to vector<8x128xf32>
    %c0_18 = arith.constant 0 : index
    %c0_19 = arith.constant 0 : index
    %40 = vector.load %arg4[%c0_18, %c0_19] : memref<8x128xf32, #tpu.memory_space<vmem>>, vector<8x128xf32>
    tpu.vector_store %arg4[%c0_18, %c0_19], %39 {strides = array<i32>} : memref<8x128xf32, #tpu.memory_space<vmem>>, vector<8x128xf32>,
    return
  }
  func.func @transform_0(%arg0: i32) -> (i32, i32) {
    %c0_i32 = arith.constant 0 : i32
    %c0_i32_0 = arith.constant 0 : i32
    return %arg0, %c0_i32 : i32, i32
  }
  func.func @transform_1(%arg0: i32) -> (i32, i32, i32) {
    %c0_i32 = arith.constant 0 : i32
    %c0_i32_0 = arith.constant 0 : i32
    %c0_i32_1 = arith.constant 0 : i32
    return %arg0, %c0_i32, %c0_i32_0 : i32, i32, i32
  }
  func.func @transform_2(%arg0: i32) -> (i32, i32) {
    %c0_i32 = arith.constant 0 : i32
    %c0_i32_0 = arith.constant 0 : i32
    return %arg0, %c0_i32 : i32, i32
  }
  func.func @transform_3(%arg0: i32) -> (i32, i32) {
    %c0_i32 = arith.constant 0 : i32
    %c0_i32_0 = arith.constant 0 : i32
    return %arg0, %c0_i32 : i32, i32
  }
}

</mosaic_0001>

<bundles_post_ra>
// kernel: tpu_custom_call.1
= control target key start
LH: loop header
LB: loop body
LE: loop exit
PB: predicated region body
PF: predicated region fallthrough
CT: control target
= control target key end

     0   :  { %8 = vsyncpa [#allocation3], 0  ;;  %s20603_s0 = inlined_call_operand.hbm [shape: f32[16,128], index: 0, kind: input, shape index: {}]   ;;  %s20604_s1 = inlined_call_operand.hbm [shape: f32[16,128,128], index: 1, kind: input, shape index: {}]   ;;  %s20605_s2 = inlined_call_operand.hbm [shape: f32[16,128], index: 2, kind: input, shape index: {}]   ;;  %s20606_s3 = inlined_call_operand.hbm [shape: f32[16,128], index: 3, kind: output, shape index: {}]  }
   0x1   :  { %10 = vsyncpa [#allocation3 + $0x1], 0 }
   0x2   :  { %11 = vsyncpa [#allocation6], 0 }
   0x3   :  { %13 = vsyncpa [#allocation6 + $0x1], 0 }
   0x4   :  { %14 = vsyncpa [#allocation4], 0 }
   0x5   :  { %16 = vsyncpa [#allocation4 + $0x1], 0  ;;  %s16932_s12 = smov 0   ;;  %s16934_s13 = smov 0  }
   0x6   :  { %s16936_s14 = smov 0   ;;  %s16938_s15 = smov 0  }
   0x7 LB: > { %s16953_s16 = sadd.s32 4294967295, %s16900_s15   ;;  %s8558_s17 = sadd.s32 4294967294, %s16900_s15   ;;  %s16900_s15 = sphi %s16938_s15, %s21405_s15   ;;  %s16896_s14 = sphi %s16936_s14, %s21404_s14   ;;  %s16892_s13 = sphi %s16934_s13, %s21403_s13   ;;  %s16888_s12 = sphi %s16932_s12, %s21402_s12  }
   0x8   : > { %s16957_s18 = sadd.s32 1, %s16900_s15   ;;  %s29_s19 = sadd.s32 1, %s16896_s14 }
   0x9   : > { %s26_s20 = ssub.s32 %s16900_s15, %s16957_s18  ;;  %p36_p0 = scmp.ne.s32.totalorder %s16896_s14, %s16892_s13 }
   0xa   : > { %p27_p1 = scmp.eq.s32.totalorder %s26_s20, 0  ;;  %p37_p2 = scmp.eq.s32.totalorder %s16900_s15, 0 }
   0xb   : > { %p42_p3 = scmp.ne.s32.totalorder %s16892_s13, %s16888_s12  ;;  %p43_p4 = scmp.eq.s32.totalorder %s16953_s16, 0 }
   0xc   : > { %s16969_s21 = scalar_select %p27_p1, %s16896_s14, %s29_s19  }
   0xd   : > { %p38_p5 = por %p37_p2, %p36_p0  ;;  %p16971_p6 = por %p43_p4, %p42_p3 }
   0xe   : > { %p118_p7 = scmp.eq.s32.totalorder %s16953_s16, 1  ;;  %p124_p8 = scmp.eq.s32.totalorder %s8558_s17, 1 }
   0xf   : > { %s20823_s22 = scalar_select %p16971_p6, 1, 0 }
  0x10   : > { %p16250_p10 = scmp.lt.s32.totalorder %s16900_s15, 2  ;;  %p16978_p11 = por %p118_p7, %p36_p0 }
  0x11   : > { %p16982_p12 = por %p124_p8, %p42_p3  ;;  %s16987_s25 = sand.u32 1, %s16896_s14  }
  0x12   : > { %s20824_s23 = scalar_select %p16978_p11, 1, 0 }
  0x13   : > { %s20825_s24 = scalar_select %p16982_p12, 1, 0 }
  0x14   : > { %p16989_p13 = pnand %p16250_p10, %p38_p5  ;;  %s162_s27 = sand.u32 1, %s16900_s15  }
  0x15   : > { %s8563_s28 = sshll.u32 %s16987_s25, 10  ;;  %s8579_s29 = sshll.u32 %s16900_s15, 14 }
  0x16   : > { %s20826_s26 = scalar_select %p16989_p13, 1, 0 }
  0x17   : > { %s16999_s5 = scalar_lea.hbm %s20604_s1, %s8579_s29  ;;  %s166_s6 = scalar_lea.vmem [#allocation5], %s8563_s28 }
  0x18   : > { %s174_s7 = sshll.u32 %s166_s6, 4  ;;  %s17004_s8 = scalar_lea.sflag [#allocation6], %s162_s27  ;;  %s17001_s7 = int_to_ptr.vmem [resolvable:$true] %s174_s7 }
  0x19   : > { %s16740_s9 = scalar_lea.hbm %s16999_s5, 16384  ;;  %p17010_p2 = pneg %p16989_p13 }
  0x1a   : > { %p16741_p1 = scmp.ne.s32.totalorder %s16999_s5, %s16740_s9  ;;  %s16745_s19 = scalar_lea.hbm %s20604_s1, 32768 }
  0x1b   : > { %p16746_p5 = scmp.lt.u32.totalorder %s16999_s5, %s20604_s1  ;;  %p16747_p7 = scmp.lt.u32.totalorder %s16745_s19, %s16740_s9 }
  0x1c   : > { %p16743_p3 = pnand %p17010_p2, %p16741_p1  ;;  %p16749_p10 = scmp.lt.u32.totalorder %s16740_s9, %s16999_s5 }
  0x1d   : > { %p16748_p8 = por %p16747_p7, %p16746_p5 }
  0x1e   : > { %p16744_p4 = pneg %p16743_p3 }
  0x1f   : > { %p16750_p9 = por %p16749_p10, %p16748_p8 }
  0x21   : > { %p16751_p0 = pnand %p16750_p9, %p16744_p4 }
  0x23   : > { %16754 = shalt.err (!%p16751_p0)
}
  0x24   : > { %s16755_s27 = scalar_lea.vmem %s17001_s7, 16384  ;;  %s16902_s29 = smov [#allocation5]  }
  0x25   : > { %p16756_p1 = scmp.ne.s32.totalorder %s17001_s7, %s16755_s27  ;;  %s16760_s30 = sshll.u32 %s16902_s29, 4  ;;  %s16761_s30 = int_to_ptr.vmem [resolvable:$false] %s16760_s30 }
  0x26   : > { %s16762_s4 = scalar_lea.vmem %s16761_s30, 32768  ;;  %p16763_p11 = scmp.lt.s32.totalorder %s17001_s7, %s16761_s30 }
  0x27   : > { %p16758_p3 = pnand %p16756_p1, %p17010_p2  ;;  %p16764_p6 = scmp.lt.s32.totalorder %s16762_s4, %s16755_s27 }
  0x29   : > { %p16759_p12 = pneg %p16758_p3  ;;  %p16765_p5 = por %p16764_p6, %p16763_p11 }
  0x2b   : > { %p16766_p7 = pnand %p16765_p5, %p16759_p12 }
  0x2d   : > { %16769 = shalt.err (!%p16766_p7)
}
  0x2e   : > { %s16903_s6 = smov 128   ;;  %s16904_s9 = smov 8  }
  0x2f   : > { %16242 = dma.hbm_to_vmem [thread:$0]  (!%p16989_p13), %s16999_s5, 16384, %s17001_s7, %s17004_s8, %s16903_s6, %s16903_s6, %s16904_s9  }
  0x30   : > { %p200_p9 = scmp.lt.s32.totalorder %s16900_s15, 3  ;;  %s20609_s11 = sshll.u32 %s16987_s25, 3 }
  0x31   : > { %s20610_s17 = sshll.u32 %s16900_s15, 7  ;;  %p20828_p6 = scmp.ge.s32.totalorder %s16900_s15, 1 }
  0x32   : > { %s17048_s27 = scalar_lea.hbm %s20603_s0, %s20610_s17  ;;  %s148_s5 = scalar_lea.vmem [#allocation2], %s20609_s11 }
  0x33   : > { %p17039_p11 = pnand %p20828_p6, %p200_p9  ;;  %s155_s7 = sshll.u32 %s148_s5, 4  ;;  %s156_s7 = int_to_ptr.vmem [resolvable:$true] %s155_s7 }
  0x34   : > { %s145_s29 = scalar_lea.sflag [#allocation3], %s16987_s25  ;;  %s16770_s30 = scalar_lea.hbm %s17048_s27, 128 }
  0x35   : > { %s20829_s19 = scalar_select %p17039_p11, 1, 0 }
  0x36   : > { %p16771_p12 = scmp.ne.s32.totalorder %s17048_s27, %s16770_s30  ;;  %s16775_s9 = scalar_lea.hbm %s20603_s0, 256 }
  0x37   : > { %p16776_p8 = scmp.lt.u32.totalorder %s17048_s27, %s20603_s0  ;;  %p16777_p10 = scmp.lt.u32.totalorder %s16775_s9, %s16770_s30 }
  0x38   : > { %p16773_p0 = pnand %p16771_p12, %p17010_p2  ;;  %p16779_p3 = scmp.lt.u32.totalorder %s16770_s30, %s17048_s27 }
  0x39   : > { %p16778_p1 = por %p16777_p10, %p16776_p8 }
  0x3a   : > { %p16774_p4 = pneg %p16773_p0 }
  0x3b   : > { %p16780_p5 = por %p16779_p3, %p16778_p1 }
  0x3d   : > { %p16781_p7 = pnand %p16780_p5, %p16774_p4 }
  0x3f   : > { %16784 = shalt.err (!%p16781_p7)
}
  0x40   : > { %s16785_s5 = scalar_lea.vmem %s156_s7, 128  ;;  %s16905_s11 = smov [#allocation2]  }
  0x41   : > { %p16786_p9 = scmp.ne.s32.totalorder %s156_s7, %s16785_s5  ;;  %s16790_s17 = sshll.u32 %s16905_s11, 4  ;;  %s16791_s17 = int_to_ptr.vmem [resolvable:$false] %s16790_s17 }
  0x42   : > { %s16792_s4 = scalar_lea.vmem %s16791_s17, 256  ;;  %p16793_p0 = scmp.lt.s32.totalorder %s156_s7, %s16791_s17 }
  0x43   : > { %p16788_p6 = pnand %p16786_p9, %p17010_p2  ;;  %p16794_p11 = scmp.lt.s32.totalorder %s16792_s4, %s16785_s5 }
  0x45   : > { %p16789_p12 = pneg %p16788_p6  ;;  %p16795_p13 = por %p16794_p11, %p16793_p0 }
  0x47   : > { %p16796_p8 = pnand %p16795_p13, %p16789_p12 }
  0x49   : > { %16799 = shalt.err (!%p16796_p8)
}
  0x4a   : > { %p20830_p10 = scmp.ne.s32.totalorder %s20826_s26, 0  ;;  %s20831_s30 = sshll.u32 %s16900_s15, 7 }
  0x4b   : > { %s17075_s20 = scalar_lea.hbm %s20605_s2, %s20831_s30  ;;  %s20832_s11 = sshll.u32 %s16987_s25, 3 }
  0x4c   : > { %16239 = dma.hbm_to_vmem [thread:$0]  (!%p20830_p10), %s17048_s27, 128, %s156_s7, %s145_s29  }
  0x4d   : > { %s188_s17 = scalar_lea.vmem [#allocation7], %s20832_s11  ;;  %s16800_s5 = scalar_lea.hbm %s17075_s20, 128 }
  0x4e   : > { %s195_s28 = sshll.u32 %s188_s17, 4  ;;  %p16801_p13 = scmp.ne.s32.totalorder %s17075_s20, %s16800_s5  ;;  %s196_s28 = int_to_ptr.vmem [resolvable:$true] %s195_s28 }
  0x4f   : > { %s16805_s29 = scalar_lea.hbm %s20605_s2, 256  ;;  %p16806_p1 = scmp.lt.u32.totalorder %s17075_s20, %s20605_s2 }
  0x50   : > { %p16803_p11 = pnand %p16801_p13, %p17010_p2  ;;  %p16807_p3 = scmp.lt.u32.totalorder %s16805_s29, %s16800_s5 }
  0x51   : > { %p16809_p7 = scmp.lt.u32.totalorder %s16800_s5, %s17075_s20 }
  0x52   : > { %p16804_p4 = pneg %p16803_p11  ;;  %p16808_p5 = por %p16807_p3, %p16806_p1 }
  0x54   : > { %p16810_p9 = por %p16809_p7, %p16808_p5 }
  0x56   : > { %p16811_p6 = pnand %p16810_p9, %p16804_p4 }
  0x58   : > { %16814 = shalt.err (!%p16811_p6)
}
  0x59   : > { %s16815_s25 = scalar_lea.vmem %s196_s28, 128  ;;  %s16906_s6 = smov [#allocation7]  }
  0x5a   : > { %p16816_p12 = scmp.ne.s32.totalorder %s196_s28, %s16815_s25  ;;  %s16820_s9 = sshll.u32 %s16906_s6, 4  ;;  %s16821_s9 = int_to_ptr.vmem [resolvable:$false] %s16820_s9 }
  0x5b   : > { %s16822_s11 = scalar_lea.vmem %s16821_s9, 256  ;;  %p16823_p13 = scmp.lt.s32.totalorder %s196_s28, %s16821_s9 }
  0x5c   : > { %p16818_p0 = pnand %p16816_p12, %p17010_p2  ;;  %p16824_p11 = scmp.lt.s32.totalorder %s16822_s11, %s16815_s25 }
  0x5e   : > { %p16819_p8 = pneg %p16818_p0  ;;  %p16825_p10 = por %p16824_p11, %p16823_p13 }
  0x60   : > { %p16826_p1 = pnand %p16825_p10, %p16819_p8 }
  0x62   : > { %16829 = shalt.err (!%p16826_p1)
}
  0x63   : > { %p20833_p3 = scmp.ne.s32.totalorder %s20826_s26, 0  ;;  %p20834_p4 = scmp.ne.s32.totalorder %s20829_s19, 0 }
  0x65   : > { %16245 = dma.hbm_to_vmem [thread:$0]  (!%p20833_p3), %s17075_s20, 128, %s196_s28, %s17004_s8  }
  0x66   : > { %204 = sbr.rel (%p20834_p4) target bundleno = 2821 (0xb05), region = 32 }
  0x6d   : > { %s17100_s10 = sand.u32 1, %s16892_s13   ;;  %p20835_p2 = scmp.ne.s32.totalorder %s20823_s22, 0 }
  0x6e   : > { %s17103_s17 = sshll.u32 %s17100_s10, 3  ;;  %s207_s5 = scalar_lea.sflag [#allocation3], %s17100_s10 }
  0x6f   : > { %s210_s27 = scalar_lea.vmem [#allocation2], %s17103_s17 }
  0x70   : > { %16875 = dma.done.wait (%p20835_p2), %s207_s5, 128  }
  0x71   : > { %16877 = vsyncadd (%p20835_p2), %s207_s5, 4294967168  ;;  %s215_s26 = sand.u32 1, %s16953_s16   ;;  %s8571_s8 = sshll.u32 %s17100_s10, 10 }
  0x72   : > { %s216_s19 = scalar_lea.sflag [#allocation6], %s215_s26  ;;  %s17113_s20 = scalar_lea.vmem [#allocation5], %s8571_s8 }
  0x73   : > { %16879 = dma.done.wait (%p20835_p2), %s216_s19, 16512  }
  0x74   : > { %16881 = vsyncadd (%p20835_p2), %s216_s19, 4294950784  ;;  %v262_v0 = vld [vmem:[%s17113_s20] sm:$0xff]  ;;  %v263_v2 = vld [vmem:[%s17113_s20 + $0x8] sm:$0xff]  ;;  %s228_s22 = scalar_lea.vmem [#allocation7], %s17103_s17  ;;  %vm16909_vm0 = vmmov 0   ;;  %s8575_s28 = sshll.u32 %s16953_s16, 7 }
  0x75   : > { %v278_v1 = vld [vmem:[%s17113_s20 + $0x80] sm:$0xff]  ;;  %v17122_v3 = vmul.f32 0.02, %v262_v0  ;;  %v279_v5 = vld [vmem:[%s17113_s20 + $0x88] sm:$0xff]  ;;  %v264_v6 = vld [vmem:[%s17113_s20 + $0x10] sm:$0xff]  ;;  %v13860_v7 = vpack.c.bf16 %v263_v2, %v262_v0  ;;  %s260_s7 = scalar_lea.vmem [#allocation8], %s17103_s17  ;;  %s20559_s25 = scalar_lea.hbm %s20606_s3, %s8575_s28 }
  0x76   : > { %v17124_v4 = vmul.f32 0.02, %v278_v1  ;;  %v17128_v8 = vmul.f32 0.02, %v263_v2  ;;  %v17130_v9 = vmul.f32 0.02, %v279_v5  ;;  %v13892_v12 = vpack.c.bf16 %v279_v5, %v278_v1 }
  0x77   : > { %20836 = vst [vmem:[#allocation12_spill] sm:$0xff] %v17122_v3  ;;  %v280_v10 = vld [vmem:[%s17113_s20 + $0x90] sm:$0xff]  ;;  %v265_v11 = vld [vmem:[%s17113_s20 + $0x18] sm:$0xff]  ;;  %v17136_v14 = vmul.f32 0.02, %v264_v6  ;;  %v266_v17 = vld [vmem:[%s17113_s20 + $0x20] sm:$0xff]  ;;  %13861 = vmatprep.subr.bf16.mxu0 %v13860_v7 }
  0x78   : > { %20837 = vst [vmem:[#allocation13_spill] sm:$0xff] %v17124_v4  ;;  %20838 = vst [vmem:[#allocation14_spill] sm:$0xff] %v17128_v8  ;;  %v16290_v13 = vpack.i.bf16 %v17124_v4, %v17122_v3  ;;  %v17138_v15 = vmul.f32 0.02, %v280_v10  ;;  %v281_v16 = vld [vmem:[%s17113_s20 + $0x98] sm:$0xff]  ;;  %v13864_v18 = vpack.c.bf16 %v265_v11, %v264_v6  ;;  %v282_v22 = vld [vmem:[%s17113_s20 + $0xa0] sm:$0xff]  ;;  %13893 = vmatprep.subr.bf16.mxu1 %v13892_v12  ;;  %13863 = vmatpush3.bf16.msra.mxu0 %v13860_v7 }
  0x79   : > { %20839 = vst [vmem:[#allocation15_spill] sm:$0xff] %v17130_v9  ;;  %20840 = vst [vmem:[#allocation16_spill] sm:$0xff] %v17136_v14  ;;  %v17146_v21 = vmul.f32 0.02, %v265_v11  ;;  %v267_v23 = vld [vmem:[%s17113_s20 + $0x28] sm:$0xff]  ;;  %v16292_v25 = vpack.i.bf16 %v17130_v9, %v17128_v8  ;;  %13895 = vmatpush3.bf16.msra.mxu1 %v13892_v12  ;;  %v268_v32 = vld [vmem:[%s17113_s20 + $0x30] sm:$0xff]  ;;  %v13896_v34 = vpack.c.bf16 %v281_v16, %v280_v10 }
  0x7a   : > { %20841 = vst [vmem:[#allocation17_spill] sm:$0xff] %v17138_v15  ;;  %v283_v24 = vld [vmem:[%s17113_s20 + $0xa8] sm:$0xff]  ;;  %16291 = vxpose.xlu0.b32.start [1/16] %v16290_v13, 128  ;;  %v17153_v26 = vmul.f32 0.02, %v281_v16  ;;  %v17155_v27 = vmul.f32 0.02, %v266_v17  ;;  %13865 = vmatprep.subr.bf16.mxu0 %v13864_v18  ;;  %v16294_v40 = vpack.i.bf16 %v17138_v15, %v17136_v14  ;;  %v13868_v50 = vpack.c.bf16 %v267_v23, %v266_v17 }
  0x7b   : > { %20842 = vst [vmem:[#allocation18_spill] sm:$0xff] %v17146_v21  ;;  %v17157_v28 = vmul.f32 0.02, %v282_v22  ;;  %v17161_v30 = vmul.f32 0.02, %v267_v23  ;;  %v284_v33 = vld [vmem:[%s17113_s20 + $0xb0] sm:$0xff]  ;;  %13897 = vmatprep.subr.bf16.mxu1 %v13896_v34  ;;  %v13900_v59 = vpack.c.bf16 %v283_v24, %v282_v22 }
  0x7c   : > { %20843 = vst [vmem:[#allocation19_spill] sm:$0xff] %v17153_v26  ;;  %20844 = vst [vmem:[#allocation20_spill] sm:$0xff] %v17155_v27  ;;  %v17163_v31 = vmul.f32 0.02, %v283_v24  ;;  %v17169_v36 = vmul.f32 0.02, %v268_v32  ;;  %13867 = vmatpush3.bf16.msra.mxu0 %v13864_v18  ;;  %v16296_v60 = vpack.i.bf16 %v17153_v26, %v17146_v21 }
  0x7d   : > { %20845 = vst [vmem:[#allocation21_spill] sm:$0xff] %v17157_v28  ;;  %20846 = vst [vmem:[#allocation22_spill] sm:$0xff] %v17161_v30  ;;  %v269_v37 = vld [vmem:[%s17113_s20 + $0x38] sm:$0xff]  ;;  %v17174_v39 = vld [vmem:[%s17113_s20 + $0x100] sm:$0xff]  ;;  %v17182_v43 = vmul.f32 0.02, %v284_v33  ;;  %13899 = vmatpush3.bf16.msra.mxu1 %v13896_v34  ;;  %13869 = vmatprep.subr.bf16.mxu0 %v13868_v50 }
  0x7e   : > { %20847 = vst [vmem:[#allocation23_spill] sm:$0xff] %v17163_v31  ;;  %20848 = vst [vmem:[#allocation24_spill] sm:$0xff] %v17169_v36  ;;  %v285_v38 = vld [vmem:[%s17113_s20 + $0xb8] sm:$0xff]  ;;  %v17185_v44 = vld [vmem:[%s17113_s20 + $0x180] sm:$0xff]  ;;  %16293 = vxpose.xlu0.b32.cont [2/16] %v16292_v25, 128  ;;  %v17191_v47 = vmul.f32 0.02, %v269_v37  ;;  %13901 = vmatprep.subr.bf16.mxu1 %v13900_v59  ;;  %v13872_v10 = vpack.c.bf16 %v269_v37, %v268_v32  ;;  %v16300_v54 = vpack.i.bf16 %v17163_v31, %v17161_v30 }
  0x7f   : > { %20849 = vst [vmem:[#allocation25_spill] sm:$0xff] %v17182_v43  ;;  %v270_v45 = vld [vmem:[%s17113_s20 + $0x40] sm:$0xff]  ;;  %v17193_v48 = vmul.f32 0.02, %v285_v38  ;;  %v17196_v49 = vmul.f32 0.02, %v17174_v39  ;;  %v13904_v11 = vpack.c.bf16 %v285_v38, %v284_v33 }
  0x80   : > { %v17189_v46 = vld [vmem:[%s17113_s20 + $0xc0] sm:$0xff]  ;;  %20850 = vst [vmem:[#allocation26_spill] sm:$0xff] %v17191_v47  ;;  %v17199_v51 = vmul.f32 0.02, %v17185_v44  ;;  %v17201_v52 = vmul.f32 0.02, %v270_v45  ;;  %13871 = vmatpush3.bf16.msra.mxu0 %v13868_v50 }
  0x81   : > { %20851 = vst [vmem:[#allocation27_spill] sm:$0xff] %v17193_v48  ;;  %20852 = vst [vmem:[#allocation28_spill] sm:$0xff] %v17196_v49  ;;  %v17208_v55 = vmul.f32 0.02, %v17189_v46  ;;  %v17211_v56 = vld [vmem:[%s17113_s20 + $0x108] sm:$0xff]  ;;  %v17229_v1 = vld [vmem:[%s17113_s20 + $0x110] sm:$0xff]  ;;  %13903 = vmatpush3.bf16.msra.mxu1 %v13900_v59  ;;  %13873 = vmatprep.subr.bf16.mxu0 %v13872_v10  ;;  %v16298_v59 = vpack.i.bf16 %v17157_v28, %v17155_v27  ;;  %v16302_v28 = vpack.i.bf16 %v17182_v43, %v17169_v36 }
  0x82   : > { %20853 = vst [vmem:[#allocation29_spill] sm:$0xff] %v17199_v51  ;;  %20854 = vst [vmem:[#allocation30_spill] sm:$0xff] %v17201_v52  ;;  %v17214_v57 = vld [vmem:[%s17113_s20 + $0x188] sm:$0xff]  ;;  %v16402_v61 = vpack.i.bf16 %v17199_v51, %v17196_v49  ;;  %v17222_v62 = vmul.f32 0.02, %v17211_v56  ;;  %16295 = vxpose.xlu0.b32.cont [3/16] %v16294_v40, 128  ;;  %v17236_v6 = vld [vmem:[%s17113_s20 + $0x190] sm:$0xff]  ;;  %13905 = vmatprep.subr.bf16.mxu1 %v13904_v11  ;;  %v16304_v36 = vpack.i.bf16 %v17193_v48, %v17191_v47 }
  0x83   : > { %20855 = vst [vmem:[#allocation31_spill] sm:$0xff] %v17208_v55  ;;  %v271_v58 = vld [vmem:[%s17113_s20 + $0x48] sm:$0xff]  ;;  %v17225_v63 = vmul.f32 0.02, %v17214_v57  ;;  %v272_v7 = vld [vmem:[%s17113_s20 + $0x50] sm:$0xff]  ;;  %v17250_v22 = vld [vmem:[%s17113_s20 + $0x118] sm:$0xff] }
  0x84   : > { %20856 = vst [vmem:[#allocation32_spill] sm:$0xff] %v17222_v62  ;;  %v287_v0 = vld [vmem:[%s17113_s20 + $0xc8] sm:$0xff]  ;;  %v17231_v2 = vmul.f32 0.02, %v271_v58  ;;  %16403 = vxpose.xlu1.b32.start [1/16] %v16402_v61, 128  ;;  %v17246_v17 = vmul.f32 0.02, %v17229_v1  ;;  %13875 = vmatpush3.bf16.msra.mxu0 %v13872_v10  ;;  %v13876_v50 = vpack.c.bf16 %v271_v58, %v270_v45 }
  0x85   : > { %20857 = vst [vmem:[#allocation33_spill] sm:$0xff] %v17225_v63  ;;  %v17233_v5 = vmul.f32 0.02, %v287_v0  ;;  %v16404_v13 = vpack.i.bf16 %v17225_v63, %v17222_v62  ;;  %v288_v18 = vld [vmem:[%s17113_s20 + $0xd0] sm:$0xff]  ;;  %v17253_v23 = vld [vmem:[%s17113_s20 + $0x198] sm:$0xff]  ;;  %v17270_v40 = vld [vmem:[%s17113_s20 + $0x120] sm:$0xff]  ;;  %13907 = vmatpush3.bf16.msra.mxu1 %v13904_v11  ;;  %v13908_v53 = vpack.c.bf16 %v287_v0, %v17189_v46 }
  0x86   : > { %20858 = vst [vmem:[#allocation34_spill] sm:$0xff] %v17231_v2  ;;  %20860 = vst [vmem:[#allocation36_spill] sm:$0xff] %v17246_v17  ;;  %v17260_v32 = vmul.f32 0.02, %v17236_v6  ;;  %v273_v33 = vld [vmem:[%s17113_s20 + $0x58] sm:$0xff]  ;;  %16297 = vxpose.xlu0.b32.cont [4/16] %v16296_v60, 128  ;;  %v17288_v60 = vld [vmem:[%s17113_s20 + $0x1a0] sm:$0xff]  ;;  %13877 = vmatprep.subr.bf16.mxu0 %v13876_v50 }
  0x87   : > { %20859 = vst [vmem:[#allocation35_spill] sm:$0xff] %v17233_v5  ;;  %v289_v34 = vld [vmem:[%s17113_s20 + $0xd8] sm:$0xff]  ;;  %v17264_v37 = vmul.f32 0.02, %v272_v7  ;;  %v17267_v38 = vmul.f32 0.02, %v17250_v22  ;;  %13909 = vmatprep.subr.bf16.mxu1 %v13908_v53 }
  0x88   : > { %20861 = vst [vmem:[#allocation37_spill] sm:$0xff] %v17260_v32  ;;  %v17274_v61 = vmul.f32 0.02, %v288_v18  ;;  %v17277_v12 = vmul.f32 0.02, %v17253_v23  ;;  %16405 = vxpose.xlu1.b32.cont [2/16] %v16404_v13, 128  ;;  %v16406_v24 = vpack.i.bf16 %v17260_v32, %v17246_v17  ;;  %v274_v10 = vld [vmem:[%s17113_s20 + $0x60] sm:$0xff]  ;;  %13879 = vmatpush3.bf16.msra.mxu0 %v13876_v50  ;;  %v13880_v32 = vpack.c.bf16 %v273_v33, %v272_v7 }
  0x89   : > { %20862 = vst [vmem:[#allocation38_spill] sm:$0xff] %v17264_v37  ;;  %20863 = vst [vmem:[#allocation39_spill] sm:$0xff] %v17267_v38  ;;  %v17279_v16 = vmul.f32 0.02, %v289_v34  ;;  %v17285_v58 = vmul.f32 0.02, %v273_v33  ;;  %v13912_v17 = vpack.c.bf16 %v289_v34, %v288_v18  ;;  %13911 = vmatpush3.bf16.msra.mxu1 %v13908_v53 }
  0x8a   : > { %20864 = vst [vmem:[#allocation40_spill] sm:$0xff] %v17274_v61  ;;  %20865 = vst [vmem:[#allocation41_spill] sm:$0xff] %v17277_v12  ;;  %v17292_v25 = vld [vmem:[%s17113_s20 + $0xe0] sm:$0xff]  ;;  %v17302_v41 = vmul.f32 0.02, %v17270_v40  ;;  %v17305_v42 = vld [vmem:[%s17113_s20 + $0x128] sm:$0xff]  ;;  %16299 = vxpose.xlu0.b32.cont [5/16] %v16298_v59, 128  ;;  %v16408_v51 = vpack.i.bf16 %v17277_v12, %v17267_v38  ;;  %13881 = vmatprep.subr.bf16.mxu0 %v13880_v32 }
  0x8b   : > { %20866 = vst [vmem:[#allocation42_spill] sm:$0xff] %v17279_v16  ;;  %20867 = vst [vmem:[#allocation43_spill] sm:$0xff] %v17285_v58  ;;  %v17308_v35 = vld [vmem:[%s17113_s20 + $0x1a8] sm:$0xff]  ;;  %v17314_v0 = vmul.f32 0.02, %v17288_v60  ;;  %v17329_v20 = vld [vmem:[%s17113_s20 + $0x130] sm:$0xff]  ;;  %13913 = vmatprep.subr.bf16.mxu1 %v13912_v17 }
  0x8c   : > { %20868 = vst [vmem:[#allocation44_spill] sm:$0xff] %v17302_v41  ;;  %v275_v11 = vld [vmem:[%s17113_s20 + $0x68] sm:$0xff]  ;;  %v17316_v13 = vmul.f32 0.02, %v274_v10  ;;  %v17319_v45 = vmul.f32 0.02, %v17292_v25  ;;  %16407 = vxpose.xlu1.b32.cont [3/16] %v16406_v24, 128  ;;  %13883 = vmatpush3.bf16.msra.mxu0 %v13880_v32 }
  0x8d   : > { %20869 = vst [vmem:[#allocation45_spill] sm:$0xff] %v17314_v0  ;;  %v17322_v29 = vmul.f32 0.02, %v17305_v42  ;;  %v17325_v46 = vmul.f32 0.02, %v17308_v35  ;;  %v291_v19 = vld [vmem:[%s17113_s20 + $0xe8] sm:$0xff]  ;;  %v13884_v27 = vpack.c.bf16 %v275_v11, %v274_v10  ;;  %v16410_v30 = vpack.i.bf16 %v17314_v0, %v17302_v41  ;;  %13915 = vmatpush3.bf16.msra.mxu1 %v13912_v17 }
  0x8e   : > { %20870 = vst [vmem:[#allocation46_spill] sm:$0xff] %v17316_v13  ;;  %20871 = vst [vmem:[#allocation47_spill] sm:$0xff] %v17319_v45  ;;  %v17333_v50 = vmul.f32 0.02, %v275_v11  ;;  %v17335_v59 = vmul.f32 0.02, %v291_v19  ;;  %16301 = vxpose.xlu0.b32.cont [6/16] %v16300_v54, 128  ;;  %v13916_v15 = vpack.c.bf16 %v291_v19, %v17292_v25 }
  0x8f   : > { %20872 = vst [vmem:[#allocation48_spill] sm:$0xff] %v17322_v29  ;;  %20873 = vst [vmem:[#allocation49_spill] sm:$0xff] %v17325_v46  ;;  %v17338_v63 = vld [vmem:[%s17113_s20 + $0x1b0] sm:$0xff]  ;;  %v17347_v24 = vld [vmem:[%s17113_s20 + $0x138] sm:$0xff]  ;;  %v17357_v12 = vmul.f32 0.02, %v17329_v20  ;;  %13885 = vmatprep.subr.bf16.mxu0 %v13884_v27  ;;  %v16412_v17 = vpack.i.bf16 %v17325_v46, %v17322_v29 }
  0x90   : > { %20874 = vst [vmem:[#allocation50_spill] sm:$0xff] %v17333_v50  ;;  %20875 = vst [vmem:[#allocation51_spill] sm:$0xff] %v17335_v59  ;;  %v276_v49 = vld [vmem:[%s17113_s20 + $0x70] sm:$0xff]  ;;  %v17350_v33 = vld [vmem:[%s17113_s20 + $0x1b8] sm:$0xff]  ;;  %v17360_v62 = vmul.f32 0.02, %v17338_v63  ;;  %16409 = vxpose.xlu1.b32.cont [4/16] %v16408_v51, 128  ;;  %13887 = vmatpush3.bf16.msra.mxu0 %v13884_v27 }
  0x91   : > { %v292_v18 = vld [vmem:[%s17113_s20 + $0xf0] sm:$0xff]  ;;  %20876 = vst [vmem:[#allocation52_spill] sm:$0xff] %v17357_v12  ;;  %v277_v7 = vld [vmem:[%s17113_s20 + $0x78] sm:$0xff]  ;;  %v17366_v34 = vmul.f32 0.02, %v276_v49  ;;  %v17372_v31 = vld [vmem:[%s17113_s20 + $0x140] sm:$0xff]  ;;  %13917 = vmatprep.subr.bf16.mxu1 %v13916_v15 }
  0x92   : > { %20877 = vst [vmem:[#allocation53_spill] sm:$0xff] %v17360_v62  ;;  %v293_v38 = vld [vmem:[%s17113_s20 + $0xf8] sm:$0xff]  ;;  %v17369_v53 = vmul.f32 0.02, %v17347_v24  ;;  %v17376_v32 = vmul.f32 0.02, %v292_v18  ;;  %16303 = vxpose.xlu0.b32.cont [7/16] %v16302_v28, 128  ;;  %13919 = vmatpush3.bf16.msra.mxu1 %v13916_v15  ;;  %v13888_v46 = vpack.c.bf16 %v277_v7, %v276_v49  ;;  %v16306_v49 = vpack.i.bf16 %v17208_v55, %v17201_v52 }
  0x93   : > { %20878 = vst [vmem:[#allocation54_spill] sm:$0xff] %v17366_v34  ;;  %v17379_v54 = vmul.f32 0.02, %v17350_v33  ;;  %v17381_v43 = vmul.f32 0.02, %v293_v38  ;;  %v17390_v11 = vld [vmem:[%s17113_s20 + $0x1c0] sm:$0xff]  ;;  %v13920_v29 = vpack.c.bf16 %v293_v38, %v292_v18  ;;  %v16414_v18 = vpack.i.bf16 %v17360_v62, %v17357_v12 }
  0x94   : > { %20879 = vst [vmem:[#allocation55_spill] sm:$0xff] %v17369_v53  ;;  %20880 = vst [vmem:[#allocation56_spill] sm:$0xff] %v17376_v32  ;;  %v17387_v10 = vmul.f32 0.02, %v277_v7  ;;  %v17393_v0 = vld [vmem:[%s17113_s20 + $0x200] sm:$0xff]  ;;  %v17396_v41 = vld [vmem:[%s17113_s20 + $0x208] sm:$0xff]  ;;  %16411 = vxpose.xlu1.b32.cont [5/16] %v16410_v30, 128  ;;  %13889 = vmatprep.subr.bf16.mxu0 %v13888_v46  ;;  %v16308_v62 = vpack.i.bf16 %v17233_v5, %v17231_v2  ;;  %v17507_v5 = vpack.c.bf16 %v17211_v56, %v17174_v39 }
  0x95   : > { %20881 = vst [vmem:[#allocation57_spill] sm:$0xff] %v17379_v54  ;;  %20882 = vst [vmem:[#allocation58_spill] sm:$0xff] %v17381_v43  ;;  %v17406_v47 = vmul.f32 0.02, %v17372_v31  ;;  %v17409_v26 = vld [vmem:[%s17113_s20 + $0x280] sm:$0xff]  ;;  %v17412_v14 = vld [vmem:[%s17113_s20 + $0x288] sm:$0xff]  ;;  %13921 = vmatprep.subr.bf16.mxu1 %v13920_v29  ;;  %13891 = vmatpush3.bf16.msra.mxu0 %v13888_v46  ;;  %v16416_v52 = vpack.i.bf16 %v17379_v54, %v17369_v53  ;;  %v17520_v54 = vpack.c.bf16 %v17214_v57, %v17185_v44 }
  0x96   : > { %20883 = vst [vmem:[#allocation59_spill] sm:$0xff] %v17387_v10  ;;  %20884 = vst [vmem:[#allocation60_spill] sm:$0xff] %v17393_v0  ;;  %v17415_v21 = vld [vmem:[%s17113_s20 + $0x148] sm:$0xff]  ;;  %v17420_v25 = vmul.f32 0.02, %v17390_v11  ;;  %v17446_v30 = vld [vmem:[%s17113_s20 + $0x150] sm:$0xff]  ;;  %16305 = vxpose.xlu0.b32.cont [8/16] %v16304_v36, 128  ;;  %13923 = vmatpush3.bf16.msra.mxu1 %v13920_v29  ;;  %v16310_v39 = vpack.i.bf16 %v17274_v61, %v17264_v37  ;;  %v17544_v61 = vpack.c.bf16 %v17250_v22, %v17229_v1 }
  0x97   : > { %20885 = vst [vmem:[#allocation61_spill] sm:$0xff] %v17396_v41  ;;  %20886 = vst [vmem:[#allocation62_spill] sm:$0xff] %v17406_v47  ;;  %v17423_v48 = vmul.f32 0.02, %v17393_v0  ;;  %v17426_v51 = vmul.f32 0.02, %v17396_v41  ;;  %13925 = vmatprep.subr.bf16.mxu0 %v17507_v5  ;;  %13957 = vmatprep.subr.bf16.mxu1 %v17520_v54  ;;  %v16312_v22 = vpack.i.bf16 %v17279_v16, %v17285_v58 }
  0x98   : > { %20887 = vst [vmem:[#allocation63_spill] sm:$0xff] %v17409_v26  ;;  %20888 = vst [vmem:[#allocation64_spill] sm:$0xff] %v17412_v14  ;;  %v17429_v27 = vmul.f32 0.02, %v17409_v26  ;;  %v17432_v28 = vmul.f32 0.02, %v17412_v14  ;;  %16413 = vxpose.xlu1.b32.cont [6/16] %v16412_v17, 128  ;;  %v16418_v57 = vpack.i.bf16 %v17420_v25, %v17406_v47  ;;  %v17595_v58 = vpack.c.bf16 %v17308_v35, %v17288_v60 }
  0x99   : > { %20889 = vst [vmem:[#allocation65_spill] sm:$0xff] %v17420_v25  ;;  %20890 = vst [vmem:[#allocation66_spill] sm:$0xff] %v17423_v48  ;;  %v17435_v19 = vld [vmem:[%s17113_s20 + $0x1c8] sm:$0xff]  ;;  %v17440_v9 = vmul.f32 0.02, %v17415_v21  ;;  %v17451_v14 = vld [vmem:[%s17113_s20 + $0x1d0] sm:$0xff]  ;;  %v17605_v16 = vpack.c.bf16 %v17347_v24, %v17329_v20  ;;  %v16316_v35 = vpack.i.bf16 %v17335_v59, %v17333_v50 }
  0x9a   : > { %20891 = vst [vmem:[#allocation67_spill] sm:$0xff] %v17426_v51  ;;  %20892 = vst [vmem:[#allocation68_spill] sm:$0xff] %v17429_v27  ;;  %v17443_v3 = vmul.f32 0.02, %v17435_v19  ;;  %v17454_v26 = vld [vmem:[%s17113_s20 + $0x158] sm:$0xff]  ;;  %v17480_v7 = vld [vmem:[%s17113_s20 + $0x160] sm:$0xff]  ;;  %16307 = vxpose.xlu0.b32.cont [9/16] %v16306_v49, 128  ;;  %v17621_v20 = vpack.c.bf16 %v17435_v19, %v17390_v11 }
  0x9b   : > { %20893 = vst [vmem:[#allocation69_spill] sm:$0xff] %v17432_v28  ;;  %20894 = vst [vmem:[#allocation70_spill] sm:$0xff] %v17440_v9  ;;  %v17457_v15 = vld [vmem:[%s17113_s20 + $0x1d8] sm:$0xff]  ;;  %v17468_v8 = vmul.f32 0.02, %v17446_v30  ;;  %v17485_v17 = vld [vmem:[%s17113_s20 + $0x1e0] sm:$0xff] }
  0x9c   : > { %20895 = vst [vmem:[#allocation71_spill] sm:$0xff] %v17443_v3  ;;  %v17471_v36 = vmul.f32 0.02, %v17454_v26  ;;  %v17474_v4 = vmul.f32 0.02, %v17451_v14  ;;  %v17492_v12 = vld [vmem:[%s17113_s20 + $0x168] sm:$0xff]  ;;  %16415 = vxpose.xlu1.b32.cont [7/16] %v16414_v18, 128 }
  0x9d   : > { %20896 = vst [vmem:[#allocation72_spill] sm:$0xff] %v17468_v8  ;;  %v17477_v38 = vmul.f32 0.02, %v17457_v15  ;;  %v17495_v55 = vld [vmem:[%s17113_s20 + $0x1e8] sm:$0xff]  ;;  %v17500_v46 = vmul.f32 0.02, %v17480_v7  ;;  %v17639_v24 = vpack.c.bf16 %v17492_v12, %v17480_v7 }
  0x9e   : > { %20897 = vst [vmem:[#allocation73_spill] sm:$0xff] %v17471_v36  ;;  %20898 = vst [vmem:[#allocation74_spill] sm:$0xff] %v17474_v4  ;;  %v17503_v49 = vmul.f32 0.02, %v17492_v12  ;;  %v17510_v29 = vmul.f32 0.02, %v17485_v17  ;;  %16309 = vxpose.xlu0.b32.cont [10/16] %v16308_v62, 128 }
  0x9f   : > { %20899 = vst [vmem:[#allocation75_spill] sm:$0xff] %v17477_v38  ;;  %20900 = vst [vmem:[#allocation76_spill] sm:$0xff] %v17500_v46  ;;  %v17513_v2 = vmul.f32 0.02, %v17495_v55  ;;  %v17516_v18 = vld [vmem:[%s17113_s20 + $0x170] sm:$0xff]  ;;  %v309_v44 = vld [vmem:[%s17113_s20 + $0x178] sm:$0xff]  ;;  %v16424_v60 = vpack.i.bf16 %v17477_v38, %v17471_v36 }
  0xa0   : > { %20901 = vst [vmem:[#allocation77_spill] sm:$0xff] %v17503_v49  ;;  %20902 = vst [vmem:[#allocation78_spill] sm:$0xff] %v17507_v5  ;;  %v17525_v41 = vld [vmem:[%s17113_s20 + $0x1f0] sm:$0xff]  ;;  %16417 = vxpose.xlu1.b32.cont [8/16] %v16416_v52, 128  ;;  %v17537_v53 = vmul.f32 0.02, %v17516_v18  ;;  %v325_v62 = vld [vmem:[%s17113_s20 + $0x1f8] sm:$0xff]  ;;  %v17556_v52 = vpack.c.bf16 %v17253_v23, %v17236_v6  ;;  %v16420_v23 = vpack.i.bf16 %v17443_v3, %v17440_v9 }
  0xa1   : > { %20903 = vst [vmem:[#allocation79_spill] sm:$0xff] %v17510_v29  ;;  %20904 = vst [vmem:[#allocation80_spill] sm:$0xff] %v17513_v2  ;;  %v17540_v5 = vmul.f32 0.02, %v309_v44  ;;  %v17547_v56 = vmul.f32 0.02, %v17525_v41  ;;  %v16314_v3 = vpack.i.bf16 %v17319_v45, %v17316_v13  ;;  %v16422_v9 = vpack.i.bf16 %v17474_v4, %v17468_v8 }
  0xa2   : > { %20905 = vst [vmem:[#allocation81_spill] sm:$0xff] %v17520_v54  ;;  %20906 = vst [vmem:[#allocation82_spill] sm:$0xff] %v17537_v53  ;;  %v17549_v37 = vmul.f32 0.02, %v325_v62  ;;  %v17552_v54 = vld [vmem:[%s17113_s20 + $0x300] sm:$0xff]  ;;  %v17561_v47 = vld [vmem:[%s17113_s20 + $0x308] sm:$0xff]  ;;  %16311 = vxpose.xlu0.b32.cont [11/16] %v16310_v39, 128  ;;  %v17650_v11 = vpack.c.bf16 %v309_v44, %v17516_v18 }
  0xa3   : > { %20907 = vst [vmem:[#allocation83_spill] sm:$0xff] %v17540_v5  ;;  %20908 = vst [vmem:[#allocation84_spill] sm:$0xff] %v17544_v61  ;;  %v17564_v0 = vld [vmem:[%s17113_s20 + $0x380] sm:$0xff]  ;;  %v17567_v1 = vld [vmem:[%s17113_s20 + $0x388] sm:$0xff]  ;;  %v17574_v28 = vmul.f32 0.02, %v17552_v54  ;;  %v17591_v61 = vpack.c.bf16 %v17305_v42, %v17270_v40  ;;  %v17609_v42 = vpack.c.bf16 %v17350_v33, %v17338_v63  ;;  %v17615_v40 = vpack.c.bf16 %v17415_v21, %v17372_v31 }
  0xa4   : > { %20909 = vst [vmem:[#allocation85_spill] sm:$0xff] %v17547_v56  ;;  %20910 = vst [vmem:[#allocation86_spill] sm:$0xff] %v17549_v37  ;;  %v17577_v6 = vmul.f32 0.02, %v17561_v47  ;;  %16419 = vxpose.xlu1.b32.cont [9/16] %v16418_v57, 128  ;;  %v17582_v25 = vmul.f32 0.02, %v17564_v0  ;;  %v17627_v63 = vpack.c.bf16 %v17454_v26, %v17446_v30  ;;  %v17633_v21 = vpack.c.bf16 %v17457_v15, %v17451_v14 }
  0xa5   : > { %20911 = vst [vmem:[#allocation87_spill] sm:$0xff] %v17574_v28  ;;  %v17585_v39 = vmul.f32 0.02, %v17567_v1  ;;  %v16320_v31 = vpack.i.bf16 %v17381_v43, %v17387_v10  ;;  %v16428_v26 = vpack.i.bf16 %v17513_v2, %v17503_v49  ;;  %v17645_v33 = vpack.c.bf16 %v17495_v55, %v17485_v17  ;;  %v328_v19 = vld [vmem:[%s17113_s20 + $0x210] sm:$0xff]  ;;  %v20915_v55 = vld [vmem:[#allocation69_spill] sm:$0xff]  ;;  %v20918_v18 = vld [vmem:[#allocation60_spill] sm:$0xff] }
  0xa6   : > { %20912 = vst [vmem:[#allocation88_spill] sm:$0xff] %v17577_v6  ;;  %20913 = vst [vmem:[#allocation89_spill] sm:$0xff] %v17582_v25  ;;  %16313 = vxpose.xlu0.b32.cont [12/16] %v16312_v22, 128  ;;  %v16514_v14 = vpack.i.bf16 %v17429_v27, %v17423_v48  ;;  %v344_v12 = vld [vmem:[%s17113_s20 + $0x290] sm:$0xff]  ;;  %v16430_v30 = vpack.i.bf16 %v17547_v56, %v17537_v53  ;;  %v17657_v15 = vpack.c.bf16 %v325_v62, %v17525_v41  ;;  %v20919_v44 = vld [vmem:[#allocation61_spill] sm:$0xff]  ;;  %s8445_s29 = sshll.u32 %s260_s7, 4  ;;  %s8432_s6 = scalar_lea.sflag [#allocation4], %s17100_s10  ;;  %s20561_s29 = int_to_ptr.vmem [resolvable:$true] %s8445_s29 }
  0xa7   : > { %20914 = vst [vmem:[#allocation90_spill] sm:$0xff] %v17585_v39  ;;  %v16516_v7 = vpack.i.bf16 %v20915_v55, %v17426_v51  ;;  %v17661_v17 = vmul.f32 0.02, %v328_v19  ;;  %v17663_v22 = vmul.f32 0.02, %v344_v12  ;;  %v329_v41 = vld [vmem:[%s17113_s20 + $0x218] sm:$0xff] }
  0xa8   : > { %16421 = vxpose.xlu1.b32.cont [10/16] %v16420_v23, 128  ;;  %v17667_v23 = vpack.c.bf16 %v20919_v44, %v20918_v18  ;;  %v345_v62 = vld [vmem:[%s17113_s20 + $0x298] sm:$0xff]  ;;  %v330_v18 = vld [vmem:[%s17113_s20 + $0x220] sm:$0xff]  ;;  %v17695_v57 = vld [vmem:[%s17113_s20 + $0x390] sm:$0xff]  ;;  %s16830_s16 = scalar_lea.vmem %s20561_s29, 128  ;;  %p21399_p5 = scmp.ne.s32.totalorder %s20824_s23, 0 }
  0xa9   : > { %20916 = vst [vmem:[#allocation91_spill] sm:$0xff] %v17661_v17  ;;  %20917 = vst [vmem:[#allocation92_spill] sm:$0xff] %v17663_v22  ;;  %v346_v44 = vld [vmem:[%s17113_s20 + $0x2a0] sm:$0xff]  ;;  %v333_v48 = vld [vmem:[%s17113_s20 + $0x238] sm:$0xff]  ;;  %p16831_p10 = scmp.ne.s32.totalorder %s20561_s29, %s16830_s16  ;;  %s16911_s9 = smov [#allocation8]  }
  0xaa   : > { %16315 = vxpose.xlu0.b32.cont [13/16] %v16314_v3, 128  ;;  %v16318_v3 = vpack.i.bf16 %v17376_v32, %v17366_v34  ;;  %v335_v53 = vld [vmem:[%s17113_s20 + $0x248] sm:$0xff]  ;;  %v337_v4 = vld [vmem:[%s17113_s20 + $0x258] sm:$0xff]  ;;  %v338_v43 = vld [vmem:[%s17113_s20 + $0x260] sm:$0xff]  ;;  %s16834_s11 = sshll.u32 %s16911_s9, 4  ;;  %s16835_s11 = int_to_ptr.vmem [resolvable:$false] %s16834_s11 }
  0xab   : > { %v17770_v2 = vld [vmem:[%s17113_s20 + $0x328] sm:$0xff]  ;;  %v353_v38 = vld [vmem:[%s17113_s20 + $0x2d8] sm:$0xff]  ;;  %v17843_v59 = vld [vmem:[%s17113_s20 + $0x270] sm:$0xff]  ;;  %p16832_p7 = pnand %p16831_p10, %p21399_p5  ;;  %s16836_s17 = scalar_lea.vmem %s16835_s11, 256 }
  0xac   : > { %16423 = vxpose.xlu1.b32.cont [11/16] %v16422_v9, 128  ;;  %v16426_v9 = vpack.i.bf16 %v17510_v29, %v17500_v46  ;;  %v17779_v46 = vmul.f32 0.02, %v333_v48  ;;  %v17790_v8 = vmul.f32 0.02, %v17770_v2  ;;  %v17818_v10 = vld [vmem:[%s17113_s20 + $0x268] sm:$0xff]  ;;  %v17846_v13 = vld [vmem:[%s17113_s20 + $0x2f0] sm:$0xff]  ;;  %p16837_p6 = scmp.lt.s32.totalorder %s20561_s29, %s16835_s11  ;;  %p16838_p12 = scmp.lt.s32.totalorder %s16836_s17, %s16830_s16 }
  0xad   : > { %v355_v45 = vld [vmem:[%s17113_s20 + $0x2e8] sm:$0xff]  ;;  %p16833_p9 = pneg %p16832_p7 }
  0xae   : > { %16317 = vxpose.xlu0.b32.cont [14/16] %v16316_v35, 128  ;;  %v20920_v35 = vld [vmem:[#allocation63_spill] sm:$0xff]  ;;  %20938 = vst [vmem:[#allocation105_spill] sm:$0xff] %v17779_v46  ;;  %20940 = vst [vmem:[#allocation107_spill] sm:$0xff] %v17790_v8  ;;  %p16839_p0 = por %p16838_p12, %p16837_p6 }
  0xb0   : > { %16425 = vxpose.xlu1.b32.cont [12/16] %v16424_v60, 128  ;;  %v20921_v60 = vld [vmem:[#allocation64_spill] sm:$0xff]  ;;  %p16840_p8 = pnand %p16839_p0, %p16833_p9 }
  0xb2   : > { %16319 = vxpose.xlu0.b32.cont [15/16] %v16318_v3, 128  ;;  %v17671_v3 = vpack.c.bf16 %v20921_v60, %v20920_v35  ;;  %v17687_v35 = vpack.c.bf16 %v329_v41, %v328_v19  ;;  %v17692_v60 = vld [vmem:[%s17113_s20 + $0x310] sm:$0xff]  ;;  %v347_v19 = vld [vmem:[%s17113_s20 + $0x2a8] sm:$0xff] }
  0xb4   : > { %16427 = vxpose.xlu1.b32.cont [13/16] %v16426_v9, 128  ;;  %v16432_v9 = vpack.i.bf16 %v17549_v37, %v17540_v5  ;;  %v334_v37 = vld [vmem:[%s17113_s20 + $0x240] sm:$0xff]  ;;  %v351_v5 = vld [vmem:[%s17113_s20 + $0x2c8] sm:$0xff] }
  0xb5   : > { %v17807_v32 = vmul.f32 0.02, %v334_v37 }
  0xb6   : > { %16321 = vxpose.xlu0.b32.end [16/16] %v16320_v31, 128  ;;  %v16518_v31 = vpack.i.bf16 %v17663_v22, %v17661_v17  ;;  %v17701_v17 = vmul.f32 0.02, %v346_v44 }
  0xb7   : > { %20944 = vst [vmem:[#allocation111_spill] sm:$0xff] %v17807_v32 }
  0xb8   : > { %16429 = vxpose.xlu1.b32.cont [14/16] %v16428_v26, 128  ;;  %v17679_v26 = vmul.f32 0.02, %v329_v41  ;;  %20925 = vst [vmem:[#allocation64_spill] sm:$0xff] %v17701_v17  ;;  %v17708_v41 = vmul.f32 0.02, %v17692_v60 }
  0xba   : > { %16515 = vxpose.xlu0.b32.start [1/16] %v16514_v14, 128  ;;  %20922 = vst [vmem:[#allocation60_spill] sm:$0xff] %v17679_v26  ;;  %v17681_v14 = vmul.f32 0.02, %v345_v62  ;;  %20926 = vst [vmem:[#allocation93_spill] sm:$0xff] %v17708_v41 }
  0xbc   : > { %16431 = vxpose.xlu1.b32.cont [15/16] %v16430_v30, 128  ;;  %20923 = vst [vmem:[#allocation61_spill] sm:$0xff] %v17681_v14  ;;  %v16626_v30 = vpack.i.bf16 %v17582_v25, %v17574_v28  ;;  %v16520_v22 = vpack.i.bf16 %v17681_v14, %v17679_v26  ;;  %v331_v25 = vld [vmem:[%s17113_s20 + $0x228] sm:$0xff]  ;;  %v17717_v28 = vld [vmem:[%s17113_s20 + $0x398] sm:$0xff]  ;;  %v17721_v26 = vpack.c.bf16 %v347_v19, %v346_v44 }
  0xbd   : > { %v17719_v14 = vpack.c.bf16 %v331_v25, %v330_v18  ;;  %v17723_v27 = vmul.f32 0.02, %v331_v25  ;;  %v17737_v25 = vmul.f32 0.02, %v17717_v28 }
  0xbe   : > { %16517 = vxpose.xlu0.b32.cont [2/16] %v16516_v7, 128  ;;  %v17689_v7 = vpack.c.bf16 %v345_v62, %v344_v12  ;;  %v16628_v12 = vpack.i.bf16 %v17585_v39, %v17577_v6  ;;  %v17711_v62 = vmul.f32 0.02, %v17695_v57  ;;  %v17725_v39 = vmul.f32 0.02, %v347_v19  ;;  %v348_v6 = vld [vmem:[%s17113_s20 + $0x2b0] sm:$0xff] }
  0xbf   : > { %20928 = vst [vmem:[#allocation95_spill] sm:$0xff] %v17723_v27  ;;  %20931 = vst [vmem:[#allocation98_spill] sm:$0xff] %v17737_v25 }
  0xc0   : > { %16433 = vxpose.xlu1.b32.end [16/16] %v16432_v9, 128  ;;  %v17699_v9 = vmul.f32 0.02, %v330_v18  ;;  %20927 = vst [vmem:[#allocation94_spill] sm:$0xff] %v17711_v62  ;;  %20929 = vst [vmem:[#allocation96_spill] sm:$0xff] %v17725_v39  ;;  %v349_v18 = vld [vmem:[%s17113_s20 + $0x2b8] sm:$0xff]  ;;  %v16630_v19 = vpack.i.bf16 %v17711_v62, %v17708_v41  ;;  %v350_v41 = vld [vmem:[%s17113_s20 + $0x2c0] sm:$0xff] }
  0xc1   : > { %v17756_v62 = vmul.f32 0.02, %v348_v6 }
  0xc2   : > { %16519 = vxpose.xlu0.b32.cont [3/16] %v16518_v31, 128  ;;  %20924 = vst [vmem:[#allocation63_spill] sm:$0xff] %v17699_v9  ;;  %v17714_v31 = vld [vmem:[%s17113_s20 + $0x318] sm:$0xff]  ;;  %v16522_v55 = vpack.i.bf16 %v17701_v17, %v17699_v9  ;;  %v17746_v17 = vld [vmem:[%s17113_s20 + $0x320] sm:$0xff] }
  0xc3   : > { %v17734_v44 = vmul.f32 0.02, %v17714_v31  ;;  %v17749_v9 = vld [vmem:[%s17113_s20 + $0x3a0] sm:$0xff]  ;;  %20933 = vst [vmem:[#allocation100_spill] sm:$0xff] %v17756_v62 }
  0xc4   : > { %16627 = vxpose.xlu1.b32.start [1/16] %v16626_v30, 128  ;;  %v332_v30 = vld [vmem:[%s17113_s20 + $0x230] sm:$0xff] }
  0xc5   : > { %20930 = vst [vmem:[#allocation97_spill] sm:$0xff] %v17734_v44  ;;  %v17741_v51 = vpack.c.bf16 %v333_v48, %v332_v30  ;;  %v17751_v56 = vmul.f32 0.02, %v332_v30  ;;  %v16632_v29 = vpack.i.bf16 %v17737_v25, %v17734_v44  ;;  %v17764_v30 = vmul.f32 0.02, %v17746_v17  ;;  %v352_v44 = vld [vmem:[%s17113_s20 + $0x2d0] sm:$0xff] }
  0xc6   : > { %16521 = vxpose.xlu0.b32.cont [4/16] %v16520_v22, 128  ;;  %v17743_v22 = vpack.c.bf16 %v349_v18, %v348_v6  ;;  %v17775_v6 = vpack.c.bf16 %v335_v53, %v334_v37  ;;  %v17781_v25 = vmul.f32 0.02, %v349_v18 }
  0xc7   : > { %20932 = vst [vmem:[#allocation99_spill] sm:$0xff] %v17751_v56  ;;  %20934 = vst [vmem:[#allocation101_spill] sm:$0xff] %v17764_v30  ;;  %v16526_v49 = vpack.i.bf16 %v17756_v62, %v17751_v56  ;;  %v17802_v62 = vld [vmem:[%s17113_s20 + $0x330] sm:$0xff] }
  0xc8   : > { %16629 = vxpose.xlu1.b32.cont [2/16] %v16628_v12, 128  ;;  %v16524_v12 = vpack.i.bf16 %v17725_v39, %v17723_v27  ;;  %v17773_v39 = vld [vmem:[%s17113_s20 + $0x3a8] sm:$0xff]  ;;  %20936 = vst [vmem:[#allocation103_spill] sm:$0xff] %v17775_v6  ;;  %v17777_v27 = vpack.c.bf16 %v351_v5, %v350_v41  ;;  %20939 = vst [vmem:[#allocation106_spill] sm:$0xff] %v17781_v25  ;;  %v17805_v56 = vld [vmem:[%s17113_s20 + $0x3b0] sm:$0xff]  ;;  %v17822_v37 = vmul.f32 0.02, %v17802_v62 }
  0xc9   : > { %v17793_v48 = vmul.f32 0.02, %v17773_v39 }
  0xca   : > { %16523 = vxpose.xlu0.b32.cont [5/16] %v16522_v55, 128  ;;  %v17767_v55 = vmul.f32 0.02, %v17749_v9  ;;  %20937 = vst [vmem:[#allocation104_spill] sm:$0xff] %v17777_v27  ;;  %20946 = vst [vmem:[#allocation113_spill] sm:$0xff] %v17822_v37 }
  0xcb   : > { %20941 = vst [vmem:[#allocation108_spill] sm:$0xff] %v17793_v48  ;;  %v16636_v34 = vpack.i.bf16 %v17793_v48, %v17790_v8  ;;  %v17838_v8 = vmul.f32 0.02, %v335_v53  ;;  %v17860_v53 = vld [vmem:[%s17113_s20 + $0x2f8] sm:$0xff] }
  0xcc   : > { %16631 = vxpose.xlu1.b32.cont [3/16] %v16630_v19, 128  ;;  %20935 = vst [vmem:[#allocation102_spill] sm:$0xff] %v17767_v55  ;;  %v336_v19 = vld [vmem:[%s17113_s20 + $0x250] sm:$0xff]  ;;  %v16634_v18 = vpack.i.bf16 %v17767_v55, %v17764_v30  ;;  %v17812_v55 = vmul.f32 0.02, %v350_v41  ;;  %v354_v30 = vld [vmem:[%s17113_s20 + $0x2e0] sm:$0xff]  ;;  %v17831_v41 = vld [vmem:[%s17113_s20 + $0x3b8] sm:$0xff] }
  0xcd   : > { %v17797_v36 = vpack.c.bf16 %v337_v4, %v336_v19  ;;  %v17836_v48 = vpack.c.bf16 %v355_v45, %v354_v30  ;;  %v17876_v6 = vmul.f32 0.02, %v336_v19  ;;  %v17893_v19 = vpack.c.bf16 %v17567_v1, %v17564_v0  ;;  %v368_v0 = vld [vmem:[%s17113_s20 + $0x350] sm:$0xff] }
  0xce   : > { %16525 = vxpose.xlu0.b32.cont [6/16] %v16524_v12, 128  ;;  %v17799_v12 = vpack.c.bf16 %v353_v38, %v352_v44  ;;  %20945 = vst [vmem:[#allocation112_spill] sm:$0xff] %v17812_v55  ;;  %v16530_v50 = vpack.i.bf16 %v17812_v55, %v17807_v32  ;;  %v17870_v55 = vpack.c.bf16 %v17860_v53, %v17846_v13  ;;  %v366_v32 = vld [vmem:[%s17113_s20 + $0x340] sm:$0xff] }
  0xcf   : > { %20942 = vst [vmem:[#allocation109_spill] sm:$0xff] %v17797_v36  ;;  %20949 = vst [vmem:[#allocation116_spill] sm:$0xff] %v17836_v48  ;;  %v17857_v48 = vld [vmem:[%s17113_s20 + $0x278] sm:$0xff]  ;;  %v382_v36 = vld [vmem:[%s17113_s20 + $0x3c0] sm:$0xff] }
  0xd0   : > { %16633 = vxpose.xlu1.b32.cont [4/16] %v16632_v29, 128  ;;  %20943 = vst [vmem:[#allocation110_spill] sm:$0xff] %v17799_v12  ;;  %v16528_v29 = vpack.i.bf16 %v17781_v25, %v17779_v46  ;;  %v17828_v25 = vld [vmem:[%s17113_s20 + $0x338] sm:$0xff]  ;;  %v17834_v46 = vpack.c.bf16 %v17818_v10, %v338_v43  ;;  %20954 = vst [vmem:[#allocation121_spill] sm:$0xff] %v17870_v55  ;;  %v367_v55 = vld [vmem:[%s17113_s20 + $0x348] sm:$0xff] }
  0xd1   : > { %v17851_v12 = vmul.f32 0.02, %v17828_v25 }
  0xd2   : > { %16527 = vxpose.xlu0.b32.cont [7/16] %v16526_v49, 128  ;;  %v17825_v49 = vmul.f32 0.02, %v17805_v56  ;;  %20948 = vst [vmem:[#allocation115_spill] sm:$0xff] %v17834_v46  ;;  %v17854_v46 = vmul.f32 0.02, %v17831_v41 }
  0xd3   : > { %20951 = vst [vmem:[#allocation118_spill] sm:$0xff] %v17851_v12 }
  0xd4   : > { %16635 = vxpose.xlu1.b32.cont [5/16] %v16634_v18, 128  ;;  %20947 = vst [vmem:[#allocation114_spill] sm:$0xff] %v17825_v49  ;;  %v17840_v18 = vmul.f32 0.02, %v351_v5  ;;  %20952 = vst [vmem:[#allocation119_spill] sm:$0xff] %v17854_v46  ;;  %v16638_v5 = vpack.i.bf16 %v17825_v49, %v17822_v37  ;;  %v16640_v49 = vpack.i.bf16 %v17854_v46, %v17851_v12  ;;  %v17882_v37 = vmul.f32 0.02, %v366_v32 }
  0xd5   : > { %v17900_v12 = vmul.f32 0.02, %v353_v38  ;;  %v384_v38 = vld [vmem:[%s17113_s20 + $0x3d0] sm:$0xff] }
  0xd6   : > { %20950 = vst [vmem:[#allocation117_spill] sm:$0xff] %v17840_v18  ;;  %16529 = vxpose.xlu0.b32.cont [8/16] %v16528_v29, 128  ;;  %v17866_v29 = vpack.c.bf16 %v17857_v48, %v17843_v59  ;;  %v16532_v27 = vpack.i.bf16 %v17840_v18, %v17838_v8  ;;  %20955 = vst [vmem:[#allocation122_spill] sm:$0xff] %v17882_v37  ;;  %v17902_v18 = vmul.f32 0.02, %v367_v55 }
  0xd8   : > { %16637 = vxpose.xlu1.b32.cont [6/16] %v16636_v34, 128  ;;  %20953 = vst [vmem:[#allocation120_spill] sm:$0xff] %v17866_v29  ;;  %v17878_v34 = vmul.f32 0.02, %v352_v44  ;;  %v17884_v29 = vmul.f32 0.02, %v382_v36  ;;  %v383_v44 = vld [vmem:[%s17113_s20 + $0x3c8] sm:$0xff] }
  0xd9   : > { %20957 = vst [vmem:[#allocation124_spill] sm:$0xff] %v17902_v18 }
  0xda   : > { %16531 = vxpose.xlu0.b32.cont [9/16] %v16530_v50, 128  ;;  %20956 = vst [vmem:[#allocation123_spill] sm:$0xff] %v17884_v29  ;;  %v17889_v50 = vpack.c.bf16 %v17561_v47, %v17552_v54  ;;  %v16534_v46 = vpack.i.bf16 %v17878_v34, %v17876_v6  ;;  %v16642_v47 = vpack.i.bf16 %v17884_v29, %v17882_v37  ;;  %v17906_v54 = vmul.f32 0.02, %v383_v44 }
  0xdb   : > { %v17922_v29 = vmul.f32 0.02, %v354_v30  ;;  %v17924_v37 = vmul.f32 0.02, %v368_v0 }
  0xdc   : > { %16639 = vxpose.xlu1.b32.cont [7/16] %v16638_v5, 128  ;;  %v17898_v5 = vmul.f32 0.02, %v337_v4  ;;  %20958 = vst [vmem:[#allocation125_spill] sm:$0xff] %v17906_v54  ;;  %v17915_v4 = vpack.c.bf16 %v17717_v28, %v17695_v57  ;;  %v369_v28 = vld [vmem:[%s17113_s20 + $0x358] sm:$0xff] }
  0xdd   : > { %20959 = vst [vmem:[#allocation126_spill] sm:$0xff] %v17924_v37  ;;  %v385_v57 = vld [vmem:[%s17113_s20 + $0x3d8] sm:$0xff] }
  0xde   : > { %16533 = vxpose.xlu0.b32.cont [10/16] %v16532_v27, 128  ;;  %v17911_v27 = vpack.c.bf16 %v17714_v31, %v17692_v60  ;;  %v16536_v1 = vpack.i.bf16 %v17900_v12, %v17898_v5  ;;  %v16644_v60 = vpack.i.bf16 %v17906_v54, %v17902_v18  ;;  %v17928_v31 = vmul.f32 0.02, %v384_v38 }
  0xdf   : > { %v17945_v54 = vmul.f32 0.02, %v355_v45  ;;  %v17947_v18 = vmul.f32 0.02, %v369_v28  ;;  %v386_v45 = vld [vmem:[%s17113_s20 + $0x3e0] sm:$0xff] }
  0xe0   : > { %16641 = vxpose.xlu1.b32.cont [8/16] %v16640_v49, 128  ;;  %v17920_v49 = vmul.f32 0.02, %v338_v43  ;;  %20960 = vst [vmem:[#allocation127_spill] sm:$0xff] %v17928_v31  ;;  %v17937_v43 = vpack.c.bf16 %v17773_v39, %v17749_v9  ;;  %v370_v39 = vld [vmem:[%s17113_s20 + $0x360] sm:$0xff]  ;;  %v17956_v9 = vpack.c.bf16 %v17828_v25, %v17802_v62  ;;  %v371_v25 = vld [vmem:[%s17113_s20 + $0x368] sm:$0xff] }
  0xe1   : > { %20961 = vst [vmem:[#allocation128_spill] sm:$0xff] %v17945_v54  ;;  %20962 = vst [vmem:[#allocation129_spill] sm:$0xff] %v17947_v18 }
  0xe2   : > { %16535 = vxpose.xlu0.b32.cont [11/16] %v16534_v46, 128  ;;  %v17933_v46 = vpack.c.bf16 %v17770_v2, %v17746_v17  ;;  %v16538_v30 = vpack.i.bf16 %v17922_v29, %v17920_v49  ;;  %v16646_v2 = vpack.i.bf16 %v17928_v31, %v17924_v37  ;;  %v17951_v17 = vmul.f32 0.02, %v385_v57 }
  0xe3   : > { %v17969_v31 = vmul.f32 0.02, %v17846_v13  ;;  %v17971_v37 = vmul.f32 0.02, %v370_v39 }
  0xe4   : > { %16643 = vxpose.xlu1.b32.cont [9/16] %v16642_v47, 128  ;;  %v17943_v47 = vmul.f32 0.02, %v17818_v10  ;;  %20963 = vst [vmem:[#allocation130_spill] sm:$0xff] %v17951_v17  ;;  %v17960_v10 = vpack.c.bf16 %v17831_v41, %v17805_v56  ;;  %v16648_v62 = vpack.i.bf16 %v17951_v17, %v17947_v18  ;;  %v17975_v56 = vmul.f32 0.02, %v386_v45 }
  0xe5   : > { %20965 = vst [vmem:[#allocation132_spill] sm:$0xff] %v17969_v31  ;;  %20966 = vst [vmem:[#allocation133_spill] sm:$0xff] %v17971_v37  ;;  %v17978_v41 = vpack.c.bf16 %v367_v55, %v366_v32  ;;  %v17991_v17 = vmul.f32 0.02, %v371_v25  ;;  %v372_v55 = vld [vmem:[%s17113_s20 + $0x370] sm:$0xff] }
  0xe6   : > { %16537 = vxpose.xlu0.b32.cont [12/16] %v16536_v1, 128  ;;  %v16540_v1 = vpack.i.bf16 %v17945_v54, %v17943_v47  ;;  %20967 = vst [vmem:[#allocation134_spill] sm:$0xff] %v17975_v56  ;;  %v17986_v54 = vmul.f32 0.02, %v17857_v48  ;;  %v16650_v32 = vpack.i.bf16 %v17975_v56, %v17971_v37  ;;  %v388_v48 = vld [vmem:[%s17113_s20 + $0x3f0] sm:$0xff]  ;;  %v18005_v18 = vmul.f32 0.02, %v372_v55 }
  0xe7   : > { %20968 = vst [vmem:[#allocation135_spill] sm:$0xff] %v17991_v17  ;;  %v373_v56 = vld [vmem:[%s17113_s20 + $0x378] sm:$0xff] }
  0xe8   : > { %16645 = vxpose.xlu1.b32.cont [10/16] %v16644_v60, 128  ;;  %v17966_v60 = vmul.f32 0.02, %v17843_v59  ;;  %v387_v59 = vld [vmem:[%s17113_s20 + $0x3e8] sm:$0xff]  ;;  %v389_v37 = vld [vmem:[%s17113_s20 + $0x3f8] sm:$0xff] }
  0xea   : > { %16539 = vxpose.xlu0.b32.cont [13/16] %v16538_v30, 128  ;;  %20964 = vst [vmem:[#allocation131_spill] sm:$0xff] %v17966_v60  ;;  %v17980_v30 = vpack.c.bf16 %v383_v44, %v382_v36  ;;  %v16542_v13 = vpack.i.bf16 %v17969_v31, %v17966_v60  ;;  %v17995_v36 = vmul.f32 0.02, %v387_v59  ;;  %v17998_v44 = vpack.c.bf16 %v369_v28, %v368_v0 }
  0xeb   : > { %v18009_v31 = vmul.f32 0.02, %v388_v48  ;;  %v18013_v60 = vpack.c.bf16 %v371_v25, %v370_v39  ;;  %v18015_v0 = vpack.c.bf16 %v387_v59, %v386_v45  ;;  %v18019_v28 = vmul.f32 0.02, %v389_v37 }
  0xec   : > { %16647 = vxpose.xlu1.b32.cont [11/16] %v16646_v2, 128  ;;  %v17989_v2 = vmul.f32 0.02, %v17860_v53  ;;  %20969 = vst [vmem:[#allocation136_spill] sm:$0xff] %v17995_v36 }
  0xed   : > { %20970 = vst [vmem:[#allocation137_spill] sm:$0xff] %v18009_v31  ;;  %20971 = vst [vmem:[#allocation138_spill] sm:$0xff] %v18019_v28 }
  0xee   : > { %16541 = vxpose.xlu0.b32.cont [14/16] %v16540_v1, 128  ;;  %v18000_v1 = vpack.c.bf16 %v385_v57, %v384_v38  ;;  %v16544_v53 = vpack.i.bf16 %v17989_v2, %v17986_v54  ;;  %v18017_v38 = vmul.f32 0.02, %v373_v56  ;;  %v16654_v57 = vpack.i.bf16 %v18009_v31, %v18005_v18 }
  0xf0   : > { %16649 = vxpose.xlu1.b32.cont [12/16] %v16648_v62, 128  ;;  %v16652_v62 = vpack.i.bf16 %v17995_v36, %v17991_v17  ;;  %v16656_v39 = vpack.i.bf16 %v18019_v28, %v18017_v38  ;;  %v20974_v28 = vld [vmem:[#allocation84_spill] sm:$0xff] }
  0xf2   : > { %16543 = vxpose.xlu0.b32.cont [15/16] %v16542_v13, 128  ;;  %v18023_v13 = vpack.c.bf16 %v373_v56, %v372_v55  ;;  %v20972_v56 = vld [vmem:[#allocation78_spill] sm:$0xff] }
  0xf4   : > { %16651 = vxpose.xlu1.b32.cont [13/16] %v16650_v32, 128  ;;  %v18025_v32 = vpack.c.bf16 %v389_v37, %v388_v48  ;;  %v20973_v37 = vld [vmem:[#allocation81_spill] sm:$0xff] }
  0xf6   : > { %16545 = vxpose.xlu0.b32.end [16/16] %v16544_v53, 128 }
  0xf8   : > { %16653 = vxpose.xlu1.b32.cont [14/16] %v16652_v62, 128 }
  0xfa   : > { %v16322_v36 = vpop.trf.xlu0 }
  0xfb   : > { %v16323_v25 = vunpack.i.l.bf16 %v16322_v36  ;;  %v16326_v45 = vunpack.i.h.bf16 %v16322_v36 }
  0xfc   : > { %16655 = vxpose.xlu1.b32.cont [15/16] %v16654_v57, 128 }
  0xfd   : > { %10364 = vmatprep.mubr.f32.mxu0 %v16323_v25  ;;  %10420 = vmatprep.mubr.f32.mxu1 %v16326_v45 }
  0xfe   : > { %v16327_v59 = vpop.trf.xlu0 }
  0xff   : > { %v16328_v53 = vunpack.i.l.bf16 %v16327_v59  ;;  %v16331_v17 = vunpack.i.h.bf16 %v16327_v59 }
 0x100   : > { %16657 = vxpose.xlu1.b32.end [16/16] %v16656_v39, 128 }
 0x101   : > { %10365 = vmatmul.mubr.f32.vlgmr.msra.gmra.mrb[0].mxu0 %v16328_v53  ;;  %10421 = vmatmul.mubr.f32.vlgmr.msra.gmra.mrb[0].mxu1 %v16331_v17 }
 0x102   : > { %v16332_v62 = vpop.trf.xlu0  ;;  %13927 = vmatpush3.bf16.msra.mxu0 %v20972_v56  ;;  %13959 = vmatpush3.bf16.msra.mxu1 %v20973_v37 }
 0x103   : > { %v16333_v55 = vunpack.i.l.bf16 %v16332_v62  ;;  %v16336_v48 = vunpack.i.h.bf16 %v16332_v62  ;;  %13929 = vmatprep.subr.bf16.mxu0 %v20974_v28  ;;  %13961 = vmatprep.subr.bf16.mxu1 %v17556_v52 }
 0x104   : > { %v18031_v31 = vpop.trf.xlu1 }
 0x105   : > { %10367 = vmatprep.mubr.f32.mxu0 %v16333_v55  ;;  %10423 = vmatprep.mubr.f32.mxu1 %v16336_v48 }
 0x106   : > { %v16337_v36 = vpop.trf.xlu0  ;;  %13931 = vmatpush3.bf16.msra.mxu0 %v20974_v28  ;;  %13963 = vmatpush3.bf16.msra.mxu1 %v17556_v52 }
 0x107   : > { %v16338_v17 = vunpack.i.l.bf16 %v16337_v36  ;;  %v16341_v57 = vunpack.i.h.bf16 %v16337_v36  ;;  %13933 = vmatprep.subr.bf16.mxu0 %v17591_v61  ;;  %13965 = vmatprep.subr.bf16.mxu1 %v17595_v58 }
 0x108   : > { %v18037_v39 = vpop.trf.xlu1 }
 0x109   : > { %10368 = vmatmul.mubr.f32.gmra.mrb[2].mxu0 %v16338_v17  ;;  %10424 = vmatmul.mubr.f32.gmra.mrb[2].mxu1 %v16341_v57 }
 0x10a   : > { %v16342_v25 = vpop.trf.xlu0  ;;  %13935 = vmatpush3.bf16.msra.mxu0 %v17591_v61  ;;  %13967 = vmatpush3.bf16.msra.mxu1 %v17595_v58 }
 0x10b   : > { %v16343_v45 = vunpack.i.l.bf16 %v16342_v25  ;;  %v16346_v59 = vunpack.i.h.bf16 %v16342_v25  ;;  %13937 = vmatprep.subr.bf16.mxu0 %v17605_v16  ;;  %13969 = vmatprep.subr.bf16.mxu1 %v17609_v42 }
 0x10c   : > { %v18043_v28 = vpop.trf.xlu1 }
 0x10d   : > { %10370 = vmatprep.mubr.f32.mxu0 %v16343_v45  ;;  %10426 = vmatprep.mubr.f32.mxu1 %v16346_v59 }
 0x10e   : > { %v16347_v52 = vpop.trf.xlu0  ;;  %13939 = vmatpush3.bf16.msra.mxu0 %v17605_v16  ;;  %13971 = vmatpush3.bf16.msra.mxu1 %v17609_v42 }
 0x10f   : > { %v16348_v53 = vunpack.i.l.bf16 %v16347_v52  ;;  %v16351_v62 = vunpack.i.h.bf16 %v16347_v52  ;;  %13941 = vmatprep.subr.bf16.mxu0 %v17615_v40  ;;  %13973 = vmatprep.subr.bf16.mxu1 %v17621_v20 }
 0x110   : > { %v18049_v61 = vpop.trf.xlu1 }
 0x111   : > { %10371 = vmatmul.mubr.f32.gmra.mrb[4].mxu0 %v16348_v53  ;;  %10427 = vmatmul.mubr.f32.gmra.mrb[4].mxu1 %v16351_v62 }
 0x112   : > { %v16352_v58 = vpop.trf.xlu0  ;;  %13943 = vmatpush3.bf16.msra.mxu0 %v17615_v40  ;;  %13975 = vmatpush3.bf16.msra.mxu1 %v17621_v20 }
 0x113   : > { %v16353_v56 = vunpack.i.l.bf16 %v16352_v58  ;;  %v16356_v37 = vunpack.i.h.bf16 %v16352_v58  ;;  %13945 = vmatprep.subr.bf16.mxu0 %v17627_v63  ;;  %13977 = vmatprep.subr.bf16.mxu1 %v17633_v21 }
 0x114   : > { %v18055_v16 = vpop.trf.xlu1 }
 0x115   : > { %10373 = vmatprep.mubr.f32.mxu0 %v16353_v56  ;;  %10429 = vmatprep.mubr.f32.mxu1 %v16356_v37 }
 0x116   : > { %v16357_v42 = vpop.trf.xlu0  ;;  %13947 = vmatpush3.bf16.msra.mxu0 %v17627_v63  ;;  %13979 = vmatpush3.bf16.msra.mxu1 %v17633_v21 }
 0x117   : > { %v16358_v55 = vunpack.i.l.bf16 %v16357_v42  ;;  %v16361_v48 = vunpack.i.h.bf16 %v16357_v42  ;;  %13949 = vmatprep.subr.bf16.mxu0 %v17639_v24  ;;  %13981 = vmatprep.subr.bf16.mxu1 %v17645_v33 }
 0x118   : > { %v18061_v40 = vpop.trf.xlu1 }
 0x119   : > { %10374 = vmatmul.mubr.f32.gmra.mrb[6].mxu0 %v16358_v55  ;;  %10430 = vmatmul.mubr.f32.gmra.mrb[6].mxu1 %v16361_v48 }
 0x11a   : > { %v16362_v20 = vpop.trf.xlu0  ;;  %13951 = vmatpush3.bf16.msra.mxu0 %v17639_v24  ;;  %13983 = vmatpush3.bf16.msra.mxu1 %v17645_v33 }
 0x11b   : > { %v16363_v36 = vunpack.i.l.bf16 %v16362_v20  ;;  %v16366_v17 = vunpack.i.h.bf16 %v16362_v20  ;;  %13953 = vmatprep.subr.bf16.mxu0 %v17650_v11  ;;  %13985 = vmatprep.subr.bf16.mxu1 %v17657_v15 }
 0x11c   : > { %v18067_v63 = vpop.trf.xlu1 }
 0x11d   : > { %10376 = vmatprep.mubr.f32.mxu0 %v16363_v36  ;;  %10432 = vmatprep.mubr.f32.mxu1 %v16366_v17 }
 0x11e   : > { %v16367_v21 = vpop.trf.xlu0  ;;  %13955 = vmatpush3.bf16.msra.mxu0 %v17650_v11  ;;  %13987 = vmatpush3.bf16.msra.mxu1 %v17657_v15 }
 0x11f   : > { %v16368_v57 = vunpack.i.l.bf16 %v16367_v21  ;;  %v16371_v25 = vunpack.i.h.bf16 %v16367_v21  ;;  %13989 = vmatprep.subr.bf16.mxu0 %v17667_v23  ;;  %14021 = vmatprep.subr.bf16.mxu1 %v17671_v3 }
 0x120   : > { %v18073_v24 = vpop.trf.xlu1 }
 0x121   : > { %10377 = vmatmul.mubr.f32.gmra.mrb[8].mxu0 %v16368_v57  ;;  %10433 = vmatmul.mubr.f32.gmra.mrb[8].mxu1 %v16371_v25 }
 0x122   : > { %v16372_v33 = vpop.trf.xlu0 }
 0x123   : > { %v16373_v45 = vunpack.i.l.bf16 %v16372_v33  ;;  %v16376_v59 = vunpack.i.h.bf16 %v16372_v33 }
 0x124   : > { %v18077_v52 = vpop.trf.xlu1 }
 0x125   : > { %10379 = vmatprep.mubr.f32.mxu0 %v16373_v45  ;;  %10435 = vmatprep.mubr.f32.mxu1 %v16376_v59 }
 0x126   : > { %v16377_v11 = vpop.trf.xlu0 }
 0x127   : > { %v16378_v53 = vunpack.i.l.bf16 %v16377_v11  ;;  %v16381_v15 = vunpack.i.h.bf16 %v16377_v11 }
 0x128   : > { %v18079_v62 = vpop.trf.xlu1 }
 0x129   : > { %10380 = vmatmul.mubr.f32.gmra.mrb[10].mxu0 %v16378_v53  ;;  %10436 = vmatmul.mubr.f32.gmra.mrb[10].mxu1 %v16381_v15  ;;  %v16435_v53 = vunpack.i.l.bf16 %v18031_v31  ;;  %v16438_v15 = vunpack.i.h.bf16 %v18031_v31 }
 0x12a   : > { %v16382_v58 = vpop.trf.xlu0 }
 0x12b   : > { %v16383_v56 = vunpack.i.l.bf16 %v16382_v58  ;;  %v16386_v37 = vunpack.i.h.bf16 %v16382_v58 }
 0x12c   : > { %v18081_v42 = vpop.trf.xlu1 }
 0x12d   : > { %10382 = vmatprep.mubr.f32.mxu0 %v16383_v56  ;;  %10438 = vmatprep.mubr.f32.mxu1 %v16386_v37  ;;  %v16443_v56 = vunpack.i.h.bf16 %v18037_v39  ;;  %v16440_v37 = vunpack.i.l.bf16 %v18037_v39  ;;  %v16453_v39 = vunpack.i.h.bf16 %v18049_v61 }
 0x12e   : > { %v16387_v55 = vpop.trf.xlu0 }
 0x12f   : > { %v16388_v48 = vunpack.i.l.bf16 %v16387_v55  ;;  %v16391_v20 = vunpack.i.h.bf16 %v16387_v55 }
 0x130   : > { %v18083_v36 = vpop.trf.xlu1 }
 0x131   : > { %10383 = vmatmul.mubr.f32.gmra.mrb[12].mxu0 %v16388_v48  ;;  %10439 = vmatmul.mubr.f32.gmra.mrb[12].mxu1 %v16391_v20  ;;  %v16445_v48 = vunpack.i.l.bf16 %v18043_v28  ;;  %v16448_v20 = vunpack.i.h.bf16 %v18043_v28 }
 0x132   : > { %v16392_v17 = vpop.trf.xlu0 }
 0x133   : > { %v16393_v21 = vunpack.i.l.bf16 %v16392_v17  ;;  %v16396_v57 = vunpack.i.h.bf16 %v16392_v17  ;;  %v16450_v17 = vunpack.i.l.bf16 %v18049_v61  ;;  %v16460_v61 = vunpack.i.l.bf16 %v18061_v40 }
 0x134   : > { %v18085_v25 = vpop.trf.xlu1 }
 0x135   : > { %10385 = vmatprep.mubr.f32.mxu0 %v16393_v21  ;;  %10441 = vmatprep.mubr.f32.mxu1 %v16396_v57  ;;  %v16463_v57 = vunpack.i.h.bf16 %v18061_v40  ;;  %v16470_v40 = vunpack.i.l.bf16 %v18073_v24 }
 0x136   : > { %v16397_v33 = vpop.trf.xlu0 }
 0x137   : > { %v16398_v45 = vunpack.i.l.bf16 %v16397_v33  ;;  %v16401_v59 = vunpack.i.h.bf16 %v16397_v33 }
 0x138   : > { %v18087_v11 = vpop.trf.xlu1 }
 0x139   : > { %10386 = vmatmul.mubr.f32.gmra.mrb[14].mxu0 %v16398_v45  ;;  %10442 = vmatmul.mubr.f32.gmra.mrb[14].mxu1 %v16401_v59  ;;  %v16473_v45 = vunpack.i.h.bf16 %v18073_v24  ;;  %v16480_v24 = vunpack.i.l.bf16 %v18079_v62 }
 0x13a   : > { %v18091_v58 = vpop.trf.xlu0  ;;  %10476 = vmatprep.mubr.f32.mxu0 %v16435_v53  ;;  %10532 = vmatprep.mubr.f32.mxu1 %v16438_v15  ;;  %v16483_v53 = vunpack.i.h.bf16 %v18079_v62  ;;  %v16490_v62 = vunpack.i.l.bf16 %v18083_v36 }
 0x13c   : > { %v18095_v55 = vpop.trf.xlu1 }
 0x13d   : > { %10477 = vmatmul.mubr.f32.vlgmr.msra.gmra.mrb[16].mxu0 %v16440_v37  ;;  %10533 = vmatmul.mubr.f32.vlgmr.msra.gmra.mrb[16].mxu1 %v16443_v56  ;;  %v20975_v56 = vld [vmem:[#allocation103_spill] sm:$0xff]  ;;  %v20976_v37 = vld [vmem:[#allocation104_spill] sm:$0xff] }
 0x13e   : > { %13991 = vmatpush3.bf16.msra.mxu0 %v17667_v23  ;;  %14023 = vmatpush3.bf16.msra.mxu1 %v17671_v3  ;;  %v18101_v31 = vpop.trf.xlu0  ;;  %v16455_v23 = vunpack.i.l.bf16 %v18055_v16  ;;  %v16458_v3 = vunpack.i.h.bf16 %v18055_v16 }
 0x13f   : > { %10479 = vmatprep.mubr.f32.mxu0 %v16445_v48  ;;  %10535 = vmatprep.mubr.f32.mxu1 %v16448_v20  ;;  %v16493_v48 = vunpack.i.h.bf16 %v18083_v36  ;;  %v16500_v36 = vunpack.i.l.bf16 %v18087_v11 }
 0x140   : > { %v18105_v21 = vpop.trf.xlu1  ;;  %13993 = vmatprep.subr.bf16.mxu0 %v17687_v35  ;;  %14025 = vmatprep.subr.bf16.mxu1 %v17689_v7 }
 0x141   : > { %10480 = vmatmul.mubr.f32.gmra.mrb[18].mxu0 %v16450_v17  ;;  %10536 = vmatmul.mubr.f32.gmra.mrb[18].mxu1 %v16453_v39  ;;  %v20977_v17 = vld [vmem:[#allocation109_spill] sm:$0xff]  ;;  %v20978_v39 = vld [vmem:[#allocation110_spill] sm:$0xff] }
 0x142   : > { %13995 = vmatpush3.bf16.msra.mxu0 %v17687_v35  ;;  %14027 = vmatpush3.bf16.msra.mxu1 %v17689_v7  ;;  %v18113_v28 = vpop.trf.xlu0  ;;  %v16465_v35 = vunpack.i.l.bf16 %v18067_v63  ;;  %v16468_v7 = vunpack.i.h.bf16 %v18067_v63 }
 0x143   : > { %10482 = vmatprep.mubr.f32.mxu0 %v16455_v23  ;;  %10538 = vmatprep.mubr.f32.mxu1 %v16458_v3  ;;  %v16498_v23 = vunpack.i.h.bf16 %v18085_v25 }
 0x144   : > { %v18117_v33 = vpop.trf.xlu1  ;;  %13997 = vmatprep.subr.bf16.mxu0 %v17719_v14  ;;  %14029 = vmatprep.subr.bf16.mxu1 %v17721_v26 }
 0x145   : > { %10483 = vmatmul.mubr.f32.gmra.mrb[20].mxu0 %v16460_v61  ;;  %10539 = vmatmul.mubr.f32.gmra.mrb[20].mxu1 %v16463_v57  ;;  %v16503_v61 = vunpack.i.h.bf16 %v18087_v11  ;;  %v16505_v57 = vunpack.i.l.bf16 %v18095_v55 }
 0x146   : > { %13999 = vmatpush3.bf16.msra.mxu0 %v17719_v14  ;;  %14031 = vmatpush3.bf16.msra.mxu1 %v17721_v26  ;;  %v18125_v16 = vpop.trf.xlu0  ;;  %v16475_v14 = vunpack.i.l.bf16 %v18077_v52  ;;  %v16478_v26 = vunpack.i.h.bf16 %v18077_v52 }
 0x147   : > { %10485 = vmatprep.mubr.f32.mxu0 %v16465_v35  ;;  %10541 = vmatprep.mubr.f32.mxu1 %v16468_v7  ;;  %v16508_v35 = vunpack.i.h.bf16 %v18095_v55 }
 0x148   : > { %v18129_v59 = vpop.trf.xlu1  ;;  %14001 = vmatprep.subr.bf16.mxu0 %v17741_v51  ;;  %14033 = vmatprep.subr.bf16.mxu1 %v17743_v22 }
 0x149   : > { %10486 = vmatmul.mubr.f32.gmra.mrb[22].mxu0 %v16470_v40  ;;  %10542 = vmatmul.mubr.f32.gmra.mrb[22].mxu1 %v16473_v45  ;;  %v20979_v40 = vld [vmem:[#allocation115_spill] sm:$0xff]  ;;  %v16510_v45 = vunpack.i.l.bf16 %v18105_v21 }
 0x14a   : > { %14003 = vmatpush3.bf16.msra.mxu0 %v17741_v51  ;;  %14035 = vmatpush3.bf16.msra.mxu1 %v17743_v22  ;;  %v18137_v63 = vpop.trf.xlu0  ;;  %v16485_v51 = vunpack.i.l.bf16 %v18081_v42  ;;  %v16488_v22 = vunpack.i.h.bf16 %v18081_v42  ;;  %v16495_v42 = vunpack.i.l.bf16 %v18085_v25  ;;  %v20980_v25 = vld [vmem:[#allocation116_spill] sm:$0xff] }
 0x14b   : > { %10488 = vmatprep.mubr.f32.mxu0 %v16475_v14  ;;  %10544 = vmatprep.mubr.f32.mxu1 %v16478_v26  ;;  %v16513_v14 = vunpack.i.h.bf16 %v18105_v21  ;;  %v20981_v26 = vld [vmem:[#allocation120_spill] sm:$0xff]  ;;  %v16550_v21 = vunpack.i.h.bf16 %v18091_v58 }
 0x14c   : > { %v18141_v15 = vpop.trf.xlu1  ;;  %14005 = vmatprep.subr.bf16.mxu0 %v20975_v56  ;;  %14037 = vmatprep.subr.bf16.mxu1 %v20976_v37 }
 0x14d   : > { %10489 = vmatmul.mubr.f32.gmra.mrb[24].mxu0 %v16480_v24  ;;  %10545 = vmatmul.mubr.f32.gmra.mrb[24].mxu1 %v16483_v53  ;;  %v20982_v24 = vld [vmem:[#allocation121_spill] sm:$0xff]  ;;  %v16547_v53 = vunpack.i.l.bf16 %v18091_v58  ;;  %v16557_v58 = vunpack.i.l.bf16 %v18113_v28 }
 0x14e   : > { %14007 = vmatpush3.bf16.msra.mxu0 %v20975_v56  ;;  %14039 = vmatpush3.bf16.msra.mxu1 %v20976_v37  ;;  %v18149_v52 = vpop.trf.xlu0  ;;  %v16555_v37 = vunpack.i.h.bf16 %v18101_v31 }
 0x14f   : > { %10491 = vmatprep.mubr.f32.mxu0 %v16485_v51  ;;  %10547 = vmatprep.mubr.f32.mxu1 %v16488_v22  ;;  %v16552_v51 = vunpack.i.l.bf16 %v18101_v31  ;;  %v16562_v31 = vunpack.i.l.bf16 %v18125_v16 }
 0x150   : > { %v18153_v20 = vpop.trf.xlu1  ;;  %14009 = vmatprep.subr.bf16.mxu0 %v20977_v17  ;;  %14041 = vmatprep.subr.bf16.mxu1 %v20978_v39 }
 0x151   : > { %10492 = vmatmul.mubr.f32.gmra.mrb[26].mxu0 %v16490_v62  ;;  %10548 = vmatmul.mubr.f32.gmra.mrb[26].mxu1 %v16493_v48  ;;  %v16560_v62 = vunpack.i.h.bf16 %v18113_v28  ;;  %v16567_v28 = vunpack.i.l.bf16 %v18137_v63 }
 0x152   : > { %14011 = vmatpush3.bf16.msra.mxu0 %v20977_v17  ;;  %14043 = vmatpush3.bf16.msra.mxu1 %v20978_v39  ;;  %v18161_v3 = vpop.trf.xlu0  ;;  %v16565_v17 = vunpack.i.h.bf16 %v18125_v16  ;;  %v16572_v16 = vunpack.i.l.bf16 %v18149_v52 }
 0x153   : > { %10494 = vmatprep.mubr.f32.mxu0 %v16495_v42  ;;  %10550 = vmatprep.mubr.f32.mxu1 %v16498_v23  ;;  %v16575_v42 = vunpack.i.h.bf16 %v18149_v52 }
 0x154   : > { %v18167_v7 = vpop.trf.xlu1  ;;  %14013 = vmatprep.subr.bf16.mxu0 %v20979_v40  ;;  %14045 = vmatprep.subr.bf16.mxu1 %v20980_v25 }
 0x155   : > { %10495 = vmatmul.mubr.f32.gmra.mrb[28].mxu0 %v16500_v36  ;;  %10551 = vmatmul.mubr.f32.gmra.mrb[28].mxu1 %v16503_v61 }
 0x156   : > { %14015 = vmatpush3.bf16.msra.mxu0 %v20979_v40  ;;  %14047 = vmatpush3.bf16.msra.mxu1 %v20980_v25  ;;  %v18175_v11 = vpop.trf.xlu0 }
 0x157   : > { %10497 = vmatprep.mubr.f32.mxu0 %v16505_v57  ;;  %10553 = vmatprep.mubr.f32.mxu1 %v16508_v35  ;;  %v16582_v52 = vunpack.i.l.bf16 %v18175_v11  ;;  %v16585_v36 = vunpack.i.h.bf16 %v18175_v11 }
 0x158   : > { %v18177_v55 = vpop.trf.xlu1  ;;  %14017 = vmatprep.subr.bf16.mxu0 %v20981_v26  ;;  %14049 = vmatprep.subr.bf16.mxu1 %v20982_v24 }
 0x159   : > { %10498 = vmatmul.mubr.f32.gmra.mrb[30].mxu0 %v16510_v45  ;;  %10554 = vmatmul.mubr.f32.gmra.mrb[30].mxu1 %v16513_v14 }
 0x15a   : > { %14019 = vmatpush3.bf16.msra.mxu0 %v20981_v26  ;;  %14051 = vmatpush3.bf16.msra.mxu1 %v20982_v24  ;;  %v16586_v56 = vpop.trf.xlu0 }
 0x15b   : > { %10588 = vmatprep.mubr.f32.mxu0 %v16547_v53  ;;  %10644 = vmatprep.mubr.f32.mxu1 %v16550_v21  ;;  %v16590_v57 = vunpack.i.h.bf16 %v16586_v56 }
 0x15c   : > { %v18187_v22 = vpop.trf.xlu1  ;;  %14053 = vmatprep.subr.bf16.mxu0 %v17889_v50  ;;  %14085 = vmatprep.subr.bf16.mxu1 %v17893_v19 }
 0x15d   : > { %10589 = vmatmul.mubr.f32.vlgmr.msra.gmra.mrb[32].mxu0 %v16552_v51  ;;  %10645 = vmatmul.mubr.f32.vlgmr.msra.gmra.mrb[32].mxu1 %v16555_v37 }
 0x15e   : > { %14055 = vmatpush3.bf16.msra.mxu0 %v17889_v50  ;;  %14087 = vmatpush3.bf16.msra.mxu1 %v17893_v19  ;;  %v16591_v48 = vpop.trf.xlu0  ;;  %v16570_v50 = vunpack.i.h.bf16 %v18137_v63  ;;  %v16577_v63 = vunpack.i.l.bf16 %v18161_v3 }
 0x15f   : > { %10591 = vmatprep.mubr.f32.mxu0 %v16557_v58  ;;  %10647 = vmatprep.mubr.f32.mxu1 %v16560_v62  ;;  %v16595_v35 = vunpack.i.h.bf16 %v16591_v48  ;;  %v16659_v62 = vunpack.i.l.bf16 %v18117_v33 }
 0x160   : > { %v18197_v39 = vpop.trf.xlu1  ;;  %14057 = vmatprep.subr.bf16.mxu0 %v17911_v27  ;;  %14089 = vmatprep.subr.bf16.mxu1 %v17915_v4 }
 0x161   : > { %10592 = vmatmul.mubr.f32.gmra.mrb[34].mxu0 %v16562_v31  ;;  %10648 = vmatmul.mubr.f32.gmra.mrb[34].mxu1 %v16565_v17  ;;  %v20803_v17 = vmov 0.0|0.0  }
 0x162   : > { %14059 = vmatpush3.bf16.msra.mxu0 %v17911_v27  ;;  %14091 = vmatpush3.bf16.msra.mxu1 %v17915_v4  ;;  %v16596_v19 = vpop.trf.xlu0  ;;  %v16580_v27 = vunpack.i.h.bf16 %v18161_v3  ;;  %v16587_v3 = vunpack.i.l.bf16 %v16586_v56 }
 0x163   : > { %10594 = vmatprep.mubr.f32.mxu0 %v16567_v28  ;;  %10650 = vmatprep.mubr.f32.mxu1 %v16570_v50  ;;  %v16597_v25 = vunpack.i.l.bf16 %v16596_v19  ;;  %v16600_v45 = vunpack.i.h.bf16 %v16596_v19  ;;  %v20984_v28 = vld [vmem:[#allocation12_spill] sm:$0xff]  ;;  %v20987_v19 = vld [vmem:[#allocation13_spill] sm:$0xff] }
 0x164   : > { %v18207_v23 = vpop.trf.xlu1  ;;  %14061 = vmatprep.subr.bf16.mxu0 %v17933_v46  ;;  %14093 = vmatprep.subr.bf16.mxu1 %v17937_v43 }
 0x165   : > { %10595 = vmatmul.mubr.f32.gmra.mrb[36].mxu0 %v16572_v16  ;;  %10651 = vmatmul.mubr.f32.gmra.mrb[36].mxu1 %v16575_v42  ;;  %v16674_v42 = vunpack.i.l.bf16 %v18153_v20 }
 0x166   : > { %14063 = vmatpush3.bf16.msra.mxu0 %v17933_v46  ;;  %14095 = vmatpush3.bf16.msra.mxu1 %v17937_v43  ;;  %v16601_v4 = vpop.trf.xlu0  ;;  %v16592_v43 = vunpack.i.l.bf16 %v16591_v48  ;;  %v16662_v48 = vunpack.i.h.bf16 %v18117_v33  ;;  %v16669_v33 = vunpack.i.l.bf16 %v18141_v15 }
 0x167   : > { %10597 = vmatprep.mubr.f32.mxu0 %v16577_v63  ;;  %10653 = vmatprep.mubr.f32.mxu1 %v16580_v27  ;;  %v16605_v14 = vunpack.i.h.bf16 %v16601_v4  ;;  %v16677_v63 = vunpack.i.h.bf16 %v18153_v20  ;;  %v16684_v20 = vunpack.i.l.bf16 %v18177_v55 }
 0x168   : > { %v18217_v61 = vpop.trf.xlu1  ;;  %14065 = vmatprep.subr.bf16.mxu0 %v17956_v9  ;;  %14097 = vmatprep.subr.bf16.mxu1 %v17960_v10 }
 0x169   : > { %10598 = vmatmul.mubr.f32.gmra.mrb[38].mxu0 %v16582_v52  ;;  %10654 = vmatmul.mubr.f32.gmra.mrb[38].mxu1 %v16585_v36  ;;  %v20989_v52 = vld [vmem:[#allocation18_spill] sm:$0xff]  ;;  %v20990_v36 = vld [vmem:[#allocation16_spill] sm:$0xff] }
 0x16a   : > { %14067 = vmatpush3.bf16.msra.mxu0 %v17956_v9  ;;  %14099 = vmatpush3.bf16.msra.mxu1 %v17960_v10  ;;  %v16606_v46 = vpop.trf.xlu0  ;;  %v16602_v10 = vunpack.i.l.bf16 %v16601_v4  ;;  %v16682_v4 = vunpack.i.h.bf16 %v18167_v7 }
 0x16b   : > { %10600 = vmatprep.mubr.f32.mxu0 %v16587_v3  ;;  %10656 = vmatprep.mubr.f32.mxu1 %v16590_v57  ;;  %v16607_v26 = vunpack.i.l.bf16 %v16606_v46  ;;  %v16610_v24 = vunpack.i.h.bf16 %v16606_v46  ;;  %v20991_v3 = vpack.c.bf16 %v20989_v52, %v20990_v36  ;;  %v20992_v57 = vld [vmem:[#allocation19_spill] sm:$0xff]  ;;  %v20993_v46 = vld [vmem:[#allocation17_spill] sm:$0xff] }
 0x16c   : > { %v18223_v40 = vpop.trf.xlu1  ;;  %14069 = vmatprep.subr.bf16.mxu0 %v17978_v41  ;;  %14101 = vmatprep.subr.bf16.mxu1 %v17980_v30 }
 0x16d   : > { %10601 = vmatmul.mubr.f32.gmra.mrb[40].mxu0 %v16592_v43  ;;  %10657 = vmatmul.mubr.f32.gmra.mrb[40].mxu1 %v16595_v35  ;;  %v20994_v43 = vpack.c.bf16 %v20992_v57, %v20993_v46  ;;  %v16687_v35 = vunpack.i.h.bf16 %v18177_v55  ;;  %v21015_v57 = vld [vmem:[#allocation38_spill] sm:$0xff] }
 0x16e   : > { %14071 = vmatpush3.bf16.msra.mxu0 %v17978_v41  ;;  %14103 = vmatpush3.bf16.msra.mxu1 %v17980_v30  ;;  %v16611_v9 = vpop.trf.xlu0 }
 0x16f   : > { %10603 = vmatprep.mubr.f32.mxu0 %v16597_v25  ;;  %10659 = vmatprep.mubr.f32.mxu1 %v16600_v45  ;;  %v16612_v30 = vunpack.i.l.bf16 %v16611_v9  ;;  %v16615_v53 = vunpack.i.h.bf16 %v16611_v9  ;;  %v16692_v25 = vunpack.i.h.bf16 %v18187_v22  ;;  %v16908_v45 = vmov 1966171168  }
 0x170   : > { %v18229_v11 = vpop.trf.xlu1  ;;  %14073 = vmatprep.subr.bf16.mxu0 %v17998_v44  ;;  %14105 = vmatprep.subr.bf16.mxu1 %v18000_v1  ;;  %v1939_v9 = vunpack.c.l.s4 %v16908_v45 }
 0x171   : > { %10604 = vmatmul.mubr.f32.gmra.mrb[42].mxu0 %v16602_v10  ;;  %10660 = vmatmul.mubr.f32.gmra.mrb[42].mxu1 %v16605_v14  ;;  %v1941_v10 = vlaneseq  ;;  %v20995_v14 = vld [vmem:[#allocation22_spill] sm:$0xff] }
 0x172   : > { %14075 = vmatpush3.bf16.msra.mxu0 %v17998_v44  ;;  %14107 = vmatpush3.bf16.msra.mxu1 %v18000_v1  ;;  %v16616_v41 = vpop.trf.xlu0 }
 0x173   : > { %10606 = vmatprep.mubr.f32.mxu0 %v16607_v26  ;;  %10662 = vmatprep.mubr.f32.mxu1 %v16610_v24  ;;  %v16617_v21 = vunpack.i.l.bf16 %v16616_v41  ;;  %v16620_v56 = vunpack.i.h.bf16 %v16616_v41  ;;  %v20996_v26 = vld [vmem:[#allocation20_spill] sm:$0xff]  ;;  %v20998_v41 = vld [vmem:[#allocation23_spill] sm:$0xff] }
 0x174   : > { %v18235_v37 = vpop.trf.xlu1  ;;  %14077 = vmatprep.subr.bf16.mxu0 %v18013_v60  ;;  %14109 = vmatprep.subr.bf16.mxu1 %v18015_v0  ;;  %v20997_v24 = vpack.c.bf16 %v20995_v14, %v20996_v26  ;;  %v21020_v14 = vld [vmem:[#allocation50_spill] sm:$0xff] }
 0x175   : > { %10607 = vmatmul.mubr.f32.gmra.mrb[44].mxu0 %v16612_v30  ;;  %10663 = vmatmul.mubr.f32.gmra.mrb[44].mxu1 %v16615_v53  ;;  %v20999_v30 = vld [vmem:[#allocation21_spill] sm:$0xff]  ;;  %v16694_v53 = vunpack.i.l.bf16 %v18197_v39  ;;  %v16722_v52 = vunpack.i.h.bf16 %v18235_v37  ;;  %v21021_v26 = vld [vmem:[#allocation46_spill] sm:$0xff] }
 0x176   : > { %14079 = vmatpush3.bf16.msra.mxu0 %v18013_v60  ;;  %14111 = vmatpush3.bf16.msra.mxu1 %v18015_v0  ;;  %v16621_v44 = vpop.trf.xlu0  ;;  %v16667_v60 = vunpack.i.h.bf16 %v18129_v59  ;;  %v16664_v0 = vunpack.i.l.bf16 %v18129_v59  ;;  %v20986_v59 = vld [vmem:[#allocation15_spill] sm:$0xff]  ;;  %v21000_v55 = vpack.c.bf16 %v20998_v41, %v20999_v30 }
 0x177   : > { %v16625_v1 = vunpack.i.h.bf16 %v16621_v44  ;;  %v16622_v51 = vunpack.i.l.bf16 %v16621_v44  ;;  %10609 = vmatprep.mubr.f32.mxu0 %v16617_v21  ;;  %10665 = vmatprep.mubr.f32.mxu1 %v16620_v56  ;;  %v20988_v16 = vpack.c.bf16 %v20986_v59, %v20987_v19  ;;  %v16697_v21 = vunpack.i.h.bf16 %v18197_v39  ;;  %v21009_v59 = vld [vmem:[#allocation30_spill] sm:$0xff]  ;;  %v21024_v41 = vld [vmem:[#allocation47_spill] sm:$0xff] }
 0x178   : > { %v18241_v58 = vpop.trf.xlu1  ;;  %14081 = vmatprep.subr.bf16.mxu0 %v18023_v13  ;;  %14113 = vmatprep.subr.bf16.mxu1 %v18025_v32  ;;  %v16702_v56 = vunpack.i.h.bf16 %v18207_v23  ;;  %v1940_v44 = vunpack.c.0.s8 %v1939_v9 }
 0x179   : > { %10610 = vmatmul.mubr.f32.gmra.mrb[46].mxu0 %v16622_v51  ;;  %10666 = vmatmul.mubr.f32.gmra.mrb[46].mxu1 %v16625_v1  ;;  %v1942_v1 = vshrl.u32 %v1941_v10, 7  ;;  %v21001_v51 = vld [vmem:[#allocation26_spill] sm:$0xff] }
 0x17a   : > { %14083 = vmatpush3.bf16.msra.mxu0 %v18023_v13  ;;  %14115 = vmatpush3.bf16.msra.mxu1 %v18025_v32  ;;  %v16672_v13 = vunpack.i.h.bf16 %v18141_v15  ;;  %v20983_v32 = vld [vmem:[#allocation14_spill] sm:$0xff]  ;;  %v16679_v15 = vunpack.i.l.bf16 %v18167_v7  ;;  %v16689_v7 = vunpack.i.l.bf16 %v18187_v22  ;;  %v16699_v22 = vunpack.i.l.bf16 %v18207_v23 }
 0x17b   : > { %10700 = vmatprep.mubr.f32.mxu0 %v16659_v62  ;;  %10756 = vmatprep.mubr.f32.mxu1 %v16662_v48  ;;  %v20985_v50 = vpack.c.bf16 %v20983_v32, %v20984_v28  ;;  %v21002_v62 = vld [vmem:[#allocation24_spill] sm:$0xff]  ;;  %v16709_v23 = vunpack.i.l.bf16 %v18223_v40  ;;  %v16712_v32 = vunpack.i.h.bf16 %v18223_v40  ;;  %v18307_v28 = vsub.s32 %v1940_v44, %v1942_v1 }
 0x17c   : > { %v18251_v31 = vpop.trf.xlu1  ;;  %14116 = vmatprep.subr.bf16.mxu0 %v20803_v17  ;;  %14140 = vmatprep.subr.bf16.mxu1 %v20803_v17  ;;  %v21003_v48 = vpack.c.bf16 %v21001_v51, %v21002_v62  ;;  %v16719_v40 = vunpack.i.l.bf16 %v18235_v37  ;;  %v20745_v1 = vmov 0.0   ;;  %v21032_v51 = vld [vmem:[#allocation32_spill] sm:$0xff] }
 0x17d   : > { %10701 = vmatmul.mubr.f32.vlgmr.msra.gmra.mrb[48].mxu0 %v16664_v0  ;;  %10757 = vmatmul.mubr.f32.vlgmr.msra.gmra.mrb[48].mxu1 %v16667_v60  ;;  %v21004_v60 = vld [vmem:[#allocation27_spill] sm:$0xff]  ;;  %v21005_v0 = vld [vmem:[#allocation25_spill] sm:$0xff]  ;;  %21007 = vst [vmem:[#allocation78_spill] sm:$0xff] %v18307_v28  ;;  %v16732_v37 = vunpack.i.h.bf16 %v18251_v31  ;;  %v21033_v62 = vld [vmem:[#allocation28_spill] sm:$0xff] }
 0x17e   : > { %14118 = vmatpush3.bf16.msra.mxu0 %v20985_v50  ;;  %14142 = vmatpush3.bf16.msra.mxu1 %v20988_v16  ;;  %v21006_v39 = vpack.c.bf16 %v21004_v60, %v21005_v0  ;;  %v21008_v50 = vld [vmem:[#allocation34_spill] sm:$0xff]  ;;  %v21011_v16 = vld [vmem:[#allocation35_spill] sm:$0xff]  ;;  %v21035_v60 = vld [vmem:[#allocation33_spill] sm:$0xff] }
 0x17f   : > { %10703 = vmatprep.mubr.f32.mxu0 %v16669_v33  ;;  %10759 = vmatprep.mubr.f32.mxu1 %v16672_v13  ;;  %v16704_v33 = vunpack.i.l.bf16 %v18217_v61  ;;  %v16707_v13 = vunpack.i.h.bf16 %v18217_v61  ;;  %v21010_v19 = vpack.c.bf16 %v21008_v50, %v21009_v59  ;;  %v18316_v61 = vld [vmem:[%s228_s22] sm:$0xff] }
 0x180   : > { %v18265_v27 = vpop.trf.xlu1  ;;  %14119 = vmatprep.subr.bf16.mxu0 %v20803_v17  ;;  %14143 = vmatprep.subr.bf16.mxu1 %v20803_v17  ;;  %v1944_v36 = vrot.slane %v18316_v61, %v18307_v28  ;;  %v21036_v0 = vld [vmem:[#allocation29_spill] sm:$0xff] }
 0x181   : > { %10704 = vmatmul.mubr.f32.gmra.mrb[50].mxu0 %v16674_v42  ;;  %10760 = vmatmul.mubr.f32.gmra.mrb[50].mxu1 %v16677_v63  ;;  %v21012_v42 = vld [vmem:[#allocation31_spill] sm:$0xff]  ;;  %v16737_v45 = vunpack.i.h.bf16 %v18265_v27  ;;  %v16734_v9 = vunpack.i.l.bf16 %v18265_v27  ;;  %v21042_v50 = vld [vmem:[#allocation37_spill] sm:$0xff] }
 0x182   : > { %14121 = vmatpush3.bf16.msra.mxu0 %v20991_v3  ;;  %14145 = vmatpush3.bf16.msra.mxu1 %v20994_v43  ;;  %v21013_v63 = vpack.c.bf16 %v21011_v16, %v21012_v42  ;;  %v21014_v3 = vld [vmem:[#allocation43_spill] sm:$0xff]  ;;  %v21017_v43 = vld [vmem:[#allocation42_spill] sm:$0xff]  ;;  %v1952_v10 = vcombine.high %v1944_v36, %v1944_v36  ;;  %v21045_v16 = vld [vmem:[#allocation44_spill] sm:$0xff] }
 0x183   : > { %10706 = vmatprep.mubr.f32.mxu0 %v16679_v15  ;;  %10762 = vmatprep.mubr.f32.mxu1 %v16682_v4  ;;  %v16714_v15 = vunpack.i.l.bf16 %v18229_v11  ;;  %v16717_v4 = vunpack.i.h.bf16 %v18229_v11  ;;  %v21016_v46 = vpack.c.bf16 %v21014_v3, %v21015_v57  ;;  %v21053_v3 = vld [vmem:[#allocation57_spill] sm:$0xff] }
 0x184   : > { %14122 = vmatprep.subr.bf16.mxu0 %v20803_v17  ;;  %14146 = vmatprep.subr.bf16.mxu1 %v20803_v17  ;;  %v1974_v27 = vrot.slane %v1952_v10, %v18307_v28  ;;  %v21054_v57 = vld [vmem:[#allocation53_spill] sm:$0xff]  ;;  %v21065_v10 = vld [vmem:[#allocation75_spill] sm:$0xff] }
 0x185   : > { %10707 = vmatmul.mubr.f32.gmra.mrb[52].mxu0 %v16684_v20  ;;  %10763 = vmatmul.mubr.f32.gmra.mrb[52].mxu1 %v16687_v35  ;;  %v21018_v20 = vld [vmem:[#allocation40_spill] sm:$0xff]  ;;  %v16724_v35 = vunpack.i.l.bf16 %v18241_v58 }
 0x186   : > { %14124 = vmatpush3.bf16.msra.mxu0 %v20997_v24  ;;  %14148 = vmatpush3.bf16.msra.mxu1 %v21000_v55  ;;  %v21019_v11 = vpack.c.bf16 %v21017_v43, %v21018_v20  ;;  %v21022_v24 = vpack.c.bf16 %v21020_v14, %v21021_v26  ;;  %v21026_v55 = vld [vmem:[#allocation59_spill] sm:$0xff]  ;;  %v21056_v43 = vld [vmem:[#allocation70_spill] sm:$0xff] }
 0x187   : > { %10709 = vmatprep.mubr.f32.mxu0 %v16689_v7  ;;  %10765 = vmatprep.mubr.f32.mxu1 %v16692_v25  ;;  %v16727_v7 = vunpack.i.h.bf16 %v18241_v58  ;;  %v16729_v25 = vunpack.i.l.bf16 %v18251_v31  ;;  %v21023_v58 = vld [vmem:[#allocation51_spill] sm:$0xff]  ;;  %v1960_v31 = vrot.slane %v1944_v36, %v18307_v28  ;;  %v21057_v20 = vld [vmem:[#allocation62_spill] sm:$0xff] }
 0x188   : > { %14125 = vmatprep.subr.bf16.mxu0 %v20803_v17  ;;  %14149 = vmatprep.subr.bf16.mxu1 %v20803_v17  ;;  %v21025_v30 = vpack.c.bf16 %v21023_v58, %v21024_v41  ;;  %v21066_v14 = vld [vmem:[#allocation74_spill] sm:$0xff]  ;;  %v21069_v58 = vld [vmem:[#allocation76_spill] sm:$0xff] }
 0x189   : > { %10710 = vmatmul.mubr.f32.gmra.mrb[54].mxu0 %v16694_v53  ;;  %10766 = vmatmul.mubr.f32.gmra.mrb[54].mxu1 %v16697_v21  ;;  %v21027_v53 = vld [vmem:[#allocation54_spill] sm:$0xff]  ;;  %v21067_v26 = vpack.c.bf16 %v21065_v10, %v21066_v14  ;;  %v14252_v10 = vpack.c.bf16 %v17900_v12, %v17878_v34  ;;  %v14231_v14 = vpack.c.bf16 %v17943_v47, %v17920_v49  ;;  %v21103_v49 = vld [vmem:[#allocation132_spill] sm:$0xff] }
 0x18a   : > { %14127 = vmatpush3.bf16.msra.mxu0 %v21003_v48  ;;  %14151 = vmatpush3.bf16.msra.mxu1 %v21006_v39  ;;  %v21028_v21 = vpack.c.bf16 %v21026_v55, %v21027_v53  ;;  %v21034_v48 = vpack.c.bf16 %v21032_v51, %v21033_v62  ;;  %v21037_v39 = vpack.c.bf16 %v21035_v60, %v21036_v0  ;;  %v21072_v55 = vld [vmem:[#allocation79_spill] sm:$0xff]  ;;  %v21077_v62 = vld [vmem:[#allocation86_spill] sm:$0xff] }
 0x18b   : > { %10712 = vmatprep.mubr.f32.mxu0 %v16699_v22  ;;  %10768 = vmatprep.mubr.f32.mxu1 %v16702_v56  ;;  %v21029_v22 = vld [vmem:[#allocation58_spill] sm:$0xff]  ;;  %v21030_v56 = vld [vmem:[#allocation56_spill] sm:$0xff]  ;;  %v21080_v0 = vld [vmem:[#allocation67_spill] sm:$0xff] }
 0x18c   : > { %14128 = vmatprep.subr.bf16.mxu0 %v20803_v17  ;;  %14152 = vmatprep.subr.bf16.mxu1 %v20803_v17  ;;  %v21031_v44 = vpack.c.bf16 %v21029_v22, %v21030_v56  ;;  %v1984_v22 = vcombine.high %v1974_v27, %v1974_v27  ;;  %v21074_v56 = vld [vmem:[#allocation83_spill] sm:$0xff] }
 0x18d   : > { %10713 = vmatmul.mubr.f32.gmra.mrb[56].mxu0 %v16704_v33  ;;  %10769 = vmatmul.mubr.f32.gmra.mrb[56].mxu1 %v16707_v13  ;;  %v21038_v33 = vld [vmem:[#allocation39_spill] sm:$0xff]  ;;  %v21039_v13 = vld [vmem:[#allocation36_spill] sm:$0xff] }
 0x18e   : > { %14130 = vmatpush3.bf16.msra.mxu0 %v21010_v19  ;;  %14154 = vmatpush3.bf16.msra.mxu1 %v21013_v63  ;;  %v21044_v19 = vld [vmem:[#allocation48_spill] sm:$0xff]  ;;  %v21047_v63 = vld [vmem:[#allocation49_spill] sm:$0xff] }
 0x18f   : > { %10715 = vmatprep.mubr.f32.mxu0 %v16709_v23  ;;  %10771 = vmatprep.mubr.f32.mxu1 %v16712_v32  ;;  %v21040_v23 = vpack.c.bf16 %v21038_v33, %v21039_v13  ;;  %v21041_v32 = vld [vmem:[#allocation41_spill] sm:$0xff]  ;;  %v21046_v42 = vpack.c.bf16 %v21044_v19, %v21045_v16 }
 0x190   : > { %14131 = vmatprep.subr.bf16.mxu0 %v20803_v17  ;;  %14155 = vmatprep.subr.bf16.mxu1 %v20803_v17  ;;  %v21043_v59 = vpack.c.bf16 %v21041_v32, %v21042_v50  ;;  %v21087_v32 = vld [vmem:[#allocation60_spill] sm:$0xff]  ;;  %v21089_v19 = vld [vmem:[#allocation61_spill] sm:$0xff] }
 0x191   : > { %10716 = vmatmul.mubr.f32.gmra.mrb[58].mxu0 %v16714_v15  ;;  %10772 = vmatmul.mubr.f32.gmra.mrb[58].mxu1 %v16717_v4  ;;  %v21048_v15 = vld [vmem:[#allocation45_spill] sm:$0xff] }
 0x192   : > { %14133 = vmatpush3.bf16.msra.mxu0 %v21016_v46  ;;  %14157 = vmatpush3.bf16.msra.mxu1 %v21019_v11  ;;  %v21049_v4 = vpack.c.bf16 %v21047_v63, %v21048_v15  ;;  %v21055_v46 = vpack.c.bf16 %v21053_v3, %v21054_v57  ;;  %v21058_v11 = vpack.c.bf16 %v21056_v43, %v21057_v20  ;;  %v21091_v63 = vld [vmem:[#allocation95_spill] sm:$0xff]  ;;  %v21095_v3 = vld [vmem:[#allocation105_spill] sm:$0xff]  ;;  %v21097_v43 = vld [vmem:[#allocation106_spill] sm:$0xff] }
 0x193   : > { %10718 = vmatprep.mubr.f32.mxu0 %v16719_v40  ;;  %10774 = vmatprep.mubr.f32.mxu1 %v16722_v52  ;;  %v21050_v40 = vld [vmem:[#allocation55_spill] sm:$0xff]  ;;  %v21051_v52 = vld [vmem:[#allocation52_spill] sm:$0xff] }
 0x194   : > { %14134 = vmatprep.subr.bf16.mxu0 %v20803_v17  ;;  %14158 = vmatprep.subr.bf16.mxu1 %v20803_v17  ;;  %v21052_v36 = vpack.c.bf16 %v21050_v40, %v21051_v52  ;;  %v21093_v40 = vld [vmem:[#allocation96_spill] sm:$0xff] }
 0x195   : > { %10719 = vmatmul.mubr.f32.gmra.mrb[60].mxu0 %v16724_v35  ;;  %10775 = vmatmul.mubr.f32.gmra.mrb[60].mxu1 %v16727_v7  ;;  %v21059_v35 = vld [vmem:[#allocation71_spill] sm:$0xff]  ;;  %v21060_v7 = vld [vmem:[#allocation65_spill] sm:$0xff] }
 0x196   : > { %14136 = vmatpush3.bf16.msra.mxu0 %v21022_v24  ;;  %14160 = vmatpush3.bf16.msra.mxu1 %v21025_v30  ;;  %v21068_v24 = vld [vmem:[#allocation77_spill] sm:$0xff]  ;;  %v21071_v30 = vld [vmem:[#allocation80_spill] sm:$0xff] }
 0x197   : > { %10721 = vmatprep.mubr.f32.mxu0 %v16729_v25  ;;  %10777 = vmatprep.mubr.f32.mxu1 %v16732_v37  ;;  %v21061_v25 = vpack.c.bf16 %v21059_v35, %v21060_v7  ;;  %v21062_v37 = vld [vmem:[#allocation73_spill] sm:$0xff]  ;;  %v21070_v41 = vpack.c.bf16 %v21068_v24, %v21069_v58  ;;  %v21073_v53 = vpack.c.bf16 %v21071_v30, %v21072_v55  ;;  %v21099_v7 = vld [vmem:[#allocation112_spill] sm:$0xff]  ;;  %v21102_v24 = vld [vmem:[#allocation131_spill] sm:$0xff] }
 0x198   : > { %14137 = vmatprep.subr.bf16.mxu0 %v20803_v17  ;;  %14161 = vmatprep.subr.bf16.mxu1 %v20803_v17  ;;  %v14234_v58 = vpack.c.bf16 %v17986_v54, %v21102_v24 }
 0x199   : > { %10722 = vmatmul.mubr.f32.gmra.mrb[62].mxu0 %v16734_v9  ;;  %10778 = vmatmul.mubr.f32.gmra.mrb[62].mxu1 %v16737_v45  ;;  %v21063_v45 = vld [vmem:[#allocation72_spill] sm:$0xff] }
 0x19a   : > { %14139 = vmatpush3.bf16.msra.mxu0 %v21028_v21  ;;  %14163 = vmatpush3.bf16.msra.mxu1 %v21031_v44  ;;  %v21064_v9 = vpack.c.bf16 %v21062_v37, %v21063_v45  ;;  %v1982_v21 = vcombine.high %v1960_v31, %v1960_v31  ;;  %v21075_v44 = vld [vmem:[#allocation82_spill] sm:$0xff]  ;;  %v1937_v45 = vcombine.high %v18316_v61, %v18316_v61  ;;  %v21101_v61 = vld [vmem:[#allocation128_spill] sm:$0xff] }
 0x19b   : > { %10812 = vmatprep.mubr.msk.f32.mxu0 %vm16909_vm0, %v20745_v1  ;;  %10847 = vmatprep.mubr.msk.f32.mxu1 %vm16909_vm0, %v20745_v1  ;;  %v21076_v51 = vpack.c.bf16 %v21074_v56, %v21075_v44  ;;  %v21104_v56 = vld [vmem:[#allocation93_spill] sm:$0xff] }
 0x19c   : > { %14164 = vmatprep.subr.bf16.mxu0 %v20803_v17  ;;  %14188 = vmatprep.subr.bf16.mxu1 %v20803_v17  ;;  %v21105_v44 = vld [vmem:[#allocation97_spill] sm:$0xff] }
 0x19d   : > { %10813 = vmatmul.mubr.f32.vlgmr.msra.gmra.mrb[64].mxu0 %v1960_v31  ;;  %10848 = vmatmul.mubr.f32.vlgmr.msra.gmra.mrb[64].mxu1 %v1974_v27  ;;  %v21083_v31 = vld [vmem:[#allocation69_spill] sm:$0xff]  ;;  %v21084_v27 = vld [vmem:[#allocation68_spill] sm:$0xff] }
 0x19e   : > { %14166 = vmatpush3.bf16.msra.mxu0 %v21034_v48  ;;  %14190 = vmatpush3.bf16.msra.mxu1 %v21037_v39  ;;  %v21078_v48 = vld [vmem:[#allocation85_spill] sm:$0xff]  ;;  %v21081_v39 = vld [vmem:[#allocation66_spill] sm:$0xff]  ;;  %v21085_v13 = vpack.c.bf16 %v21083_v31, %v21084_v27 }
 0x19f   : > { %14167 = vmatprep.subr.bf16.mxu0 %v20803_v17  ;;  %14191 = vmatprep.subr.bf16.mxu1 %v20803_v17  ;;  %v21079_v60 = vpack.c.bf16 %v21077_v62, %v21078_v48  ;;  %v21082_v33 = vpack.c.bf16 %v21080_v0, %v21081_v39  ;;  %v21109_v0 = vld [vmem:[#allocation87_spill] sm:$0xff]  ;;  %v21112_v31 = vld [vmem:[#allocation89_spill] sm:$0xff] }
 0x1a0   : > { %10882 = vmatprep.mubr.msk.f32.mxu0 %vm16909_vm0, %v20745_v1  ;;  %10917 = vmatprep.mubr.msk.f32.mxu1 %vm16909_vm0, %v20745_v1 }
 0x1a2   : > { %14169 = vmatpush3.bf16.msra.mxu0 %v21040_v23  ;;  %14193 = vmatpush3.bf16.msra.mxu1 %v21043_v59  ;;  %v21086_v23 = vld [vmem:[#allocation91_spill] sm:$0xff]  ;;  %v21088_v59 = vld [vmem:[#allocation92_spill] sm:$0xff] }
 0x1a3   : > { %14170 = vmatprep.subr.bf16.mxu0 %v20803_v17  ;;  %14194 = vmatprep.subr.bf16.mxu1 %v20803_v17  ;;  %v14216_v50 = vpack.c.bf16 %v21087_v32, %v21086_v23  ;;  %v14240_v16 = vpack.c.bf16 %v21089_v19, %v21088_v59  ;;  %v21115_v23 = vld [vmem:[#allocation98_spill] sm:$0xff]  ;;  %v21117_v59 = vld [vmem:[#allocation107_spill] sm:$0xff] }
 0x1a6   : > { %14172 = vmatpush3.bf16.msra.mxu0 %v21046_v42  ;;  %14196 = vmatpush3.bf16.msra.mxu1 %v21049_v4  ;;  %v21090_v42 = vld [vmem:[#allocation63_spill] sm:$0xff]  ;;  %v21092_v4 = vld [vmem:[#allocation64_spill] sm:$0xff] }
 0x1a7   : > { %14173 = vmatprep.subr.bf16.mxu0 %v20803_v17  ;;  %14197 = vmatprep.subr.bf16.mxu1 %v20803_v17  ;;  %v14219_v15 = vpack.c.bf16 %v21091_v63, %v21090_v42  ;;  %v14243_v52 = vpack.c.bf16 %v21093_v40, %v21092_v4  ;;  %v21119_v42 = vld [vmem:[#allocation108_spill] sm:$0xff] }
 0x1aa   : > { %14175 = vmatpush3.bf16.msra.mxu0 %v21052_v36  ;;  %14199 = vmatpush3.bf16.msra.mxu1 %v21055_v46  ;;  %v21094_v36 = vld [vmem:[#allocation99_spill] sm:$0xff]  ;;  %v21096_v46 = vld [vmem:[#allocation100_spill] sm:$0xff] }
 0x1ab   : > { %14176 = vmatprep.subr.bf16.mxu0 %v20803_v17  ;;  %14200 = vmatprep.subr.bf16.mxu1 %v20803_v17  ;;  %v14222_v57 = vpack.c.bf16 %v21095_v3, %v21094_v36  ;;  %v14246_v20 = vpack.c.bf16 %v21097_v43, %v21096_v46  ;;  %v21120_v36 = vld [vmem:[#allocation113_spill] sm:$0xff]  ;;  %v21121_v3 = vld [vmem:[#allocation118_spill] sm:$0xff] }
 0x1ae   : > { %14178 = vmatpush3.bf16.msra.mxu0 %v21058_v11  ;;  %14202 = vmatpush3.bf16.msra.mxu1 %v21061_v25  ;;  %v21098_v11 = vld [vmem:[#allocation111_spill] sm:$0xff]  ;;  %v21100_v25 = vld [vmem:[#allocation117_spill] sm:$0xff] }
 0x1af   : > { %14179 = vmatprep.subr.bf16.mxu0 %v20803_v17  ;;  %14203 = vmatprep.subr.bf16.mxu1 %v20803_v17  ;;  %v14225_v35 = vpack.c.bf16 %v17838_v8, %v21098_v11  ;;  %v14249_v37 = vpack.c.bf16 %v21100_v25, %v21099_v7  ;;  %v1951_v8 = vrot.slane %v1937_v45, %v18307_v28  ;;  %v21125_v11 = vld [vmem:[#allocation119_spill] sm:$0xff]  ;;  %v21126_v7 = vld [vmem:[#allocation122_spill] sm:$0xff]  ;;  %v21127_v25 = vld [vmem:[#allocation124_spill] sm:$0xff] }
 0x1b0   : > { %v21128_v45 = vld [vmem:[#allocation123_spill] sm:$0xff] }
 0x1b1   : > { %v18490_v47 = vrot.slane %v1951_v8, %v18307_v28 }
 0x1b2   : > { %14181 = vmatpush3.bf16.msra.mxu0 %v21064_v9  ;;  %14205 = vmatpush3.bf16.msra.mxu1 %v21067_v26  ;;  %v14228_v9 = vpack.c.bf16 %v17898_v5, %v17876_v6  ;;  %v14255_v26 = vpack.c.bf16 %v21101_v61, %v17922_v29  ;;  %v14258_v29 = vpack.c.bf16 %v17989_v2, %v21103_v49 }
 0x1b3   : > { %14182 = vmatprep.subr.bf16.mxu0 %v20803_v17  ;;  %14206 = vmatprep.subr.bf16.mxu1 %v20803_v17 }
 0x1b6   : > { %14184 = vmatpush3.bf16.msra.mxu0 %v21070_v41  ;;  %14208 = vmatpush3.bf16.msra.mxu1 %v21073_v53  ;;  %v1953_v41 = vcombine.high %v1951_v8, %v1951_v8 }
 0x1b7   : > { %14185 = vmatprep.subr.bf16.mxu0 %v20803_v17  ;;  %14209 = vmatprep.subr.bf16.mxu1 %v20803_v17 }
 0x1b8   : > { %v18493_v53 = vrot.slane %v1953_v41, %v18307_v28  ;;  %v21135_v41 = vld [vmem:[#allocation130_spill] sm:$0xff] }
 0x1ba   : > { %14187 = vmatpush3.bf16.msra.mxu0 %v21076_v51  ;;  %14211 = vmatpush3.bf16.msra.mxu1 %v21079_v60  ;;  %v14264_v51 = vpack.c.bf16 %v21105_v44, %v21104_v56  ;;  %v21108_v60 = vld [vmem:[#allocation88_spill] sm:$0xff] }
 0x1bb   : > { %14212 = vmatprep.subr.bf16.mxu0 %v20803_v17  ;;  %14236 = vmatprep.subr.bf16.mxu1 %v20803_v17  ;;  %v21110_v39 = vpack.c.bf16 %v21108_v60, %v21109_v0 }
 0x1bd   : > { %10883 = vmatmul.mubr.f32.vlgmr.msra.gmra.mrb[66].mxu0 %v1982_v21  ;;  %10918 = vmatmul.mubr.f32.vlgmr.msra.gmra.mrb[66].mxu1 %v1984_v22 }
 0x1be   : > { %14214 = vmatpush3.bf16.msra.mxu0 %v21082_v33  ;;  %14238 = vmatpush3.bf16.msra.mxu1 %v21085_v13  ;;  %v21111_v33 = vld [vmem:[#allocation90_spill] sm:$0xff] }
 0x1bf   : > { %14215 = vmatprep.subr.bf16.mxu0 %v20803_v17  ;;  %14239 = vmatprep.subr.bf16.mxu1 %v20803_v17  ;;  %v21113_v27 = vpack.c.bf16 %v21111_v33, %v21112_v31  ;;  %v21114_v13 = vld [vmem:[#allocation94_spill] sm:$0xff] }
 0x1c0   : > { %10952 = vmatprep.mubr.msk.f32.mxu0 %vm16909_vm0, %v20745_v1  ;;  %10987 = vmatprep.mubr.msk.f32.mxu1 %vm16909_vm0, %v20745_v1  ;;  %v14288_v32 = vpack.c.bf16 %v21115_v23, %v21114_v13  ;;  %v21143_v13 = vld [vmem:[#allocation138_spill] sm:$0xff] }
 0x1c2   : > { %14217 = vmatpush3.bf16.msra.mxu0 %v14216_v50  ;;  %14241 = vmatpush3.bf16.msra.mxu1 %v14240_v16  ;;  %v21116_v50 = vld [vmem:[#allocation101_spill] sm:$0xff]  ;;  %v21118_v16 = vld [vmem:[#allocation102_spill] sm:$0xff] }
 0x1c3   : > { %14218 = vmatprep.subr.bf16.mxu0 %v20803_v17  ;;  %14242 = vmatprep.subr.bf16.mxu1 %v20803_v17  ;;  %v14267_v19 = vpack.c.bf16 %v21117_v59, %v21116_v50  ;;  %v14291_v63 = vpack.c.bf16 %v21119_v42, %v21118_v16  ;;  %v1985_v50 = vcombine.high %v18493_v53, %v18493_v53 }
 0x1c6   : > { %14220 = vmatpush3.bf16.msra.mxu0 %v14219_v15  ;;  %14244 = vmatpush3.bf16.msra.mxu1 %v14243_v52 }
 0x1c7   : > { %14221 = vmatprep.subr.bf16.mxu0 %v20803_v17  ;;  %14245 = vmatprep.subr.bf16.mxu1 %v20803_v17 }
 0x1ca   : > { %14223 = vmatpush3.bf16.msra.mxu0 %v14222_v57  ;;  %14247 = vmatpush3.bf16.msra.mxu1 %v14246_v20  ;;  %v14270_v57 = vpack.c.bf16 %v21121_v3, %v21120_v36  ;;  %v21124_v20 = vld [vmem:[#allocation114_spill] sm:$0xff] }
 0x1cb   : > { %14224 = vmatprep.subr.bf16.mxu0 %v20803_v17  ;;  %14248 = vmatprep.subr.bf16.mxu1 %v20803_v17 }
 0x1ce   : > { %14226 = vmatpush3.bf16.msra.mxu0 %v14225_v35  ;;  %14250 = vmatpush3.bf16.msra.mxu1 %v14249_v37  ;;  %v14294_v35 = vpack.c.bf16 %v21125_v11, %v21124_v20  ;;  %v14273_v37 = vpack.c.bf16 %v21127_v25, %v21126_v7 }
 0x1cf   : > { %14227 = vmatprep.subr.bf16.mxu0 %v20803_v17  ;;  %14251 = vmatprep.subr.bf16.mxu1 %v20803_v17 }
 0x1d2   : > { %14229 = vmatpush3.bf16.msra.mxu0 %v14228_v9  ;;  %14253 = vmatpush3.bf16.msra.mxu1 %v14252_v10  ;;  %v21129_v9 = vld [vmem:[#allocation125_spill] sm:$0xff] }
 0x1d3   : > { %14230 = vmatprep.subr.bf16.mxu0 %v20803_v17  ;;  %14254 = vmatprep.subr.bf16.mxu1 %v20803_v17  ;;  %v14297_v10 = vpack.c.bf16 %v21129_v9, %v21128_v45 }
 0x1d4   : > { %v10366_v6 = vpop.f32.mrb[0].mxu0  ;;  %v10422_v12 = vpop.f32.mrb[0].mxu1 }
 0x1d5   : > { %v618_v34 = vpop.f32.mrb[1].mxu0  ;;  %v795_v5 = vpop.f32.mrb[1].mxu1 }
 0x1d6   : > { %v18481_v30 = vpack.c.bf16 %v10366_v6, %v618_v34  ;;  %v18483_v55 = vpack.c.bf16 %v10422_v12, %v795_v5  ;;  %14232 = vmatpush3.bf16.msra.mxu0 %v14231_v14  ;;  %14256 = vmatpush3.bf16.msra.mxu1 %v14255_v26  ;;  %v21130_v6 = vld [vmem:[#allocation126_spill] sm:$0xff]  ;;  %v21131_v12 = vld [vmem:[#allocation129_spill] sm:$0xff] }
 0x1d7   : > { %14233 = vmatprep.subr.bf16.mxu0 %v20803_v17  ;;  %14257 = vmatprep.subr.bf16.mxu1 %v20803_v17  ;;  %v14276_v34 = vpack.c.bf16 %v21131_v12, %v21130_v6 }
 0x1da   : > { %14235 = vmatpush3.bf16.msra.mxu0 %v14234_v58  ;;  %14259 = vmatpush3.bf16.msra.mxu1 %v14258_v29  ;;  %v21134_v58 = vld [vmem:[#allocation127_spill] sm:$0xff]  ;;  %v21136_v29 = vld [vmem:[#allocation133_spill] sm:$0xff] }
 0x1db   : > { %14260 = vmatprep.subr.bf16.mxu0 %v20803_v17  ;;  %14284 = vmatprep.subr.bf16.mxu1 %v20803_v17  ;;  %v14300_v49 = vpack.c.bf16 %v21135_v41, %v21134_v58 }
 0x1dc   : > { %v10369_v54 = vpop.f32.mrb[2].mxu0  ;;  %v10425_v21 = vpop.f32.mrb[2].mxu1 }
 0x1dd   : > { %10953 = vmatmul.mubr.f32.vlgmr.msra.gmra.mrb[68].mxu0 %v18490_v47  ;;  %10988 = vmatmul.mubr.f32.vlgmr.msra.gmra.mrb[68].mxu1 %v18493_v53  ;;  %v628_v2 = vpop.f32.mrb[3].mxu0  ;;  %v805_v22 = vpop.f32.mrb[3].mxu1 }
 0x1de   : > { %v18501_v62 = vpack.c.bf16 %v10369_v54, %v628_v2  ;;  %v18503_v48 = vpack.c.bf16 %v10425_v21, %v805_v22  ;;  %14262 = vmatpush3.bf16.msra.mxu0 %v21110_v39  ;;  %14286 = vmatpush3.bf16.msra.mxu1 %v21113_v27  ;;  %v21137_v54 = vld [vmem:[#allocation135_spill] sm:$0xff]  ;;  %v21138_v2 = vld [vmem:[#allocation134_spill] sm:$0xff]  ;;  %v21139_v22 = vld [vmem:[#allocation136_spill] sm:$0xff]  ;;  %v14282_v39 = vpack.c.bf16 %v18017_v38, %v18005_v18 }
 0x1df   : > { %14263 = vmatprep.subr.bf16.mxu0 %v20803_v17  ;;  %14287 = vmatprep.subr.bf16.mxu1 %v20803_v17  ;;  %v14279_v21 = vpack.c.bf16 %v21137_v54, %v21136_v29  ;;  %v14303_v56 = vpack.c.bf16 %v21139_v22, %v21138_v2  ;;  %v21142_v27 = vld [vmem:[#allocation137_spill] sm:$0xff] }
 0x1e0   : > { %21106 = vst [vmem:[#allocation81_spill] sm:$0xff] %v18501_v62  ;;  %21107 = vst [vmem:[#allocation84_spill] sm:$0xff] %v18503_v48  ;;  %11022 = vmatprep.mubr.msk.f32.mxu0 %vm16909_vm0, %v20745_v1  ;;  %11057 = vmatprep.mubr.msk.f32.mxu1 %vm16909_vm0, %v20745_v1  ;;  %v14306_v23 = vpack.c.bf16 %v21143_v13, %v21142_v27 }
 0x1e2   : > { %14265 = vmatpush3.bf16.msra.mxu0 %v14264_v51  ;;  %14289 = vmatpush3.bf16.msra.mxu1 %v14288_v32  ;;  %v1983_v32 = vcombine.high %v18490_v47, %v18490_v47 }
 0x1e3   : > { %14266 = vmatprep.subr.bf16.mxu0 %v20803_v17  ;;  %14290 = vmatprep.subr.bf16.mxu1 %v20803_v17 }
 0x1e4   : > { %v10372_v15 = vpop.f32.mrb[4].mxu0  ;;  %v10428_v4 = vpop.f32.mrb[4].mxu1 }
 0x1e5   : > { %v638_v40 = vpop.f32.mrb[5].mxu0  ;;  %v815_v52 = vpop.f32.mrb[5].mxu1 }
 0x1e6   : > { %v18527_v46 = vpack.c.bf16 %v10372_v15, %v638_v40  ;;  %v18529_v43 = vpack.c.bf16 %v10428_v4, %v815_v52  ;;  %14268 = vmatpush3.bf16.msra.mxu0 %v14267_v19  ;;  %14292 = vmatpush3.bf16.msra.mxu1 %v14291_v63 }
 0x1e7   : > { %14269 = vmatprep.subr.bf16.mxu0 %v20803_v17  ;;  %14293 = vmatprep.subr.bf16.mxu1 %v20803_v17 }
 0x1e8   : > { %21122 = vst [vmem:[#allocation103_spill] sm:$0xff] %v18527_v46  ;;  %21123 = vst [vmem:[#allocation104_spill] sm:$0xff] %v18529_v43 }
 0x1ea   : > { %14271 = vmatpush3.bf16.msra.mxu0 %v14270_v57  ;;  %14295 = vmatpush3.bf16.msra.mxu1 %v14294_v35  ;;  %v18609_v35 = vld [vmem:[%s210_s27] sm:$0xff] }
 0x1eb   : > { %14272 = vmatprep.subr.bf16.mxu0 %v20803_v17  ;;  %14296 = vmatprep.subr.bf16.mxu1 %v20803_v17  ;;  %v2562_v9 = vrot.slane %v18609_v35, %v18307_v28 }
 0x1ec   : > { %v10375_v8 = vpop.f32.mrb[6].mxu0  ;;  %v10431_v14 = vpop.f32.mrb[6].mxu1 }
 0x1ed   : > { %v648_v61 = vpop.f32.mrb[7].mxu0  ;;  %v825_v26 = vpop.f32.mrb[7].mxu1  ;;  %v2570_v12 = vcombine.high %v2562_v9, %v2562_v9 }
 0x1ee   : > { %v18543_v5 = vpack.c.bf16 %v10375_v8, %v648_v61  ;;  %v18545_v24 = vpack.c.bf16 %v10431_v14, %v825_v26  ;;  %14274 = vmatpush3.bf16.msra.mxu0 %v14273_v37  ;;  %14298 = vmatpush3.bf16.msra.mxu1 %v14297_v10 }
 0x1ef   : > { %14275 = vmatprep.subr.bf16.mxu0 %v20803_v17  ;;  %14299 = vmatprep.subr.bf16.mxu1 %v20803_v17  ;;  %v18635_v2 = vrot.slane %v2570_v12, %v18307_v28 }
 0x1f0   : > { %21132 = vst [vmem:[#allocation109_spill] sm:$0xff] %v18543_v5  ;;  %21133 = vst [vmem:[#allocation110_spill] sm:$0xff] %v18545_v24 }
 0x1f2   : > { %14277 = vmatpush3.bf16.msra.mxu0 %v14276_v34  ;;  %14301 = vmatpush3.bf16.msra.mxu1 %v14300_v49 }
 0x1f3   : > { %14278 = vmatprep.subr.bf16.mxu0 %v20803_v17  ;;  %14302 = vmatprep.subr.bf16.mxu1 %v20803_v17 }
 0x1f4   : > { %v10378_v44 = vpop.f32.mrb[8].mxu0  ;;  %v10434_v51 = vpop.f32.mrb[8].mxu1 }
 0x1f5   : > { %v658_v60 = vpop.f32.mrb[9].mxu0  ;;  %v835_v0 = vpop.f32.mrb[9].mxu1 }
 0x1f6   : > { %v18559_v33 = vpack.c.bf16 %v10378_v44, %v658_v60  ;;  %v18561_v31 = vpack.c.bf16 %v10434_v51, %v835_v0  ;;  %14280 = vmatpush3.bf16.msra.mxu0 %v14279_v21  ;;  %14304 = vmatpush3.bf16.msra.mxu1 %v14303_v56  ;;  %v18632_v21 = vrot.slane %v2562_v9, %v18307_v28 }
 0x1f7   : > { %14281 = vmatprep.subr.bf16.mxu0 %v20803_v17  ;;  %14305 = vmatprep.subr.bf16.mxu1 %v20803_v17 }
 0x1f8   : > { %21140 = vst [vmem:[#allocation115_spill] sm:$0xff] %v18559_v33  ;;  %21141 = vst [vmem:[#allocation116_spill] sm:$0xff] %v18561_v31 }
 0x1fa   : > { %14283 = vmatpush3.bf16.msra.mxu0 %v14282_v39  ;;  %14307 = vmatpush3.bf16.msra.mxu1 %v14306_v23 }
 0x1fb   : > { %14308 = vmatprep.subr.bf16.mxu0 %v20803_v17  ;;  %14332 = vmatprep.subr.bf16.mxu1 %v20803_v17 }
 0x1fc   : > { %v10381_v18 = vpop.f32.mrb[10].mxu0  ;;  %v10437_v38 = vpop.f32.mrb[10].mxu1 }
 0x1fd   : > { %11023 = vmatmul.mubr.f32.vlgmr.msra.gmra.mrb[70].mxu0 %v1983_v32  ;;  %11058 = vmatmul.mubr.f32.vlgmr.msra.gmra.mrb[70].mxu1 %v1985_v50  ;;  %v668_v59 = vpop.f32.mrb[11].mxu0  ;;  %v845_v19 = vpop.f32.mrb[11].mxu1 }
 0x1fe   : > { %v18573_v16 = vpack.c.bf16 %v10381_v18, %v668_v59  ;;  %v18575_v42 = vpack.c.bf16 %v10437_v38, %v845_v19  ;;  %14310 = vmatpush3.bf16.msra.mxu0 %v18481_v30  ;;  %14334 = vmatpush3.bf16.msra.mxu1 %v18483_v55 }
 0x1ff   : > { %14311 = vmatprep.subr.bf16.mxu0 %v20803_v17  ;;  %14335 = vmatprep.subr.bf16.mxu1 %v20803_v17 }
 0x200   : > { %21144 = vst [vmem:[#allocation120_spill] sm:$0xff] %v18573_v16  ;;  %21145 = vst [vmem:[#allocation121_spill] sm:$0xff] %v18575_v42  ;;  %11092 = vmatprep.mubr.msk.f32.mxu0 %vm16909_vm0, %v20745_v1  ;;  %11127 = vmatprep.mubr.msk.f32.mxu1 %vm16909_vm0, %v20745_v1 }
 0x202   : > { %14313 = vmatpush3.bf16.msra.mxu0 %v18501_v62  ;;  %14337 = vmatpush3.bf16.msra.mxu1 %v18503_v48 }
 0x203   : > { %14314 = vmatprep.subr.bf16.mxu0 %v20803_v17  ;;  %14338 = vmatprep.subr.bf16.mxu1 %v20803_v17 }
 0x204   : > { %v10384_v47 = vpop.f32.mrb[12].mxu0  ;;  %v10440_v53 = vpop.f32.mrb[12].mxu1 }
 0x205   : > { %v678_v63 = vpop.f32.mrb[13].mxu0  ;;  %v855_v15 = vpop.f32.mrb[13].mxu1 }
 0x206   : > { %v18589_v4 = vpack.c.bf16 %v10384_v47, %v678_v63  ;;  %v18591_v40 = vpack.c.bf16 %v10440_v53, %v855_v15  ;;  %14316 = vmatpush3.bf16.msra.mxu0 %v18527_v46  ;;  %14340 = vmatpush3.bf16.msra.mxu1 %v18529_v43 }
 0x207   : > { %14317 = vmatprep.subr.bf16.mxu0 %v20803_v17  ;;  %14341 = vmatprep.subr.bf16.mxu1 %v20803_v17 }
 0x208   : > { %21146 = vst [vmem:[#allocation14_spill] sm:$0xff] %v18589_v4  ;;  %21147 = vst [vmem:[#allocation12_spill] sm:$0xff] %v18591_v40 }
 0x20a   : > { %14319 = vmatpush3.bf16.msra.mxu0 %v18543_v5  ;;  %14343 = vmatpush3.bf16.msra.mxu1 %v18545_v24 }
 0x20b   : > { %14320 = vmatprep.subr.bf16.mxu0 %v20803_v17  ;;  %14344 = vmatprep.subr.bf16.mxu1 %v20803_v17 }
 0x20c   : > { %v10387_v52 = vpop.f32.mrb[14].mxu0  ;;  %v10443_v36 = vpop.f32.mrb[14].mxu1 }
 0x20d   : > { %v688_v3 = vpop.f32.mrb[15].mxu0  ;;  %v865_v57 = vpop.f32.mrb[15].mxu1 }
 0x20e   : > { %v18601_v20 = vpack.c.bf16 %v10387_v52, %v688_v3  ;;  %v18603_v11 = vpack.c.bf16 %v10443_v36, %v865_v57  ;;  %14322 = vmatpush3.bf16.msra.mxu0 %v18559_v33  ;;  %14346 = vmatpush3.bf16.msra.mxu1 %v18561_v31 }
 0x20f   : > { %14323 = vmatprep.subr.bf16.mxu0 %v20803_v17  ;;  %14347 = vmatprep.subr.bf16.mxu1 %v20803_v17 }
 0x210   : > { %21148 = vst [vmem:[#allocation15_spill] sm:$0xff] %v18601_v20  ;;  %21149 = vst [vmem:[#allocation13_spill] sm:$0xff] %v18603_v11  ;;  %v10478_v7 = vpop.f32.mrb[16].mxu0  ;;  %v10534_v25 = vpop.f32.mrb[16].mxu1 }
 0x211   : > { %v972_v37 = vpop.f32.mrb[17].mxu0  ;;  %v1149_v45 = vpop.f32.mrb[17].mxu1 }
 0x212   : > { %v18615_v10 = vpack.c.bf16 %v10478_v7, %v972_v37  ;;  %v18617_v8 = vpack.c.bf16 %v10534_v25, %v1149_v45  ;;  %14325 = vmatpush3.bf16.msra.mxu0 %v18573_v16  ;;  %14349 = vmatpush3.bf16.msra.mxu1 %v18575_v42 }
 0x213   : > { %14326 = vmatprep.subr.bf16.mxu0 %v20803_v17  ;;  %14350 = vmatprep.subr.bf16.mxu1 %v20803_v17 }
 0x214   : > { %v10481_v14 = vpop.f32.mrb[18].mxu0  ;;  %v10537_v61 = vpop.f32.mrb[18].mxu1 }
 0x215   : > { %v982_v26 = vpop.f32.mrb[19].mxu0  ;;  %v1159_v6 = vpop.f32.mrb[19].mxu1 }
 0x216   : > { %v18623_v34 = vpack.c.bf16 %v10481_v14, %v982_v26  ;;  %v18625_v58 = vpack.c.bf16 %v10537_v61, %v1159_v6  ;;  %14328 = vmatpush3.bf16.msra.mxu0 %v18589_v4  ;;  %14352 = vmatpush3.bf16.msra.mxu1 %v18591_v40 }
 0x217   : > { %14329 = vmatprep.subr.bf16.mxu0 %v20803_v17  ;;  %14353 = vmatprep.subr.bf16.mxu1 %v20803_v17 }
 0x218   : > { %v10484_v41 = vpop.f32.mrb[20].mxu0  ;;  %v10540_v49 = vpop.f32.mrb[20].mxu1 }
 0x219   : > { %v992_v29 = vpop.f32.mrb[21].mxu0  ;;  %v1169_v54 = vpop.f32.mrb[21].mxu1 }
 0x21a   : > { %v18637_v22 = vpack.c.bf16 %v10484_v41, %v992_v29  ;;  %v18639_v56 = vpack.c.bf16 %v10540_v49, %v1169_v54  ;;  %14331 = vmatpush3.bf16.msra.mxu0 %v18601_v20  ;;  %14355 = vmatpush3.bf16.msra.mxu1 %v18603_v11 }
 0x21b   : > { %14356 = vmatprep.subr.bf16.mxu0 %v20803_v17  ;;  %14380 = vmatprep.subr.bf16.mxu1 %v20803_v17 }
 0x21c   : > { %v10487_v44 = vpop.f32.mrb[22].mxu0  ;;  %v10543_v51 = vpop.f32.mrb[22].mxu1 }
 0x21d   : > { %11093 = vmatmul.mubr.f32.vlgmr.msra.gmra.mrb[72].mxu0 %v18632_v21  ;;  %11128 = vmatmul.mubr.f32.vlgmr.msra.gmra.mrb[72].mxu1 %v18635_v2  ;;  %v1002_v60 = vpop.f32.mrb[23].mxu0  ;;  %v1179_v0 = vpop.f32.mrb[23].mxu1 }
 0x21e   : > { %v18647_v39 = vpack.c.bf16 %v10487_v44, %v1002_v60  ;;  %v18649_v27 = vpack.c.bf16 %v10543_v51, %v1179_v0  ;;  %14358 = vmatpush3.bf16.msra.mxu0 %v18615_v10  ;;  %14382 = vmatpush3.bf16.msra.mxu1 %v18617_v8 }
 0x21f   : > { %14359 = vmatprep.subr.bf16.mxu0 %v20803_v17  ;;  %14383 = vmatprep.subr.bf16.mxu1 %v20803_v17 }
 0x220   : > { %v10490_v13 = vpop.f32.mrb[24].mxu0  ;;  %v10546_v23 = vpop.f32.mrb[24].mxu1  ;;  %11162 = vmatprep.mubr.msk.f32.mxu0 %vm16909_vm0, %v20745_v1  ;;  %11197 = vmatprep.mubr.msk.f32.mxu1 %vm16909_vm0, %v20745_v1 }
 0x221   : > { %v1012_v32 = vpop.f32.mrb[25].mxu0  ;;  %v1189_v50 = vpop.f32.mrb[25].mxu1 }
 0x222   : > { %v18659_v18 = vpack.c.bf16 %v10490_v13, %v1012_v32  ;;  %v18661_v38 = vpack.c.bf16 %v10546_v23, %v1189_v50  ;;  %14361 = vmatpush3.bf16.msra.mxu0 %v18623_v34  ;;  %14385 = vmatpush3.bf16.msra.mxu1 %v18625_v58 }
 0x223   : > { %14362 = vmatprep.subr.bf16.mxu0 %v20803_v17  ;;  %14386 = vmatprep.subr.bf16.mxu1 %v20803_v17 }
 0x224   : > { %v10493_v59 = vpop.f32.mrb[26].mxu0  ;;  %v10549_v19 = vpop.f32.mrb[26].mxu1 }
 0x225   : > { %v1022_v47 = vpop.f32.mrb[27].mxu0  ;;  %v1199_v53 = vpop.f32.mrb[27].mxu1 }
 0x226   : > { %v18667_v63 = vpack.c.bf16 %v10493_v59, %v1022_v47  ;;  %v18669_v15 = vpack.c.bf16 %v10549_v19, %v1199_v53  ;;  %14364 = vmatpush3.bf16.msra.mxu0 %v18637_v22  ;;  %14388 = vmatpush3.bf16.msra.mxu1 %v18639_v56  ;;  %v18709_v47 = vcombine.high %v18632_v21, %v18632_v21 }
 0x227   : > { %14365 = vmatprep.subr.bf16.mxu0 %v20803_v17  ;;  %14389 = vmatprep.subr.bf16.mxu1 %v20803_v17  ;;  %v18713_v53 = vcombine.high %v18635_v2, %v18635_v2 }
 0x228   : > { %v10496_v52 = vpop.f32.mrb[28].mxu0  ;;  %v10552_v36 = vpop.f32.mrb[28].mxu1 }
 0x229   : > { %v1032_v3 = vpop.f32.mrb[29].mxu0  ;;  %v1209_v57 = vpop.f32.mrb[29].mxu1 }
 0x22a   : > { %v18675_v7 = vpack.c.bf16 %v10496_v52, %v1032_v3  ;;  %v18677_v25 = vpack.c.bf16 %v10552_v36, %v1209_v57  ;;  %14367 = vmatpush3.bf16.msra.mxu0 %v18647_v39  ;;  %14391 = vmatpush3.bf16.msra.mxu1 %v18649_v27 }
 0x22b   : > { %14368 = vmatprep.subr.bf16.mxu0 %v20803_v17  ;;  %14392 = vmatprep.subr.bf16.mxu1 %v20803_v17 }
 0x22c   : > { %v10499_v37 = vpop.f32.mrb[30].mxu0  ;;  %v10555_v45 = vpop.f32.mrb[30].mxu1 }
 0x22d   : > { %v1042_v9 = vpop.f32.mrb[31].mxu0  ;;  %v1219_v14 = vpop.f32.mrb[31].mxu1 }
 0x22e   : > { %v18683_v61 = vpack.c.bf16 %v10499_v37, %v1042_v9  ;;  %v18685_v26 = vpack.c.bf16 %v10555_v45, %v1219_v14  ;;  %14370 = vmatpush3.bf16.msra.mxu0 %v18659_v18  ;;  %14394 = vmatpush3.bf16.msra.mxu1 %v18661_v38 }
 0x22f   : > { %14371 = vmatprep.subr.bf16.mxu0 %v20803_v17  ;;  %14395 = vmatprep.subr.bf16.mxu1 %v20803_v17 }
 0x230   : > { %v10590_v6 = vpop.f32.mrb[32].mxu0  ;;  %v10646_v12 = vpop.f32.mrb[32].mxu1 }
 0x231   : > { %v1326_v41 = vpop.f32.mrb[33].mxu0  ;;  %v1503_v49 = vpop.f32.mrb[33].mxu1 }
 0x232   : > { %v18691_v29 = vpack.c.bf16 %v10590_v6, %v1326_v41  ;;  %v18693_v54 = vpack.c.bf16 %v10646_v12, %v1503_v49  ;;  %14373 = vmatpush3.bf16.msra.mxu0 %v18667_v63  ;;  %14397 = vmatpush3.bf16.msra.mxu1 %v18669_v15 }
 0x233   : > { %14374 = vmatprep.subr.bf16.mxu0 %v20803_v17  ;;  %14398 = vmatprep.subr.bf16.mxu1 %v20803_v17 }
 0x234   : > { %v10593_v44 = vpop.f32.mrb[34].mxu0  ;;  %v10649_v51 = vpop.f32.mrb[34].mxu1 }
 0x235   : > { %v1336_v60 = vpop.f32.mrb[35].mxu0  ;;  %v1513_v0 = vpop.f32.mrb[35].mxu1 }
 0x236   : > { %v18699_v13 = vpack.c.bf16 %v10593_v44, %v1336_v60  ;;  %v18701_v23 = vpack.c.bf16 %v10649_v51, %v1513_v0  ;;  %14376 = vmatpush3.bf16.msra.mxu0 %v18675_v7  ;;  %14400 = vmatpush3.bf16.msra.mxu1 %v18677_v25 }
 0x237   : > { %14377 = vmatprep.subr.bf16.mxu0 %v20803_v17  ;;  %14401 = vmatprep.subr.bf16.mxu1 %v20803_v17 }
 0x238   : > { %v10596_v32 = vpop.f32.mrb[36].mxu0  ;;  %v10652_v50 = vpop.f32.mrb[36].mxu1 }
 0x239   : > { %v1346_v59 = vpop.f32.mrb[37].mxu0  ;;  %v1523_v19 = vpop.f32.mrb[37].mxu1 }
 0x23a   : > { %v18715_v52 = vpack.c.bf16 %v10596_v32, %v1346_v59  ;;  %v18717_v36 = vpack.c.bf16 %v10652_v50, %v1523_v19  ;;  %14379 = vmatpush3.bf16.msra.mxu0 %v18683_v61  ;;  %14403 = vmatpush3.bf16.msra.mxu1 %v18685_v26 }
 0x23b   : > { %14404 = vmatprep.subr.bf16.mxu0 %v20803_v17  ;;  %14428 = vmatprep.subr.bf16.mxu1 %v20803_v17 }
 0x23c   : > { %v10599_v3 = vpop.f32.mrb[38].mxu0  ;;  %v10655_v57 = vpop.f32.mrb[38].mxu1 }
 0x23d   : > { %11163 = vmatmul.mubr.f32.vlgmr.msra.gmra.mrb[74].mxu0 %v18709_v47  ;;  %11198 = vmatmul.mubr.f32.vlgmr.msra.gmra.mrb[74].mxu1 %v18713_v53  ;;  %v1356_v37 = vpop.f32.mrb[39].mxu0  ;;  %v1533_v45 = vpop.f32.mrb[39].mxu1 }
 0x23e   : > { %v18725_v9 = vpack.c.bf16 %v10599_v3, %v1356_v37  ;;  %v18727_v14 = vpack.c.bf16 %v10655_v57, %v1533_v45  ;;  %14406 = vmatpush3.bf16.msra.mxu0 %v18691_v29  ;;  %14430 = vmatpush3.bf16.msra.mxu1 %v18693_v54 }
 0x23f   : > { %14407 = vmatprep.subr.bf16.mxu0 %v20803_v17  ;;  %14431 = vmatprep.subr.bf16.mxu1 %v20803_v17 }
 0x240   : > { %21150 = vst [vmem:[#allocation18_spill] sm:$0xff] %v18725_v9  ;;  %21151 = vst [vmem:[#allocation16_spill] sm:$0xff] %v18727_v14  ;;  %v10602_v6 = vpop.f32.mrb[40].mxu0  ;;  %v10658_v12 = vpop.f32.mrb[40].mxu1  ;;  %11232 = vmatprep.mubr.msk.f32.mxu0 %vm16909_vm0, %v20745_v1  ;;  %11267 = vmatprep.mubr.msk.f32.mxu1 %vm16909_vm0, %v20745_v1 }
 0x241   : > { %v1366_v41 = vpop.f32.mrb[41].mxu0  ;;  %v1543_v49 = vpop.f32.mrb[41].mxu1 }
 0x242   : > { %v18737_v44 = vpack.c.bf16 %v10602_v6, %v1366_v41  ;;  %v18739_v51 = vpack.c.bf16 %v10658_v12, %v1543_v49  ;;  %14409 = vmatpush3.bf16.msra.mxu0 %v18699_v13  ;;  %14433 = vmatpush3.bf16.msra.mxu1 %v18701_v23 }
 0x243   : > { %14410 = vmatprep.subr.bf16.mxu0 %v20803_v17  ;;  %14434 = vmatprep.subr.bf16.mxu1 %v20803_v17 }
 0x244   : > { %21152 = vst [vmem:[#allocation19_spill] sm:$0xff] %v18737_v44  ;;  %21153 = vst [vmem:[#allocation17_spill] sm:$0xff] %v18739_v51  ;;  %v10605_v60 = vpop.f32.mrb[42].mxu0  ;;  %v10661_v0 = vpop.f32.mrb[42].mxu1 }
 0x245   : > { %v1376_v32 = vpop.f32.mrb[43].mxu0  ;;  %v1553_v50 = vpop.f32.mrb[43].mxu1 }
 0x246   : > { %v18745_v59 = vpack.c.bf16 %v10605_v60, %v1376_v32  ;;  %v18747_v19 = vpack.c.bf16 %v10661_v0, %v1553_v50  ;;  %14412 = vmatpush3.bf16.msra.mxu0 %v18715_v52  ;;  %14436 = vmatpush3.bf16.msra.mxu1 %v18717_v36  ;;  %v2555_v32 = vcombine.high %v18609_v35, %v18609_v35 }
 0x247   : > { %14413 = vmatprep.subr.bf16.mxu0 %v20803_v17  ;;  %14437 = vmatprep.subr.bf16.mxu1 %v20803_v17 }
 0x248   : > { %21154 = vst [vmem:[#allocation22_spill] sm:$0xff] %v18745_v59  ;;  %21155 = vst [vmem:[#allocation20_spill] sm:$0xff] %v18747_v19  ;;  %v10608_v3 = vpop.f32.mrb[44].mxu0  ;;  %v10664_v57 = vpop.f32.mrb[44].mxu1 }
 0x249   : > { %v1386_v37 = vpop.f32.mrb[45].mxu0  ;;  %v1563_v45 = vpop.f32.mrb[45].mxu1 }
 0x24a   : > { %v18753_v6 = vpack.c.bf16 %v10608_v3, %v1386_v37  ;;  %v18755_v12 = vpack.c.bf16 %v10664_v57, %v1563_v45  ;;  %14415 = vmatpush3.bf16.msra.mxu0 %v18725_v9  ;;  %14439 = vmatpush3.bf16.msra.mxu1 %v18727_v14  ;;  %v2569_v14 = vrot.slane %v2555_v32, %v18307_v28 }
 0x24b   : > { %14416 = vmatprep.subr.bf16.mxu0 %v20803_v17  ;;  %14440 = vmatprep.subr.bf16.mxu1 %v20803_v17 }
 0x24c   : > { %21156 = vst [vmem:[#allocation23_spill] sm:$0xff] %v18753_v6  ;;  %21157 = vst [vmem:[#allocation21_spill] sm:$0xff] %v18755_v12  ;;  %v10611_v41 = vpop.f32.mrb[46].mxu0  ;;  %v10667_v49 = vpop.f32.mrb[46].mxu1 }
 0x24d   : > { %v1396_v60 = vpop.f32.mrb[47].mxu0  ;;  %v1573_v0 = vpop.f32.mrb[47].mxu1 }
 0x24e   : > { %v18763_v50 = vpack.c.bf16 %v10611_v41, %v1396_v60  ;;  %v18765_v3 = vpack.c.bf16 %v10667_v49, %v1573_v0  ;;  %14418 = vmatpush3.bf16.msra.mxu0 %v18737_v44  ;;  %14442 = vmatpush3.bf16.msra.mxu1 %v18739_v51  ;;  %v2571_v51 = vcombine.high %v2569_v14, %v2569_v14 }
 0x24f   : > { %14419 = vmatprep.subr.bf16.mxu0 %v20803_v17  ;;  %14443 = vmatprep.subr.bf16.mxu1 %v20803_v17 }
 0x250   : > { %21158 = vst [vmem:[#allocation26_spill] sm:$0xff] %v18763_v50  ;;  %21159 = vst [vmem:[#allocation24_spill] sm:$0xff] %v18765_v3  ;;  %v10702_v57 = vpop.f32.mrb[48].mxu0  ;;  %v10758_v37 = vpop.f32.mrb[48].mxu1 }
 0x251   : > { %v1680_v45 = vpop.f32.mrb[49].mxu0  ;;  %v1857_v1 = vpop.f32.mrb[49].mxu1 }
 0x252   : > { %v18772_v9 = vpack.c.bf16 %v10702_v57, %v1680_v45  ;;  %v18774_v35 = vpack.c.bf16 %v10758_v37, %v1857_v1  ;;  %14421 = vmatpush3.bf16.msra.mxu0 %v18745_v59  ;;  %14445 = vmatpush3.bf16.msra.mxu1 %v18747_v19  ;;  %v18789_v19 = vrot.slane %v2569_v14, %v18307_v28 }
 0x253   : > { %14422 = vmatprep.subr.bf16.mxu0 %v20803_v17  ;;  %14446 = vmatprep.subr.bf16.mxu1 %v20803_v17 }
 0x254   : > { %21160 = vst [vmem:[#allocation27_spill] sm:$0xff] %v18772_v9  ;;  %21161 = vst [vmem:[#allocation25_spill] sm:$0xff] %v18774_v35  ;;  %v10705_v41 = vpop.f32.mrb[50].mxu0  ;;  %v10761_v49 = vpop.f32.mrb[50].mxu1 }
 0x255   : > { %v1690_v60 = vpop.f32.mrb[51].mxu0  ;;  %v1867_v0 = vpop.f32.mrb[51].mxu1 }
 0x256   : > { %v18780_v44 = vpack.c.bf16 %v10705_v41, %v1690_v60  ;;  %v18782_v32 = vpack.c.bf16 %v10761_v49, %v1867_v0  ;;  %14424 = vmatpush3.bf16.msra.mxu0 %v18753_v6  ;;  %14448 = vmatpush3.bf16.msra.mxu1 %v18755_v12  ;;  %v18792_v41 = vrot.slane %v2571_v51, %v18307_v28  ;;  %v21166_v28 = vmov 0.0  }
 0x257   : > { %14425 = vmatprep.subr.bf16.mxu0 %v20803_v17  ;;  %14449 = vmatprep.subr.bf16.mxu1 %v20803_v17 }
 0x258   : > { %21162 = vst [vmem:[#allocation34_spill] sm:$0xff] %v18780_v44  ;;  %21163 = vst [vmem:[#allocation30_spill] sm:$0xff] %v18782_v32  ;;  %v10708_v1 = vpop.f32.mrb[52].mxu0  ;;  %v10764_v57 = vpop.f32.mrb[52].mxu1 }
 0x259   : > { %v1700_v37 = vpop.f32.mrb[53].mxu0  ;;  %v1877_v45 = vpop.f32.mrb[53].mxu1 }
 0x25a   : > { %v18794_v49 = vpack.c.bf16 %v10708_v1, %v1700_v37  ;;  %v18796_v60 = vpack.c.bf16 %v10764_v57, %v1877_v45  ;;  %14427 = vmatpush3.bf16.msra.mxu0 %v18763_v50  ;;  %14451 = vmatpush3.bf16.msra.mxu1 %v18765_v3 }
 0x25b   : > { %14452 = vmatprep.subr.bf16.mxu0 %v20803_v17  ;;  %14476 = vmatprep.subr.bf16.mxu1 %v20803_v17 }
 0x25c   : > { %21164 = vst [vmem:[#allocation35_spill] sm:$0xff] %v18794_v49  ;;  %21165 = vst [vmem:[#allocation31_spill] sm:$0xff] %v18796_v60  ;;  %v10711_v0 = vpop.f32.mrb[54].mxu0  ;;  %v10767_v12 = vpop.f32.mrb[54].mxu1 }
 0x25d   : > { %11233 = vmatmul.mubr.f32.vlgmr.msra.gmra.mrb[76].mxu0 %v18789_v19  ;;  %11268 = vmatmul.mubr.f32.vlgmr.msra.gmra.mrb[76].mxu1 %v18792_v41  ;;  %v1710_v14 = vpop.f32.mrb[55].mxu0  ;;  %v1887_v51 = vpop.f32.mrb[55].mxu1 }
 0x25e   : > { %v18804_v1 = vpack.c.bf16 %v10711_v0, %v1710_v14  ;;  %v18806_v57 = vpack.c.bf16 %v10767_v12, %v1887_v51  ;;  %14454 = vmatpush3.bf16.msra.mxu0 %v18772_v9  ;;  %14478 = vmatpush3.bf16.msra.mxu1 %v18774_v35 }
 0x25f   : > { %14455 = vmatprep.subr.bf16.mxu0 %v20803_v17  ;;  %14479 = vmatprep.subr.bf16.mxu1 %v20803_v17 }
 0x260   : > { %v10714_v37 = vpop.f32.mrb[56].mxu0  ;;  %v10770_v45 = vpop.f32.mrb[56].mxu1  ;;  %11302 = vmatprep.mubr.msk.f32.mxu0 %vm16909_vm0, %v21166_v28  ;;  %11337 = vmatprep.mubr.msk.f32.mxu1 %vm16909_vm0, %v21166_v28 }
 0x261   : > { %v1720_v0 = vpop.f32.mrb[57].mxu0  ;;  %v1897_v14 = vpop.f32.mrb[57].mxu1 }
 0x262   : > { %v18816_v12 = vpack.c.bf16 %v10714_v37, %v1720_v0  ;;  %v18818_v51 = vpack.c.bf16 %v10770_v45, %v1897_v14  ;;  %14457 = vmatpush3.bf16.msra.mxu0 %v18780_v44  ;;  %14481 = vmatpush3.bf16.msra.mxu1 %v18782_v32 }
 0x263   : > { %14458 = vmatprep.subr.bf16.mxu0 %v20803_v17  ;;  %14482 = vmatprep.subr.bf16.mxu1 %v20803_v17 }
 0x264   : > { %21167 = vst [vmem:[#allocation43_spill] sm:$0xff] %v18816_v12  ;;  %21168 = vst [vmem:[#allocation38_spill] sm:$0xff] %v18818_v51  ;;  %v10717_v35 = vpop.f32.mrb[58].mxu0  ;;  %v10773_v9 = vpop.f32.mrb[58].mxu1 }
 0x265   : > { %v1730_v3 = vpop.f32.mrb[59].mxu0  ;;  %v1907_v50 = vpop.f32.mrb[59].mxu1 }
 0x266   : > { %v18824_v6 = vpack.c.bf16 %v10717_v35, %v1730_v3  ;;  %v18826_v59 = vpack.c.bf16 %v10773_v9, %v1907_v50  ;;  %14460 = vmatpush3.bf16.msra.mxu0 %v18794_v49  ;;  %14484 = vmatpush3.bf16.msra.mxu1 %v18796_v60 }
 0x267   : > { %14461 = vmatprep.subr.bf16.mxu0 %v20803_v17  ;;  %14485 = vmatprep.subr.bf16.mxu1 %v20803_v17 }
 0x268   : > { %21169 = vst [vmem:[#allocation42_spill] sm:$0xff] %v18824_v6  ;;  %21170 = vst [vmem:[#allocation40_spill] sm:$0xff] %v18826_v59  ;;  %v10720_v37 = vpop.f32.mrb[60].mxu0  ;;  %v10776_v45 = vpop.f32.mrb[60].mxu1 }
 0x269   : > { %v1740_v0 = vpop.f32.mrb[61].mxu0  ;;  %v1917_v14 = vpop.f32.mrb[61].mxu1 }
 0x26a   : > { %v18832_v32 = vpack.c.bf16 %v10720_v37, %v1740_v0  ;;  %v18834_v44 = vpack.c.bf16 %v10776_v45, %v1917_v14  ;;  %14463 = vmatpush3.bf16.msra.mxu0 %v18804_v1  ;;  %14487 = vmatpush3.bf16.msra.mxu1 %v18806_v57 }
 0x26b   : > { %14464 = vmatprep.subr.bf16.mxu0 %v20803_v17  ;;  %14488 = vmatprep.subr.bf16.mxu1 %v20803_v17 }
 0x26c   : > { %21171 = vst [vmem:[#allocation50_spill] sm:$0xff] %v18832_v32  ;;  %21172 = vst [vmem:[#allocation46_spill] sm:$0xff] %v18834_v44  ;;  %v10723_v9 = vpop.f32.mrb[62].mxu0  ;;  %v10779_v50 = vpop.f32.mrb[62].mxu1 }
 0x26d   : > { %v1750_v3 = vpop.f32.mrb[63].mxu0  ;;  %v1927_v35 = vpop.f32.mrb[63].mxu1 }
 0x26e   : > { %v18840_v60 = vpack.c.bf16 %v10723_v9, %v1750_v3  ;;  %v18842_v49 = vpack.c.bf16 %v10779_v50, %v1927_v35  ;;  %14466 = vmatpush3.bf16.msra.mxu0 %v18816_v12  ;;  %14490 = vmatpush3.bf16.msra.mxu1 %v18818_v51  ;;  %v18862_v9 = vcombine.high %v18789_v19, %v18789_v19 }
 0x26f   : > { %14467 = vmatprep.subr.bf16.mxu0 %v20803_v17  ;;  %14491 = vmatprep.subr.bf16.mxu1 %v20803_v17  ;;  %v18866_v50 = vcombine.high %v18792_v41, %v18792_v41 }
 0x270   : > { %v18848_v37 = vpop.f32.mrb[64].mxu0  ;;  %v18850_v45 = vpop.f32.mrb[64].mxu1 }
 0x271   : > { %v10814_v0 = vpop.f32.mrb[65].mxu0  ;;  %v10849_v14 = vpop.f32.mrb[65].mxu1 }
 0x272   : > { %14469 = vmatpush3.bf16.msra.mxu0 %v18824_v6  ;;  %14493 = vmatpush3.bf16.msra.mxu1 %v18826_v59 }
 0x273   : > { %14470 = vmatprep.subr.bf16.mxu0 %v20803_v17  ;;  %14494 = vmatprep.subr.bf16.mxu1 %v20803_v17 }
 0x276   : > { %14472 = vmatpush3.bf16.msra.mxu0 %v18832_v32  ;;  %14496 = vmatpush3.bf16.msra.mxu1 %v18834_v44 }
 0x277   : > { %14473 = vmatprep.subr.bf16.mxu0 %v20803_v17  ;;  %14497 = vmatprep.subr.bf16.mxu1 %v20803_v17 }
 0x27a   : > { %14475 = vmatpush3.bf16.msra.mxu0 %v18840_v60  ;;  %14499 = vmatpush3.bf16.msra.mxu1 %v18842_v49 }
 0x27b   : > { %14500 = vmatprep.subr.bf16.mxu0 %v20803_v17  ;;  %14524 = vmatprep.subr.bf16.mxu1 %v20803_v17 }
 0x27d   : > { %11303 = vmatmul.mubr.f32.vlgmr.msra.gmra.mrb[78].mxu0 %v18862_v9  ;;  %11338 = vmatmul.mubr.f32.vlgmr.msra.gmra.mrb[78].mxu1 %v18866_v50 }
 0x27e   : > { %14502 = vmatpush3.bf16.msra.mxu0 %v18481_v30  ;;  %14526 = vmatpush3.bf16.msra.mxu1 %v18483_v55 }
 0x27f   : > { %14503 = vmatprep.subr.bf16.mxu0 %v20803_v17  ;;  %14527 = vmatprep.subr.bf16.mxu1 %v20803_v17 }
 0x280   : > { %11372 = vmatprep.mubr.msk.f32.mxu0 %vm16909_vm0, %v21166_v28  ;;  %11407 = vmatprep.mubr.msk.f32.mxu1 %vm16909_vm0, %v21166_v28 }
 0x282   : > { %14505 = vmatpush3.bf16.msra.mxu0 %v18501_v62  ;;  %14529 = vmatpush3.bf16.msra.mxu1 %v18503_v48 }
 0x283   : > { %14506 = vmatprep.subr.bf16.mxu0 %v20803_v17  ;;  %14530 = vmatprep.subr.bf16.mxu1 %v20803_v17 }
 0x286   : > { %14508 = vmatpush3.bf16.msra.mxu0 %v18527_v46  ;;  %14532 = vmatpush3.bf16.msra.mxu1 %v18529_v43 }
 0x287   : > { %14509 = vmatprep.subr.bf16.mxu0 %v20803_v17  ;;  %14533 = vmatprep.subr.bf16.mxu1 %v20803_v17 }
 0x28a   : > { %14511 = vmatpush3.bf16.msra.mxu0 %v18543_v5  ;;  %14535 = vmatpush3.bf16.msra.mxu1 %v18545_v24 }
 0x28b   : > { %14512 = vmatprep.subr.bf16.mxu0 %v20803_v17  ;;  %14536 = vmatprep.subr.bf16.mxu1 %v20803_v17 }
 0x28e   : > { %14514 = vmatpush3.bf16.msra.mxu0 %v18559_v33  ;;  %14538 = vmatpush3.bf16.msra.mxu1 %v18561_v31 }
 0x28f   : > { %14515 = vmatprep.subr.bf16.mxu0 %v20803_v17  ;;  %14539 = vmatprep.subr.bf16.mxu1 %v20803_v17 }
 0x290   : > { %v18898_v3 = vpop.f32.mrb[66].mxu0  ;;  %v18900_v35 = vpop.f32.mrb[66].mxu1 }
 0x291   : > { %v10884_v0 = vpop.f32.mrb[67].mxu0  ;;  %v10919_v14 = vpop.f32.mrb[67].mxu1 }
 0x292   : > { %14517 = vmatpush3.bf16.msra.mxu0 %v18573_v16  ;;  %14541 = vmatpush3.bf16.msra.mxu1 %v18575_v42 }
 0x293   : > { %14518 = vmatprep.subr.bf16.mxu0 %v20803_v17  ;;  %14542 = vmatprep.subr.bf16.mxu1 %v20803_v17 }
 0x296   : > { %14520 = vmatpush3.bf16.msra.mxu0 %v18589_v4  ;;  %14544 = vmatpush3.bf16.msra.mxu1 %v18591_v40 }
 0x297   : > { %14521 = vmatprep.subr.bf16.mxu0 %v20803_v17  ;;  %14545 = vmatprep.subr.bf16.mxu1 %v20803_v17 }
 0x29a   : > { %14523 = vmatpush3.bf16.msra.mxu0 %v18601_v20  ;;  %14547 = vmatpush3.bf16.msra.mxu1 %v18603_v11 }
 0x29b   : > { %14548 = vmatprep.subr.bf16.mxu0 %v20803_v17  ;;  %14572 = vmatprep.subr.bf16.mxu1 %v20803_v17 }
 0x2b0   : > { %v18914_v0 = vpop.f32.mrb[68].mxu0  ;;  %v18916_v14 = vpop.f32.mrb[68].mxu1 }
 0x2b1   : > { %v10954_v42 = vpop.f32.mrb[69].mxu0  ;;  %v10989_v4 = vpop.f32.mrb[69].mxu1 }
 0x2d0   : > { %v18918_v16 = vpop.f32.mrb[70].mxu0  ;;  %v18920_v40 = vpop.f32.mrb[70].mxu1 }
 0x2d1   : > { %v11024_v31 = vpop.f32.mrb[71].mxu0  ;;  %v11059_v33 = vpop.f32.mrb[71].mxu1 }
 0x2d2   : > { %v21173_v33 = vmov 0.0|0.0  }
 0x2f0   : > { %v2678_v24 = vpop.f32.mrb[72].mxu0  ;;  %v2748_v20 = vpop.f32.mrb[72].mxu1 }
 0x2f1   : > { %v3172_v11 = vsub.f32 %v18632_v21, %v2678_v24  ;;  %v3173_v5 = vsub.f32 %v18635_v2, %v2748_v20  ;;  %v11094_v43 = vpop.f32.mrb[73].mxu0  ;;  %v11129_v17 = vpop.f32.mrb[73].mxu1  ;;  %v21174_v21 = vld [vmem:[#allocation18_spill] sm:$0xff]  ;;  %v21175_v2 = vld [vmem:[#allocation16_spill] sm:$0xff] }
 0x2f3   : > { %v18925_v46 = vadd.f32 %v3172_v11, %v18848_v37  ;;  %v18928_v42 = vadd.f32 %v3173_v5, %v18850_v45 }
 0x2f5   : > { %11373 = vmatmul.mubr.f32.vlgmr.msra.gmra.mrb[80].mxu0 %v18925_v46  ;;  %11408 = vmatmul.mubr.f32.vlgmr.msra.gmra.mrb[80].mxu1 %v18928_v42 }
 0x2f6   : > { %14550 = vmatpush3.bf16.msra.mxu0 %v18615_v10  ;;  %14574 = vmatpush3.bf16.msra.mxu1 %v18617_v8 }
 0x2f7   : > { %14551 = vmatprep.subr.bf16.mxu0 %v21173_v33  ;;  %14575 = vmatprep.subr.bf16.mxu1 %v21173_v33 }
 0x2f8   : > { %11442 = vmatprep.mubr.msk.f32.mxu0 %vm16909_vm0, %v21166_v28  ;;  %11477 = vmatprep.mubr.msk.f32.mxu1 %vm16909_vm0, %v21166_v28 }
 0x2fa   : > { %14553 = vmatpush3.bf16.msra.mxu0 %v18623_v34  ;;  %14577 = vmatpush3.bf16.msra.mxu1 %v18625_v58 }
 0x2fb   : > { %14554 = vmatprep.subr.bf16.mxu0 %v21173_v33  ;;  %14578 = vmatprep.subr.bf16.mxu1 %v21173_v33 }
 0x2fe   : > { %14556 = vmatpush3.bf16.msra.mxu0 %v18637_v22  ;;  %14580 = vmatpush3.bf16.msra.mxu1 %v18639_v56 }
 0x2ff   : > { %14557 = vmatprep.subr.bf16.mxu0 %v21173_v33  ;;  %14581 = vmatprep.subr.bf16.mxu1 %v21173_v33 }
 0x302   : > { %14559 = vmatpush3.bf16.msra.mxu0 %v18647_v39  ;;  %14583 = vmatpush3.bf16.msra.mxu1 %v18649_v27 }
 0x303   : > { %14560 = vmatprep.subr.bf16.mxu0 %v21173_v33  ;;  %14584 = vmatprep.subr.bf16.mxu1 %v21173_v33 }
 0x306   : > { %14562 = vmatpush3.bf16.msra.mxu0 %v18659_v18  ;;  %14586 = vmatpush3.bf16.msra.mxu1 %v18661_v38 }
 0x307   : > { %14563 = vmatprep.subr.bf16.mxu0 %v21173_v33  ;;  %14587 = vmatprep.subr.bf16.mxu1 %v21173_v33 }
 0x30a   : > { %14565 = vmatpush3.bf16.msra.mxu0 %v18667_v63  ;;  %14589 = vmatpush3.bf16.msra.mxu1 %v18669_v15 }
 0x30b   : > { %14566 = vmatprep.subr.bf16.mxu0 %v21173_v33  ;;  %14590 = vmatprep.subr.bf16.mxu1 %v21173_v33 }
 0x30e   : > { %14568 = vmatpush3.bf16.msra.mxu0 %v18675_v7  ;;  %14592 = vmatpush3.bf16.msra.mxu1 %v18677_v25 }
 0x30f   : > { %14569 = vmatprep.subr.bf16.mxu0 %v21173_v33  ;;  %14593 = vmatprep.subr.bf16.mxu1 %v21173_v33 }
 0x310   : > { %v2818_v17 = vpop.f32.mrb[74].mxu0  ;;  %v2888_v43 = vpop.f32.mrb[74].mxu1 }
 0x311   : > { %v3174_v5 = vsub.f32 %v18709_v47, %v2818_v17  ;;  %v3175_v24 = vsub.f32 %v18713_v53, %v2888_v43  ;;  %v11164_v31 = vpop.f32.mrb[75].mxu0  ;;  %v11199_v4 = vpop.f32.mrb[75].mxu1  ;;  %v21176_v47 = vld [vmem:[#allocation19_spill] sm:$0xff]  ;;  %v21177_v53 = vld [vmem:[#allocation17_spill] sm:$0xff]  ;;  %v21178_v17 = vld [vmem:[#allocation22_spill] sm:$0xff] }
 0x312   : > { %14571 = vmatpush3.bf16.msra.mxu0 %v18683_v61  ;;  %14595 = vmatpush3.bf16.msra.mxu1 %v18685_v26  ;;  %v21179_v43 = vld [vmem:[#allocation20_spill] sm:$0xff] }
 0x313   : > { %v18969_v20 = vadd.f32 %v3174_v5, %v18898_v3  ;;  %v18972_v11 = vadd.f32 %v3175_v24, %v18900_v35  ;;  %14596 = vmatprep.subr.bf16.mxu0 %v21173_v33  ;;  %14620 = vmatprep.subr.bf16.mxu1 %v21173_v33  ;;  %v21180_v5 = vld [vmem:[#allocation23_spill] sm:$0xff]  ;;  %v21181_v24 = vld [vmem:[#allocation21_spill] sm:$0xff] }
 0x315   : > { %11443 = vmatmul.mubr.f32.vlgmr.msra.gmra.mrb[82].mxu0 %v18969_v20  ;;  %11478 = vmatmul.mubr.f32.vlgmr.msra.gmra.mrb[82].mxu1 %v18972_v11 }
 0x316   : > { %14598 = vmatpush3.bf16.msra.mxu0 %v18691_v29  ;;  %14622 = vmatpush3.bf16.msra.mxu1 %v18693_v54 }
 0x317   : > { %14599 = vmatprep.subr.bf16.mxu0 %v21173_v33  ;;  %14623 = vmatprep.subr.bf16.mxu1 %v21173_v33 }
 0x318   : > { %11512 = vmatprep.mubr.msk.f32.mxu0 %vm16909_vm0, %v21166_v28  ;;  %11547 = vmatprep.mubr.msk.f32.mxu1 %vm16909_vm0, %v21166_v28 }
 0x31a   : > { %14601 = vmatpush3.bf16.msra.mxu0 %v18699_v13  ;;  %14625 = vmatpush3.bf16.msra.mxu1 %v18701_v23 }
 0x31b   : > { %14602 = vmatprep.subr.bf16.mxu0 %v21173_v33  ;;  %14626 = vmatprep.subr.bf16.mxu1 %v21173_v33 }
 0x31e   : > { %14604 = vmatpush3.bf16.msra.mxu0 %v18715_v52  ;;  %14628 = vmatpush3.bf16.msra.mxu1 %v18717_v36 }
 0x31f   : > { %14605 = vmatprep.subr.bf16.mxu0 %v21173_v33  ;;  %14629 = vmatprep.subr.bf16.mxu1 %v21173_v33 }
 0x322   : > { %14607 = vmatpush3.bf16.msra.mxu0 %v21174_v21  ;;  %14631 = vmatpush3.bf16.msra.mxu1 %v21175_v2  ;;  %v21182_v2 = vld [vmem:[#allocation26_spill] sm:$0xff]  ;;  %v21183_v21 = vld [vmem:[#allocation24_spill] sm:$0xff] }
 0x323   : > { %14608 = vmatprep.subr.bf16.mxu0 %v21173_v33  ;;  %14632 = vmatprep.subr.bf16.mxu1 %v21173_v33 }
 0x326   : > { %14610 = vmatpush3.bf16.msra.mxu0 %v21176_v47  ;;  %14634 = vmatpush3.bf16.msra.mxu1 %v21177_v53 }
 0x327   : > { %14611 = vmatprep.subr.bf16.mxu0 %v21173_v33  ;;  %14635 = vmatprep.subr.bf16.mxu1 %v21173_v33 }
 0x32a   : > { %14613 = vmatpush3.bf16.msra.mxu0 %v21178_v17  ;;  %14637 = vmatpush3.bf16.msra.mxu1 %v21179_v43 }
 0x32b   : > { %14614 = vmatprep.subr.bf16.mxu0 %v21173_v33  ;;  %14638 = vmatprep.subr.bf16.mxu1 %v21173_v33 }
 0x32e   : > { %14616 = vmatpush3.bf16.msra.mxu0 %v21180_v5  ;;  %14640 = vmatpush3.bf16.msra.mxu1 %v21181_v24 }
 0x32f   : > { %14617 = vmatprep.subr.bf16.mxu0 %v21173_v33  ;;  %14641 = vmatprep.subr.bf16.mxu1 %v21173_v33 }
 0x330   : > { %v2958_v31 = vpop.f32.mrb[76].mxu0  ;;  %v3028_v4 = vpop.f32.mrb[76].mxu1 }
 0x331   : > { %v3176_v53 = vsub.f32 %v18789_v19, %v2958_v31  ;;  %v3177_v17 = vsub.f32 %v18792_v41, %v3028_v4  ;;  %v11234_v47 = vpop.f32.mrb[77].mxu0  ;;  %v11269_v43 = vpop.f32.mrb[77].mxu1  ;;  %v21184_v19 = vld [vmem:[#allocation27_spill] sm:$0xff]  ;;  %v21185_v41 = vld [vmem:[#allocation25_spill] sm:$0xff] }
 0x332   : > { %14619 = vmatpush3.bf16.msra.mxu0 %v21182_v2  ;;  %14643 = vmatpush3.bf16.msra.mxu1 %v21183_v21  ;;  %v21186_v47 = vld [vmem:[#allocation34_spill] sm:$0xff]  ;;  %v21189_v43 = vld [vmem:[#allocation31_spill] sm:$0xff] }
 0x333   : > { %v19015_v5 = vadd.f32 %v3176_v53, %v18914_v0  ;;  %v19018_v24 = vadd.f32 %v3177_v17, %v18916_v14  ;;  %14644 = vmatprep.subr.bf16.mxu0 %v21173_v33  ;;  %14668 = vmatprep.subr.bf16.mxu1 %v21173_v33  ;;  %v21187_v53 = vld [vmem:[#allocation30_spill] sm:$0xff]  ;;  %v21188_v17 = vld [vmem:[#allocation35_spill] sm:$0xff] }
 0x335   : > { %11513 = vmatmul.mubr.f32.vlgmr.msra.gmra.mrb[84].mxu0 %v19015_v5  ;;  %11548 = vmatmul.mubr.f32.vlgmr.msra.gmra.mrb[84].mxu1 %v19018_v24 }
 0x336   : > { %14646 = vmatpush3.bf16.msra.mxu0 %v21184_v19  ;;  %14670 = vmatpush3.bf16.msra.mxu1 %v21185_v41 }
 0x337   : > { %14647 = vmatprep.subr.bf16.mxu0 %v21173_v33  ;;  %14671 = vmatprep.subr.bf16.mxu1 %v21173_v33 }
 0x338   : > { %11582 = vmatprep.mubr.msk.f32.mxu0 %vm16909_vm0, %v21166_v28  ;;  %11617 = vmatprep.mubr.msk.f32.mxu1 %vm16909_vm0, %v21166_v28 }
 0x33a   : > { %14649 = vmatpush3.bf16.msra.mxu0 %v21186_v47  ;;  %14673 = vmatpush3.bf16.msra.mxu1 %v21187_v53 }
 0x33b   : > { %14650 = vmatprep.subr.bf16.mxu0 %v21173_v33  ;;  %14674 = vmatprep.subr.bf16.mxu1 %v21173_v33 }
 0x33e   : > { %14652 = vmatpush3.bf16.msra.mxu0 %v21188_v17  ;;  %14676 = vmatpush3.bf16.msra.mxu1 %v21189_v43 }
 0x33f   : > { %14653 = vmatprep.subr.bf16.mxu0 %v21173_v33  ;;  %14677 = vmatprep.subr.bf16.mxu1 %v21173_v33 }
 0x342   : > { %14655 = vmatpush3.bf16.msra.mxu0 %v18804_v1  ;;  %14679 = vmatpush3.bf16.msra.mxu1 %v18806_v57 }
 0x343   : > { %14656 = vmatprep.subr.bf16.mxu0 %v21173_v33  ;;  %14680 = vmatprep.subr.bf16.mxu1 %v21173_v33 }
 0x346   : > { %14658 = vmatpush3.bf16.msra.mxu0 %v18816_v12  ;;  %14682 = vmatpush3.bf16.msra.mxu1 %v18818_v51 }
 0x347   : > { %14659 = vmatprep.subr.bf16.mxu0 %v21173_v33  ;;  %14683 = vmatprep.subr.bf16.mxu1 %v21173_v33 }
 0x34a   : > { %14661 = vmatpush3.bf16.msra.mxu0 %v18824_v6  ;;  %14685 = vmatpush3.bf16.msra.mxu1 %v18826_v59 }
 0x34b   : > { %14662 = vmatprep.subr.bf16.mxu0 %v21173_v33  ;;  %14686 = vmatprep.subr.bf16.mxu1 %v21173_v33 }
 0x34e   : > { %14664 = vmatpush3.bf16.msra.mxu0 %v18832_v32  ;;  %14688 = vmatpush3.bf16.msra.mxu1 %v18834_v44 }
 0x34f   : > { %14665 = vmatprep.subr.bf16.mxu0 %v21173_v33  ;;  %14689 = vmatprep.subr.bf16.mxu1 %v21173_v33 }
 0x350   : > { %v3098_v31 = vpop.f32.mrb[78].mxu0  ;;  %v3168_v4 = vpop.f32.mrb[78].mxu1 }
 0x351   : > { %v3178_v51 = vsub.f32 %v18862_v9, %v3098_v31  ;;  %v3179_v6 = vsub.f32 %v18866_v50, %v3168_v4  ;;  %v11304_v12 = vpop.f32.mrb[79].mxu0  ;;  %v11339_v59 = vpop.f32.mrb[79].mxu1  ;;  %v21194_v9 = vld [vmem:[#allocation115_spill] sm:$0xff]  ;;  %v21195_v50 = vld [vmem:[#allocation116_spill] sm:$0xff]  ;;  %v21197_v4 = vld [vmem:[#allocation121_spill] sm:$0xff] }
 0x352   : > { %14667 = vmatpush3.bf16.msra.mxu0 %v18840_v60  ;;  %14691 = vmatpush3.bf16.msra.mxu1 %v18842_v49  ;;  %v21190_v59 = vld [vmem:[#allocation103_spill] sm:$0xff]  ;;  %v21192_v12 = vld [vmem:[#allocation109_spill] sm:$0xff]  ;;  %v21196_v31 = vld [vmem:[#allocation120_spill] sm:$0xff] }
 0x353   : > { %v19061_v32 = vadd.f32 %v3178_v51, %v18918_v16  ;;  %v19064_v44 = vadd.f32 %v3179_v6, %v18920_v40  ;;  %14692 = vmatprep.subr.bf16.mxu0 %v21173_v33  ;;  %14716 = vmatprep.subr.bf16.mxu1 %v21173_v33  ;;  %v21191_v6 = vld [vmem:[#allocation104_spill] sm:$0xff]  ;;  %v21193_v51 = vld [vmem:[#allocation110_spill] sm:$0xff] }
 0x355   : > { %11583 = vmatmul.mubr.f32.vlgmr.msra.gmra.mrb[86].mxu0 %v19061_v32  ;;  %11618 = vmatmul.mubr.f32.vlgmr.msra.gmra.mrb[86].mxu1 %v19064_v44 }
 0x356   : > { %14694 = vmatpush3.bf16.msra.mxu0 %v18481_v30  ;;  %14718 = vmatpush3.bf16.msra.mxu1 %v18483_v55 }
 0x357   : > { %14695 = vmatprep.subr.bf16.mxu0 %v21173_v33  ;;  %14719 = vmatprep.subr.bf16.mxu1 %v21173_v33 }
 0x358   : > { %11652 = vmatprep.mubr.msk.f32.mxu0 %vm16909_vm0, %v21166_v28  ;;  %11687 = vmatprep.mubr.msk.f32.mxu1 %vm16909_vm0, %v21166_v28 }
 0x35a   : > { %14697 = vmatpush3.bf16.msra.mxu0 %v18501_v62  ;;  %14721 = vmatpush3.bf16.msra.mxu1 %v18503_v48 }
 0x35b   : > { %14698 = vmatprep.subr.bf16.mxu0 %v21173_v33  ;;  %14722 = vmatprep.subr.bf16.mxu1 %v21173_v33 }
 0x35e   : > { %14700 = vmatpush3.bf16.msra.mxu0 %v21190_v59  ;;  %14724 = vmatpush3.bf16.msra.mxu1 %v21191_v6 }
 0x35f   : > { %14701 = vmatprep.subr.bf16.mxu0 %v21173_v33  ;;  %14725 = vmatprep.subr.bf16.mxu1 %v21173_v33 }
 0x362   : > { %14703 = vmatpush3.bf16.msra.mxu0 %v21192_v12  ;;  %14727 = vmatpush3.bf16.msra.mxu1 %v21193_v51  ;;  %v21198_v51 = vld [vmem:[#allocation14_spill] sm:$0xff]  ;;  %v21199_v12 = vld [vmem:[#allocation12_spill] sm:$0xff] }
 0x363   : > { %14704 = vmatprep.subr.bf16.mxu0 %v21173_v33  ;;  %14728 = vmatprep.subr.bf16.mxu1 %v21173_v33 }
 0x366   : > { %14706 = vmatpush3.bf16.msra.mxu0 %v21194_v9  ;;  %14730 = vmatpush3.bf16.msra.mxu1 %v21195_v50  ;;  %v21200_v50 = vld [vmem:[#allocation15_spill] sm:$0xff]  ;;  %v21201_v9 = vld [vmem:[#allocation13_spill] sm:$0xff] }
 0x367   : > { %14707 = vmatprep.subr.bf16.mxu0 %v21173_v33  ;;  %14731 = vmatprep.subr.bf16.mxu1 %v21173_v33 }
 0x36a   : > { %14709 = vmatpush3.bf16.msra.mxu0 %v21196_v31  ;;  %14733 = vmatpush3.bf16.msra.mxu1 %v21197_v4 }
 0x36b   : > { %14710 = vmatprep.subr.bf16.mxu0 %v21173_v33  ;;  %14734 = vmatprep.subr.bf16.mxu1 %v21173_v33 }
 0x36e   : > { %14712 = vmatpush3.bf16.msra.mxu0 %v21198_v51  ;;  %14736 = vmatpush3.bf16.msra.mxu1 %v21199_v12 }
 0x36f   : > { %14713 = vmatprep.subr.bf16.mxu0 %v21173_v33  ;;  %14737 = vmatprep.subr.bf16.mxu1 %v21173_v33 }
 0x372   : > { %14715 = vmatpush3.bf16.msra.mxu0 %v21200_v50  ;;  %14739 = vmatpush3.bf16.msra.mxu1 %v21201_v9 }
 0x373   : > { %14740 = vmatprep.subr.bf16.mxu0 %v21173_v33  ;;  %14764 = vmatprep.subr.bf16.mxu1 %v21173_v33 }
 0x3c8   : > { %v3254_v4 = vpop.f32.mrb[80].mxu0  ;;  %v3324_v31 = vpop.f32.mrb[80].mxu1 }
 0x3c9   : > { %v3748_v6 = vsub.f32 %v18925_v46, %v3254_v4  ;;  %v3749_v51 = vsub.f32 %v18928_v42, %v3324_v31  ;;  %v11374_v59 = vpop.f32.mrb[81].mxu0  ;;  %v11409_v12 = vpop.f32.mrb[81].mxu1 }
 0x3cb   : > { %v19109_v48 = vadd.f32 %v3748_v6, %v18848_v37  ;;  %v19112_v62 = vadd.f32 %v3749_v51, %v18850_v45 }
 0x3cd   : > { %11653 = vmatmul.mubr.f32.vlgmr.msra.gmra.mrb[88].mxu0 %v19109_v48  ;;  %11688 = vmatmul.mubr.f32.vlgmr.msra.gmra.mrb[88].mxu1 %v19112_v62 }
 0x3ce   : > { %14742 = vmatpush3.bf16.msra.mxu0 %v18615_v10  ;;  %14766 = vmatpush3.bf16.msra.mxu1 %v18617_v8 }
 0x3cf   : > { %14743 = vmatprep.subr.bf16.mxu0 %v21173_v33  ;;  %14767 = vmatprep.subr.bf16.mxu1 %v21173_v33 }
 0x3d0   : > { %11722 = vmatprep.mubr.msk.f32.mxu0 %vm16909_vm0, %v21166_v28  ;;  %11757 = vmatprep.mubr.msk.f32.mxu1 %vm16909_vm0, %v21166_v28 }
 0x3d2   : > { %14745 = vmatpush3.bf16.msra.mxu0 %v18623_v34  ;;  %14769 = vmatpush3.bf16.msra.mxu1 %v18625_v58 }
 0x3d3   : > { %14746 = vmatprep.subr.bf16.mxu0 %v21173_v33  ;;  %14770 = vmatprep.subr.bf16.mxu1 %v21173_v33 }
 0x3d6   : > { %14748 = vmatpush3.bf16.msra.mxu0 %v18637_v22  ;;  %14772 = vmatpush3.bf16.msra.mxu1 %v18639_v56 }
 0x3d7   : > { %14749 = vmatprep.subr.bf16.mxu0 %v21173_v33  ;;  %14773 = vmatprep.subr.bf16.mxu1 %v21173_v33 }
 0x3da   : > { %14751 = vmatpush3.bf16.msra.mxu0 %v18647_v39  ;;  %14775 = vmatpush3.bf16.msra.mxu1 %v18649_v27 }
 0x3db   : > { %14752 = vmatprep.subr.bf16.mxu0 %v21173_v33  ;;  %14776 = vmatprep.subr.bf16.mxu1 %v21173_v33 }
 0x3de   : > { %14754 = vmatpush3.bf16.msra.mxu0 %v18659_v18  ;;  %14778 = vmatpush3.bf16.msra.mxu1 %v18661_v38 }
 0x3df   : > { %14755 = vmatprep.subr.bf16.mxu0 %v21173_v33  ;;  %14779 = vmatprep.subr.bf16.mxu1 %v21173_v33 }
 0x3e2   : > { %14757 = vmatpush3.bf16.msra.mxu0 %v18667_v63  ;;  %14781 = vmatpush3.bf16.msra.mxu1 %v18669_v15 }
 0x3e3   : > { %14758 = vmatprep.subr.bf16.mxu0 %v21173_v33  ;;  %14782 = vmatprep.subr.bf16.mxu1 %v21173_v33 }
 0x3e6   : > { %14760 = vmatpush3.bf16.msra.mxu0 %v18675_v7  ;;  %14784 = vmatpush3.bf16.msra.mxu1 %v18677_v25 }
 0x3e7   : > { %14761 = vmatprep.subr.bf16.mxu0 %v21173_v33  ;;  %14785 = vmatprep.subr.bf16.mxu1 %v21173_v33 }
 0x3e8   : > { %v3394_v46 = vpop.f32.mrb[82].mxu0  ;;  %v3464_v42 = vpop.f32.mrb[82].mxu1 }
 0x3e9   : > { %v3750_v59 = vsub.f32 %v18969_v20, %v3394_v46  ;;  %v3751_v6 = vsub.f32 %v18972_v11, %v3464_v42  ;;  %v11444_v12 = vpop.f32.mrb[83].mxu0  ;;  %v11479_v51 = vpop.f32.mrb[83].mxu1  ;;  %v21202_v20 = vld [vmem:[#allocation18_spill] sm:$0xff]  ;;  %v21203_v11 = vld [vmem:[#allocation16_spill] sm:$0xff]  ;;  %v21204_v46 = vld [vmem:[#allocation19_spill] sm:$0xff] }
 0x3ea   : > { %14763 = vmatpush3.bf16.msra.mxu0 %v18683_v61  ;;  %14787 = vmatpush3.bf16.msra.mxu1 %v18685_v26  ;;  %v21205_v42 = vld [vmem:[#allocation17_spill] sm:$0xff]  ;;  %v21208_v12 = vld [vmem:[#allocation23_spill] sm:$0xff] }
 0x3eb   : > { %v19153_v31 = vadd.f32 %v3750_v59, %v18898_v3  ;;  %v19156_v4 = vadd.f32 %v3751_v6, %v18900_v35  ;;  %14788 = vmatprep.subr.bf16.mxu0 %v21173_v33  ;;  %14812 = vmatprep.subr.bf16.mxu1 %v21173_v33  ;;  %v21206_v59 = vld [vmem:[#allocation22_spill] sm:$0xff]  ;;  %v21207_v6 = vld [vmem:[#allocation20_spill] sm:$0xff]  ;;  %v21209_v51 = vld [vmem:[#allocation21_spill] sm:$0xff] }
 0x3ed   : > { %11723 = vmatmul.mubr.f32.vlgmr.msra.gmra.mrb[90].mxu0 %v19153_v31  ;;  %11758 = vmatmul.mubr.f32.vlgmr.msra.gmra.mrb[90].mxu1 %v19156_v4 }
 0x3ee   : > { %14790 = vmatpush3.bf16.msra.mxu0 %v18691_v29  ;;  %14814 = vmatpush3.bf16.msra.mxu1 %v18693_v54 }
 0x3ef   : > { %14791 = vmatprep.subr.bf16.mxu0 %v21173_v33  ;;  %14815 = vmatprep.subr.bf16.mxu1 %v21173_v33 }
 0x3f0   : > { %11792 = vmatprep.mubr.msk.f32.mxu0 %vm16909_vm0, %v21166_v28  ;;  %11827 = vmatprep.mubr.msk.f32.mxu1 %vm16909_vm0, %v21166_v28 }
 0x3f2   : > { %14793 = vmatpush3.bf16.msra.mxu0 %v18699_v13  ;;  %14817 = vmatpush3.bf16.msra.mxu1 %v18701_v23 }
 0x3f3   : > { %14794 = vmatprep.subr.bf16.mxu0 %v21173_v33  ;;  %14818 = vmatprep.subr.bf16.mxu1 %v21173_v33 }
 0x3f6   : > { %14796 = vmatpush3.bf16.msra.mxu0 %v18715_v52  ;;  %14820 = vmatpush3.bf16.msra.mxu1 %v18717_v36 }
 0x3f7   : > { %14797 = vmatprep.subr.bf16.mxu0 %v21173_v33  ;;  %14821 = vmatprep.subr.bf16.mxu1 %v21173_v33 }
 0x3fa   : > { %14799 = vmatpush3.bf16.msra.mxu0 %v21202_v20  ;;  %14823 = vmatpush3.bf16.msra.mxu1 %v21203_v11 }
 0x3fb   : > { %14800 = vmatprep.subr.bf16.mxu0 %v21173_v33  ;;  %14824 = vmatprep.subr.bf16.mxu1 %v21173_v33 }
 0x3fe   : > { %14802 = vmatpush3.bf16.msra.mxu0 %v21204_v46  ;;  %14826 = vmatpush3.bf16.msra.mxu1 %v21205_v42 }
 0x3ff   : > { %14803 = vmatprep.subr.bf16.mxu0 %v21173_v33  ;;  %14827 = vmatprep.subr.bf16.mxu1 %v21173_v33 }
 0x402   : > { %14805 = vmatpush3.bf16.msra.mxu0 %v21206_v59  ;;  %14829 = vmatpush3.bf16.msra.mxu1 %v21207_v6 }
 0x403   : > { %14806 = vmatprep.subr.bf16.mxu0 %v21173_v33  ;;  %14830 = vmatprep.subr.bf16.mxu1 %v21173_v33 }
 0x406   : > { %14808 = vmatpush3.bf16.msra.mxu0 %v21208_v12  ;;  %14832 = vmatpush3.bf16.msra.mxu1 %v21209_v51 }
 0x407   : > { %14809 = vmatprep.subr.bf16.mxu0 %v21173_v33  ;;  %14833 = vmatprep.subr.bf16.mxu1 %v21173_v33 }
 0x408   : > { %v3534_v42 = vpop.f32.mrb[84].mxu0  ;;  %v3604_v46 = vpop.f32.mrb[84].mxu1 }
 0x409   : > { %v3752_v11 = vsub.f32 %v19015_v5, %v3534_v42  ;;  %v3753_v59 = vsub.f32 %v19018_v24, %v3604_v46  ;;  %v11514_v20 = vpop.f32.mrb[85].mxu0  ;;  %v11549_v6 = vpop.f32.mrb[85].mxu1  ;;  %v21210_v5 = vld [vmem:[#allocation43_spill] sm:$0xff]  ;;  %v21211_v24 = vld [vmem:[#allocation38_spill] sm:$0xff] }
 0x40a   : > { %14811 = vmatpush3.bf16.msra.mxu0 %v21182_v2  ;;  %14835 = vmatpush3.bf16.msra.mxu1 %v21183_v21  ;;  %v21212_v20 = vld [vmem:[#allocation42_spill] sm:$0xff] }
 0x40b   : > { %v19199_v12 = vadd.f32 %v3752_v11, %v18914_v0  ;;  %v19202_v51 = vadd.f32 %v3753_v59, %v18916_v14  ;;  %14836 = vmatprep.subr.bf16.mxu0 %v21173_v33  ;;  %14860 = vmatprep.subr.bf16.mxu1 %v21173_v33  ;;  %v21213_v11 = vld [vmem:[#allocation40_spill] sm:$0xff]  ;;  %v21214_v46 = vld [vmem:[#allocation50_spill] sm:$0xff] }
 0x40c   : > { %v21215_v42 = vld [vmem:[#allocation46_spill] sm:$0xff] }
 0x40d   : > { %11793 = vmatmul.mubr.f32.vlgmr.msra.gmra.mrb[92].mxu0 %v19199_v12  ;;  %11828 = vmatmul.mubr.f32.vlgmr.msra.gmra.mrb[92].mxu1 %v19202_v51 }
 0x40e   : > { %14838 = vmatpush3.bf16.msra.mxu0 %v21184_v19  ;;  %14862 = vmatpush3.bf16.msra.mxu1 %v21185_v41 }
 0x40f   : > { %14839 = vmatprep.subr.bf16.mxu0 %v21173_v33  ;;  %14863 = vmatprep.subr.bf16.mxu1 %v21173_v33 }
 0x410   : > { %11862 = vmatprep.mubr.msk.f32.mxu0 %vm16909_vm0, %v21166_v28  ;;  %11897 = vmatprep.mubr.msk.f32.mxu1 %vm16909_vm0, %v21166_v28 }
 0x412   : > { %14841 = vmatpush3.bf16.msra.mxu0 %v21186_v47  ;;  %14865 = vmatpush3.bf16.msra.mxu1 %v21187_v53 }
 0x413   : > { %14842 = vmatprep.subr.bf16.mxu0 %v21173_v33  ;;  %14866 = vmatprep.subr.bf16.mxu1 %v21173_v33 }
 0x416   : > { %14844 = vmatpush3.bf16.msra.mxu0 %v21188_v17  ;;  %14868 = vmatpush3.bf16.msra.mxu1 %v21189_v43 }
 0x417   : > { %14845 = vmatprep.subr.bf16.mxu0 %v21173_v33  ;;  %14869 = vmatprep.subr.bf16.mxu1 %v21173_v33 }
 0x41a   : > { %14847 = vmatpush3.bf16.msra.mxu0 %v18804_v1  ;;  %14871 = vmatpush3.bf16.msra.mxu1 %v18806_v57 }
 0x41b   : > { %14848 = vmatprep.subr.bf16.mxu0 %v21173_v33  ;;  %14872 = vmatprep.subr.bf16.mxu1 %v21173_v33 }
 0x41e   : > { %14850 = vmatpush3.bf16.msra.mxu0 %v21210_v5  ;;  %14874 = vmatpush3.bf16.msra.mxu1 %v21211_v24 }
 0x41f   : > { %14851 = vmatprep.subr.bf16.mxu0 %v21173_v33  ;;  %14875 = vmatprep.subr.bf16.mxu1 %v21173_v33 }
 0x422   : > { %14853 = vmatpush3.bf16.msra.mxu0 %v21212_v20  ;;  %14877 = vmatpush3.bf16.msra.mxu1 %v21213_v11 }
 0x423   : > { %14854 = vmatprep.subr.bf16.mxu0 %v21173_v33  ;;  %14878 = vmatprep.subr.bf16.mxu1 %v21173_v33 }
 0x426   : > { %14856 = vmatpush3.bf16.msra.mxu0 %v21214_v46  ;;  %14880 = vmatpush3.bf16.msra.mxu1 %v21215_v42 }
 0x427   : > { %14857 = vmatprep.subr.bf16.mxu0 %v21173_v33  ;;  %14881 = vmatprep.subr.bf16.mxu1 %v21173_v33 }
 0x428   : > { %v3674_v59 = vpop.f32.mrb[86].mxu0  ;;  %v3744_v6 = vpop.f32.mrb[86].mxu1 }
 0x429   : > { %v3754_v24 = vsub.f32 %v19061_v32, %v3674_v59  ;;  %v3755_v20 = vsub.f32 %v19064_v44, %v3744_v6  ;;  %v11584_v5 = vpop.f32.mrb[87].mxu0  ;;  %v11619_v11 = vpop.f32.mrb[87].mxu1  ;;  %v21216_v44 = vld [vmem:[#allocation81_spill] sm:$0xff]  ;;  %v21217_v32 = vld [vmem:[#allocation84_spill] sm:$0xff]  ;;  %v21222_v59 = vld [vmem:[#allocation115_spill] sm:$0xff] }
 0x42a   : > { %14859 = vmatpush3.bf16.msra.mxu0 %v18840_v60  ;;  %14883 = vmatpush3.bf16.msra.mxu1 %v18842_v49  ;;  %v21218_v5 = vld [vmem:[#allocation103_spill] sm:$0xff]  ;;  %v21221_v11 = vld [vmem:[#allocation110_spill] sm:$0xff]  ;;  %v21223_v6 = vld [vmem:[#allocation116_spill] sm:$0xff] }
 0x42b   : > { %v19245_v46 = vadd.f32 %v3754_v24, %v18918_v16  ;;  %v19248_v42 = vadd.f32 %v3755_v20, %v18920_v40  ;;  %14884 = vmatprep.subr.bf16.mxu0 %v21173_v33  ;;  %14908 = vmatprep.subr.bf16.mxu1 %v21173_v33  ;;  %v21219_v24 = vld [vmem:[#allocation104_spill] sm:$0xff]  ;;  %v21220_v20 = vld [vmem:[#allocation109_spill] sm:$0xff] }
 0x42d   : > { %11863 = vmatmul.mubr.f32.vlgmr.msra.gmra.mrb[94].mxu0 %v19245_v46  ;;  %11898 = vmatmul.mubr.f32.vlgmr.msra.gmra.mrb[94].mxu1 %v19248_v42 }
 0x42e   : > { %14886 = vmatpush3.bf16.msra.mxu0 %v18481_v30  ;;  %14910 = vmatpush3.bf16.msra.mxu1 %v18483_v55 }
 0x42f   : > { %14887 = vmatprep.subr.bf16.mxu0 %v21173_v33  ;;  %14911 = vmatprep.subr.bf16.mxu1 %v21173_v33 }
 0x430   : > { %11932 = vmatprep.mubr.msk.f32.mxu0 %vm16909_vm0, %v21166_v28  ;;  %11967 = vmatprep.mubr.msk.f32.mxu1 %vm16909_vm0, %v21166_v28 }
 0x432   : > { %14889 = vmatpush3.bf16.msra.mxu0 %v21216_v44  ;;  %14913 = vmatpush3.bf16.msra.mxu1 %v21217_v32 }
 0x433   : > { %14890 = vmatprep.subr.bf16.mxu0 %v21173_v33  ;;  %14914 = vmatprep.subr.bf16.mxu1 %v21173_v33 }
 0x436   : > { %14892 = vmatpush3.bf16.msra.mxu0 %v21218_v5  ;;  %14916 = vmatpush3.bf16.msra.mxu1 %v21219_v24  ;;  %v21224_v24 = vld [vmem:[#allocation120_spill] sm:$0xff]  ;;  %v21225_v5 = vld [vmem:[#allocation121_spill] sm:$0xff] }
 0x437   : > { %14893 = vmatprep.subr.bf16.mxu0 %v21173_v33  ;;  %14917 = vmatprep.subr.bf16.mxu1 %v21173_v33 }
 0x43a   : > { %14895 = vmatpush3.bf16.msra.mxu0 %v21220_v20  ;;  %14919 = vmatpush3.bf16.msra.mxu1 %v21221_v11  ;;  %v21226_v11 = vld [vmem:[#allocation14_spill] sm:$0xff]  ;;  %v21227_v20 = vld [vmem:[#allocation12_spill] sm:$0xff] }
 0x43b   : > { %14896 = vmatprep.subr.bf16.mxu0 %v21173_v33  ;;  %14920 = vmatprep.subr.bf16.mxu1 %v21173_v33 }
 0x43e   : > { %14898 = vmatpush3.bf16.msra.mxu0 %v21222_v59  ;;  %14922 = vmatpush3.bf16.msra.mxu1 %v21223_v6 }
 0x43f   : > { %14899 = vmatprep.subr.bf16.mxu0 %v21173_v33  ;;  %14923 = vmatprep.subr.bf16.mxu1 %v21173_v33 }
 0x442   : > { %14901 = vmatpush3.bf16.msra.mxu0 %v21224_v24  ;;  %14925 = vmatpush3.bf16.msra.mxu1 %v21225_v5 }
 0x443   : > { %14902 = vmatprep.subr.bf16.mxu0 %v21173_v33  ;;  %14926 = vmatprep.subr.bf16.mxu1 %v21173_v33 }
 0x446   : > { %14904 = vmatpush3.bf16.msra.mxu0 %v21226_v11  ;;  %14928 = vmatpush3.bf16.msra.mxu1 %v21227_v20 }
 0x447   : > { %14905 = vmatprep.subr.bf16.mxu0 %v21173_v33  ;;  %14929 = vmatprep.subr.bf16.mxu1 %v21173_v33 }
 0x44a   : > { %14907 = vmatpush3.bf16.msra.mxu0 %v21200_v50  ;;  %14931 = vmatpush3.bf16.msra.mxu1 %v21201_v9 }
 0x44b   : > { %14932 = vmatprep.subr.bf16.mxu0 %v21173_v33  ;;  %14956 = vmatprep.subr.bf16.mxu1 %v21173_v33 }
 0x4a0   : > { %v3830_v5 = vpop.f32.mrb[88].mxu0  ;;  %v3900_v24 = vpop.f32.mrb[88].mxu1 }
 0x4a1   : > { %v4324_v6 = vsub.f32 %v19109_v48, %v3830_v5  ;;  %v4325_v11 = vsub.f32 %v19112_v62, %v3900_v24  ;;  %v11654_v59 = vpop.f32.mrb[89].mxu0  ;;  %v11689_v20 = vpop.f32.mrb[89].mxu1 }
 0x4a3   : > { %v19293_v32 = vadd.f32 %v4324_v6, %v18848_v37  ;;  %v19296_v44 = vadd.f32 %v4325_v11, %v18850_v45 }
 0x4a5   : > { %11933 = vmatmul.mubr.f32.vlgmr.msra.gmra.mrb[96].mxu0 %v19293_v32  ;;  %11968 = vmatmul.mubr.f32.vlgmr.msra.gmra.mrb[96].mxu1 %v19296_v44 }
 0x4a6   : > { %14934 = vmatpush3.bf16.msra.mxu0 %v18615_v10  ;;  %14958 = vmatpush3.bf16.msra.mxu1 %v18617_v8 }
 0x4a7   : > { %14935 = vmatprep.subr.bf16.mxu0 %v21173_v33  ;;  %14959 = vmatprep.subr.bf16.mxu1 %v21173_v33 }
 0x4a8   : > { %12002 = vmatprep.mubr.msk.f32.mxu0 %vm16909_vm0, %v21166_v28  ;;  %12037 = vmatprep.mubr.msk.f32.mxu1 %vm16909_vm0, %v21166_v28 }
 0x4aa   : > { %14937 = vmatpush3.bf16.msra.mxu0 %v18623_v34  ;;  %14961 = vmatpush3.bf16.msra.mxu1 %v18625_v58 }
 0x4ab   : > { %14938 = vmatprep.subr.bf16.mxu0 %v21173_v33  ;;  %14962 = vmatprep.subr.bf16.mxu1 %v21173_v33 }
 0x4ae   : > { %14940 = vmatpush3.bf16.msra.mxu0 %v18637_v22  ;;  %14964 = vmatpush3.bf16.msra.mxu1 %v18639_v56 }
 0x4af   : > { %14941 = vmatprep.subr.bf16.mxu0 %v21173_v33  ;;  %14965 = vmatprep.subr.bf16.mxu1 %v21173_v33 }
 0x4b2   : > { %14943 = vmatpush3.bf16.msra.mxu0 %v18647_v39  ;;  %14967 = vmatpush3.bf16.msra.mxu1 %v18649_v27 }
 0x4b3   : > { %14944 = vmatprep.subr.bf16.mxu0 %v21173_v33  ;;  %14968 = vmatprep.subr.bf16.mxu1 %v21173_v33 }
 0x4b6   : > { %14946 = vmatpush3.bf16.msra.mxu0 %v18659_v18  ;;  %14970 = vmatpush3.bf16.msra.mxu1 %v18661_v38 }
 0x4b7   : > { %14947 = vmatprep.subr.bf16.mxu0 %v21173_v33  ;;  %14971 = vmatprep.subr.bf16.mxu1 %v21173_v33 }
 0x4ba   : > { %14949 = vmatpush3.bf16.msra.mxu0 %v18667_v63  ;;  %14973 = vmatpush3.bf16.msra.mxu1 %v18669_v15 }
 0x4bb   : > { %14950 = vmatprep.subr.bf16.mxu0 %v21173_v33  ;;  %14974 = vmatprep.subr.bf16.mxu1 %v21173_v33 }
 0x4be   : > { %14952 = vmatpush3.bf16.msra.mxu0 %v18675_v7  ;;  %14976 = vmatpush3.bf16.msra.mxu1 %v18677_v25 }
 0x4bf   : > { %14953 = vmatprep.subr.bf16.mxu0 %v21173_v33  ;;  %14977 = vmatprep.subr.bf16.mxu1 %v21173_v33 }
 0x4c0   : > { %v3970_v62 = vpop.f32.mrb[90].mxu0  ;;  %v4040_v48 = vpop.f32.mrb[90].mxu1 }
 0x4c1   : > { %v4326_v5 = vsub.f32 %v19153_v31, %v3970_v62  ;;  %v4327_v24 = vsub.f32 %v19156_v4, %v4040_v48  ;;  %v11724_v20 = vpop.f32.mrb[91].mxu0  ;;  %v11759_v11 = vpop.f32.mrb[91].mxu1  ;;  %v21228_v31 = vld [vmem:[#allocation18_spill] sm:$0xff]  ;;  %v21229_v4 = vld [vmem:[#allocation16_spill] sm:$0xff]  ;;  %v21230_v62 = vld [vmem:[#allocation19_spill] sm:$0xff] }
 0x4c2   : > { %14955 = vmatpush3.bf16.msra.mxu0 %v18683_v61  ;;  %14979 = vmatpush3.bf16.msra.mxu1 %v18685_v26  ;;  %v21231_v48 = vld [vmem:[#allocation17_spill] sm:$0xff]  ;;  %v21234_v20 = vld [vmem:[#allocation23_spill] sm:$0xff] }
 0x4c3   : > { %v19337_v59 = vadd.f32 %v4326_v5, %v18898_v3  ;;  %v19340_v6 = vadd.f32 %v4327_v24, %v18900_v35  ;;  %14980 = vmatprep.subr.bf16.mxu0 %v21173_v33  ;;  %15004 = vmatprep.subr.bf16.mxu1 %v21173_v33  ;;  %v21232_v5 = vld [vmem:[#allocation22_spill] sm:$0xff]  ;;  %v21233_v24 = vld [vmem:[#allocation20_spill] sm:$0xff]  ;;  %v21235_v11 = vld [vmem:[#allocation21_spill] sm:$0xff] }
 0x4c5   : > { %12003 = vmatmul.mubr.f32.vlgmr.msra.gmra.mrb[98].mxu0 %v19337_v59  ;;  %12038 = vmatmul.mubr.f32.vlgmr.msra.gmra.mrb[98].mxu1 %v19340_v6 }
 0x4c6   : > { %14982 = vmatpush3.bf16.msra.mxu0 %v18691_v29  ;;  %15006 = vmatpush3.bf16.msra.mxu1 %v18693_v54 }
 0x4c7   : > { %14983 = vmatprep.subr.bf16.mxu0 %v21173_v33  ;;  %15007 = vmatprep.subr.bf16.mxu1 %v21173_v33 }
 0x4c8   : > { %12072 = vmatprep.mubr.msk.f32.mxu0 %vm16909_vm0, %v21166_v28  ;;  %12107 = vmatprep.mubr.msk.f32.mxu1 %vm16909_vm0, %v21166_v28 }
 0x4ca   : > { %14985 = vmatpush3.bf16.msra.mxu0 %v18699_v13  ;;  %15009 = vmatpush3.bf16.msra.mxu1 %v18701_v23 }
 0x4cb   : > { %14986 = vmatprep.subr.bf16.mxu0 %v21173_v33  ;;  %15010 = vmatprep.subr.bf16.mxu1 %v21173_v33 }
 0x4ce   : > { %14988 = vmatpush3.bf16.msra.mxu0 %v18715_v52  ;;  %15012 = vmatpush3.bf16.msra.mxu1 %v18717_v36 }
 0x4cf   : > { %14989 = vmatprep.subr.bf16.mxu0 %v21173_v33  ;;  %15013 = vmatprep.subr.bf16.mxu1 %v21173_v33 }
 0x4d2   : > { %14991 = vmatpush3.bf16.msra.mxu0 %v21228_v31  ;;  %15015 = vmatpush3.bf16.msra.mxu1 %v21229_v4 }
 0x4d3   : > { %14992 = vmatprep.subr.bf16.mxu0 %v21173_v33  ;;  %15016 = vmatprep.subr.bf16.mxu1 %v21173_v33 }
 0x4d6   : > { %14994 = vmatpush3.bf16.msra.mxu0 %v21230_v62  ;;  %15018 = vmatpush3.bf16.msra.mxu1 %v21231_v48 }
 0x4d7   : > { %14995 = vmatprep.subr.bf16.mxu0 %v21173_v33  ;;  %15019 = vmatprep.subr.bf16.mxu1 %v21173_v33 }
 0x4da   : > { %14997 = vmatpush3.bf16.msra.mxu0 %v21232_v5  ;;  %15021 = vmatpush3.bf16.msra.mxu1 %v21233_v24 }
 0x4db   : > { %14998 = vmatprep.subr.bf16.mxu0 %v21173_v33  ;;  %15022 = vmatprep.subr.bf16.mxu1 %v21173_v33 }
 0x4de   : > { %15000 = vmatpush3.bf16.msra.mxu0 %v21234_v20  ;;  %15024 = vmatpush3.bf16.msra.mxu1 %v21235_v11 }
 0x4df   : > { %15001 = vmatprep.subr.bf16.mxu0 %v21173_v33  ;;  %15025 = vmatprep.subr.bf16.mxu1 %v21173_v33 }
 0x4e0   : > { %v4110_v48 = vpop.f32.mrb[92].mxu0  ;;  %v4180_v62 = vpop.f32.mrb[92].mxu1 }
 0x4e1   : > { %v4328_v4 = vsub.f32 %v19199_v12, %v4110_v48  ;;  %v4329_v5 = vsub.f32 %v19202_v51, %v4180_v62  ;;  %v11794_v31 = vpop.f32.mrb[93].mxu0  ;;  %v11829_v24 = vpop.f32.mrb[93].mxu1  ;;  %v21236_v12 = vld [vmem:[#allocation43_spill] sm:$0xff]  ;;  %v21237_v51 = vld [vmem:[#allocation38_spill] sm:$0xff] }
 0x4e2   : > { %15003 = vmatpush3.bf16.msra.mxu0 %v21182_v2  ;;  %15027 = vmatpush3.bf16.msra.mxu1 %v21183_v21  ;;  %v21238_v31 = vld [vmem:[#allocation42_spill] sm:$0xff] }
 0x4e3   : > { %v19383_v20 = vadd.f32 %v4328_v4, %v18914_v0  ;;  %v19386_v11 = vadd.f32 %v4329_v5, %v18916_v14  ;;  %15028 = vmatprep.subr.bf16.mxu0 %v21173_v33  ;;  %15052 = vmatprep.subr.bf16.mxu1 %v21173_v33  ;;  %v21239_v4 = vld [vmem:[#allocation40_spill] sm:$0xff]  ;;  %v21240_v62 = vld [vmem:[#allocation50_spill] sm:$0xff] }
 0x4e4   : > { %v21241_v48 = vld [vmem:[#allocation46_spill] sm:$0xff] }
 0x4e5   : > { %12073 = vmatmul.mubr.f32.vlgmr.msra.gmra.mrb[100].mxu0 %v19383_v20  ;;  %12108 = vmatmul.mubr.f32.vlgmr.msra.gmra.mrb[100].mxu1 %v19386_v11 }
 0x4e6   : > { %15030 = vmatpush3.bf16.msra.mxu0 %v21184_v19  ;;  %15054 = vmatpush3.bf16.msra.mxu1 %v21185_v41 }
 0x4e7   : > { %15031 = vmatprep.subr.bf16.mxu0 %v21173_v33  ;;  %15055 = vmatprep.subr.bf16.mxu1 %v21173_v33 }
 0x4e8   : > { %12142 = vmatprep.mubr.msk.f32.mxu0 %vm16909_vm0, %v21166_v28  ;;  %12177 = vmatprep.mubr.msk.f32.mxu1 %vm16909_vm0, %v21166_v28 }
 0x4ea   : > { %15033 = vmatpush3.bf16.msra.mxu0 %v21186_v47  ;;  %15057 = vmatpush3.bf16.msra.mxu1 %v21187_v53 }
 0x4eb   : > { %15034 = vmatprep.subr.bf16.mxu0 %v21173_v33  ;;  %15058 = vmatprep.subr.bf16.mxu1 %v21173_v33 }
 0x4ee   : > { %15036 = vmatpush3.bf16.msra.mxu0 %v21188_v17  ;;  %15060 = vmatpush3.bf16.msra.mxu1 %v21189_v43 }
 0x4ef   : > { %15037 = vmatprep.subr.bf16.mxu0 %v21173_v33  ;;  %15061 = vmatprep.subr.bf16.mxu1 %v21173_v33 }
 0x4f2   : > { %15039 = vmatpush3.bf16.msra.mxu0 %v18804_v1  ;;  %15063 = vmatpush3.bf16.msra.mxu1 %v18806_v57 }
 0x4f3   : > { %15040 = vmatprep.subr.bf16.mxu0 %v21173_v33  ;;  %15064 = vmatprep.subr.bf16.mxu1 %v21173_v33 }
 0x4f6   : > { %15042 = vmatpush3.bf16.msra.mxu0 %v21236_v12  ;;  %15066 = vmatpush3.bf16.msra.mxu1 %v21237_v51 }
 0x4f7   : > { %15043 = vmatprep.subr.bf16.mxu0 %v21173_v33  ;;  %15067 = vmatprep.subr.bf16.mxu1 %v21173_v33 }
 0x4fa   : > { %15045 = vmatpush3.bf16.msra.mxu0 %v21238_v31  ;;  %15069 = vmatpush3.bf16.msra.mxu1 %v21239_v4 }
 0x4fb   : > { %15046 = vmatprep.subr.bf16.mxu0 %v21173_v33  ;;  %15070 = vmatprep.subr.bf16.mxu1 %v21173_v33 }
 0x4fe   : > { %15048 = vmatpush3.bf16.msra.mxu0 %v21240_v62  ;;  %15072 = vmatpush3.bf16.msra.mxu1 %v21241_v48 }
 0x4ff   : > { %15049 = vmatprep.subr.bf16.mxu0 %v21173_v33  ;;  %15073 = vmatprep.subr.bf16.mxu1 %v21173_v33 }
 0x500   : > { %v4250_v5 = vpop.f32.mrb[94].mxu0  ;;  %v4320_v24 = vpop.f32.mrb[94].mxu1 }
 0x501   : > { %v4330_v51 = vsub.f32 %v19245_v46, %v4250_v5  ;;  %v4331_v31 = vsub.f32 %v19248_v42, %v4320_v24  ;;  %v11864_v12 = vpop.f32.mrb[95].mxu0  ;;  %v11899_v4 = vpop.f32.mrb[95].mxu1  ;;  %v21242_v46 = vld [vmem:[#allocation81_spill] sm:$0xff]  ;;  %v21243_v42 = vld [vmem:[#allocation84_spill] sm:$0xff]  ;;  %v21248_v5 = vld [vmem:[#allocation115_spill] sm:$0xff] }
 0x502   : > { %15051 = vmatpush3.bf16.msra.mxu0 %v18840_v60  ;;  %15075 = vmatpush3.bf16.msra.mxu1 %v18842_v49  ;;  %v21244_v12 = vld [vmem:[#allocation103_spill] sm:$0xff]  ;;  %v21247_v4 = vld [vmem:[#allocation110_spill] sm:$0xff]  ;;  %v21249_v24 = vld [vmem:[#allocation116_spill] sm:$0xff] }
 0x503   : > { %v19429_v62 = vadd.f32 %v4330_v51, %v18918_v16  ;;  %v19432_v48 = vadd.f32 %v4331_v31, %v18920_v40  ;;  %15076 = vmatprep.subr.bf16.mxu0 %v21173_v33  ;;  %15100 = vmatprep.subr.bf16.mxu1 %v21173_v33  ;;  %v21245_v51 = vld [vmem:[#allocation104_spill] sm:$0xff]  ;;  %v21246_v31 = vld [vmem:[#allocation109_spill] sm:$0xff] }
 0x505   : > { %12143 = vmatmul.mubr.f32.vlgmr.msra.gmra.mrb[102].mxu0 %v19429_v62  ;;  %12178 = vmatmul.mubr.f32.vlgmr.msra.gmra.mrb[102].mxu1 %v19432_v48 }
 0x506   : > { %15078 = vmatpush3.bf16.msra.mxu0 %v18481_v30  ;;  %15102 = vmatpush3.bf16.msra.mxu1 %v18483_v55 }
 0x507   : > { %15079 = vmatprep.subr.bf16.mxu0 %v21173_v33  ;;  %15103 = vmatprep.subr.bf16.mxu1 %v21173_v33 }
 0x508   : > { %12212 = vmatprep.mubr.msk.f32.mxu0 %vm16909_vm0, %v21166_v28  ;;  %12247 = vmatprep.mubr.msk.f32.mxu1 %vm16909_vm0, %v21166_v28 }
 0x50a   : > { %15081 = vmatpush3.bf16.msra.mxu0 %v21242_v46  ;;  %15105 = vmatpush3.bf16.msra.mxu1 %v21243_v42 }
 0x50b   : > { %15082 = vmatprep.subr.bf16.mxu0 %v21173_v33  ;;  %15106 = vmatprep.subr.bf16.mxu1 %v21173_v33 }
 0x50e   : > { %15084 = vmatpush3.bf16.msra.mxu0 %v21244_v12  ;;  %15108 = vmatpush3.bf16.msra.mxu1 %v21245_v51  ;;  %v21250_v51 = vld [vmem:[#allocation120_spill] sm:$0xff]  ;;  %v21251_v12 = vld [vmem:[#allocation121_spill] sm:$0xff] }
 0x50f   : > { %15085 = vmatprep.subr.bf16.mxu0 %v21173_v33  ;;  %15109 = vmatprep.subr.bf16.mxu1 %v21173_v33 }
 0x512   : > { %15087 = vmatpush3.bf16.msra.mxu0 %v21246_v31  ;;  %15111 = vmatpush3.bf16.msra.mxu1 %v21247_v4  ;;  %v21252_v4 = vld [vmem:[#allocation14_spill] sm:$0xff]  ;;  %v21253_v31 = vld [vmem:[#allocation12_spill] sm:$0xff] }
 0x513   : > { %15088 = vmatprep.subr.bf16.mxu0 %v21173_v33  ;;  %15112 = vmatprep.subr.bf16.mxu1 %v21173_v33 }
 0x516   : > { %15090 = vmatpush3.bf16.msra.mxu0 %v21248_v5  ;;  %15114 = vmatpush3.bf16.msra.mxu1 %v21249_v24 }
 0x517   : > { %15091 = vmatprep.subr.bf16.mxu0 %v21173_v33  ;;  %15115 = vmatprep.subr.bf16.mxu1 %v21173_v33 }
 0x51a   : > { %15093 = vmatpush3.bf16.msra.mxu0 %v21250_v51  ;;  %15117 = vmatpush3.bf16.msra.mxu1 %v21251_v12 }
 0x51b   : > { %15094 = vmatprep.subr.bf16.mxu0 %v21173_v33  ;;  %15118 = vmatprep.subr.bf16.mxu1 %v21173_v33 }
 0x51e   : > { %15096 = vmatpush3.bf16.msra.mxu0 %v21252_v4  ;;  %15120 = vmatpush3.bf16.msra.mxu1 %v21253_v31 }
 0x51f   : > { %15097 = vmatprep.subr.bf16.mxu0 %v21173_v33  ;;  %15121 = vmatprep.subr.bf16.mxu1 %v21173_v33 }
 0x522   : > { %15099 = vmatpush3.bf16.msra.mxu0 %v21200_v50  ;;  %15123 = vmatpush3.bf16.msra.mxu1 %v21201_v9 }
 0x523   : > { %15124 = vmatprep.subr.bf16.mxu0 %v21173_v33  ;;  %15148 = vmatprep.subr.bf16.mxu1 %v21173_v33 }
 0x578   : > { %v4406_v12 = vpop.f32.mrb[96].mxu0  ;;  %v4476_v51 = vpop.f32.mrb[96].mxu1 }
 0x579   : > { %v4900_v24 = vsub.f32 %v19293_v32, %v4406_v12  ;;  %v4901_v4 = vsub.f32 %v19296_v44, %v4476_v51  ;;  %v11934_v5 = vpop.f32.mrb[97].mxu0  ;;  %v11969_v31 = vpop.f32.mrb[97].mxu1 }
 0x57b   : > { %v19477_v42 = vadd.f32 %v4900_v24, %v18848_v37  ;;  %v19480_v46 = vadd.f32 %v4901_v4, %v18850_v45 }
 0x57d   : > { %12213 = vmatmul.mubr.f32.vlgmr.msra.gmra.mrb[104].mxu0 %v19477_v42  ;;  %12248 = vmatmul.mubr.f32.vlgmr.msra.gmra.mrb[104].mxu1 %v19480_v46 }
 0x57e   : > { %15126 = vmatpush3.bf16.msra.mxu0 %v18615_v10  ;;  %15150 = vmatpush3.bf16.msra.mxu1 %v18617_v8 }
 0x57f   : > { %15127 = vmatprep.subr.bf16.mxu0 %v21173_v33  ;;  %15151 = vmatprep.subr.bf16.mxu1 %v21173_v33 }
 0x580   : > { %12282 = vmatprep.mubr.msk.f32.mxu0 %vm16909_vm0, %v21166_v28  ;;  %12317 = vmatprep.mubr.msk.f32.mxu1 %vm16909_vm0, %v21166_v28 }
 0x582   : > { %15129 = vmatpush3.bf16.msra.mxu0 %v18623_v34  ;;  %15153 = vmatpush3.bf16.msra.mxu1 %v18625_v58 }
 0x583   : > { %15130 = vmatprep.subr.bf16.mxu0 %v21173_v33  ;;  %15154 = vmatprep.subr.bf16.mxu1 %v21173_v33 }
 0x586   : > { %15132 = vmatpush3.bf16.msra.mxu0 %v18637_v22  ;;  %15156 = vmatpush3.bf16.msra.mxu1 %v18639_v56 }
 0x587   : > { %15133 = vmatprep.subr.bf16.mxu0 %v21173_v33  ;;  %15157 = vmatprep.subr.bf16.mxu1 %v21173_v33 }
 0x58a   : > { %15135 = vmatpush3.bf16.msra.mxu0 %v18647_v39  ;;  %15159 = vmatpush3.bf16.msra.mxu1 %v18649_v27 }
 0x58b   : > { %15136 = vmatprep.subr.bf16.mxu0 %v21173_v33  ;;  %15160 = vmatprep.subr.bf16.mxu1 %v21173_v33 }
 0x58e   : > { %15138 = vmatpush3.bf16.msra.mxu0 %v18659_v18  ;;  %15162 = vmatpush3.bf16.msra.mxu1 %v18661_v38 }
 0x58f   : > { %15139 = vmatprep.subr.bf16.mxu0 %v21173_v33  ;;  %15163 = vmatprep.subr.bf16.mxu1 %v21173_v33 }
 0x592   : > { %15141 = vmatpush3.bf16.msra.mxu0 %v18667_v63  ;;  %15165 = vmatpush3.bf16.msra.mxu1 %v18669_v15 }
 0x593   : > { %15142 = vmatprep.subr.bf16.mxu0 %v21173_v33  ;;  %15166 = vmatprep.subr.bf16.mxu1 %v21173_v33 }
 0x596   : > { %15144 = vmatpush3.bf16.msra.mxu0 %v18675_v7  ;;  %15168 = vmatpush3.bf16.msra.mxu1 %v18677_v25 }
 0x597   : > { %15145 = vmatprep.subr.bf16.mxu0 %v21173_v33  ;;  %15169 = vmatprep.subr.bf16.mxu1 %v21173_v33 }
 0x598   : > { %v4546_v44 = vpop.f32.mrb[98].mxu0  ;;  %v4616_v32 = vpop.f32.mrb[98].mxu1 }
 0x599   : > { %v4902_v12 = vsub.f32 %v19337_v59, %v4546_v44  ;;  %v4903_v51 = vsub.f32 %v19340_v6, %v4616_v32  ;;  %v12004_v31 = vpop.f32.mrb[99].mxu0  ;;  %v12039_v4 = vpop.f32.mrb[99].mxu1  ;;  %v21254_v59 = vld [vmem:[#allocation18_spill] sm:$0xff]  ;;  %v21255_v6 = vld [vmem:[#allocation16_spill] sm:$0xff]  ;;  %v21256_v44 = vld [vmem:[#allocation19_spill] sm:$0xff] }
 0x59a   : > { %15147 = vmatpush3.bf16.msra.mxu0 %v18683_v61  ;;  %15171 = vmatpush3.bf16.msra.mxu1 %v18685_v26  ;;  %v21257_v32 = vld [vmem:[#allocation17_spill] sm:$0xff]  ;;  %v21260_v31 = vld [vmem:[#allocation23_spill] sm:$0xff] }
 0x59b   : > { %v19521_v5 = vadd.f32 %v4902_v12, %v18898_v3  ;;  %v19524_v24 = vadd.f32 %v4903_v51, %v18900_v35  ;;  %15172 = vmatprep.subr.bf16.mxu0 %v21173_v33  ;;  %15196 = vmatprep.subr.bf16.mxu1 %v21173_v33  ;;  %v21258_v12 = vld [vmem:[#allocation22_spill] sm:$0xff]  ;;  %v21259_v51 = vld [vmem:[#allocation20_spill] sm:$0xff]  ;;  %v21261_v4 = vld [vmem:[#allocation21_spill] sm:$0xff] }
 0x59d   : > { %12283 = vmatmul.mubr.f32.vlgmr.msra.gmra.mrb[106].mxu0 %v19521_v5  ;;  %12318 = vmatmul.mubr.f32.vlgmr.msra.gmra.mrb[106].mxu1 %v19524_v24 }
 0x59e   : > { %15174 = vmatpush3.bf16.msra.mxu0 %v18691_v29  ;;  %15198 = vmatpush3.bf16.msra.mxu1 %v18693_v54 }
 0x59f   : > { %15175 = vmatprep.subr.bf16.mxu0 %v21173_v33  ;;  %15199 = vmatprep.subr.bf16.mxu1 %v21173_v33 }
 0x5a0   : > { %12352 = vmatprep.mubr.msk.f32.mxu0 %vm16909_vm0, %v21166_v28  ;;  %12387 = vmatprep.mubr.msk.f32.mxu1 %vm16909_vm0, %v21166_v28 }
 0x5a2   : > { %15177 = vmatpush3.bf16.msra.mxu0 %v18699_v13  ;;  %15201 = vmatpush3.bf16.msra.mxu1 %v18701_v23 }
 0x5a3   : > { %15178 = vmatprep.subr.bf16.mxu0 %v21173_v33  ;;  %15202 = vmatprep.subr.bf16.mxu1 %v21173_v33 }
 0x5a6   : > { %15180 = vmatpush3.bf16.msra.mxu0 %v18715_v52  ;;  %15204 = vmatpush3.bf16.msra.mxu1 %v18717_v36 }
 0x5a7   : > { %15181 = vmatprep.subr.bf16.mxu0 %v21173_v33  ;;  %15205 = vmatprep.subr.bf16.mxu1 %v21173_v33 }
 0x5aa   : > { %15183 = vmatpush3.bf16.msra.mxu0 %v21254_v59  ;;  %15207 = vmatpush3.bf16.msra.mxu1 %v21255_v6 }
 0x5ab   : > { %15184 = vmatprep.subr.bf16.mxu0 %v21173_v33  ;;  %15208 = vmatprep.subr.bf16.mxu1 %v21173_v33 }
 0x5ae   : > { %15186 = vmatpush3.bf16.msra.mxu0 %v21256_v44  ;;  %15210 = vmatpush3.bf16.msra.mxu1 %v21257_v32 }
 0x5af   : > { %15187 = vmatprep.subr.bf16.mxu0 %v21173_v33  ;;  %15211 = vmatprep.subr.bf16.mxu1 %v21173_v33 }
 0x5b2   : > { %15189 = vmatpush3.bf16.msra.mxu0 %v21258_v12  ;;  %15213 = vmatpush3.bf16.msra.mxu1 %v21259_v51 }
 0x5b3   : > { %15190 = vmatprep.subr.bf16.mxu0 %v21173_v33  ;;  %15214 = vmatprep.subr.bf16.mxu1 %v21173_v33 }
 0x5b6   : > { %15192 = vmatpush3.bf16.msra.mxu0 %v21260_v31  ;;  %15216 = vmatpush3.bf16.msra.mxu1 %v21261_v4 }
 0x5b7   : > { %15193 = vmatprep.subr.bf16.mxu0 %v21173_v33  ;;  %15217 = vmatprep.subr.bf16.mxu1 %v21173_v33 }
 0x5b8   : > { %v4686_v32 = vpop.f32.mrb[100].mxu0  ;;  %v4756_v44 = vpop.f32.mrb[100].mxu1 }
 0x5b9   : > { %v4904_v6 = vsub.f32 %v19383_v20, %v4686_v32  ;;  %v4905_v12 = vsub.f32 %v19386_v11, %v4756_v44  ;;  %v12074_v59 = vpop.f32.mrb[101].mxu0  ;;  %v12109_v51 = vpop.f32.mrb[101].mxu1  ;;  %v21262_v20 = vld [vmem:[#allocation43_spill] sm:$0xff]  ;;  %v21263_v11 = vld [vmem:[#allocation38_spill] sm:$0xff] }
 0x5ba   : > { %15195 = vmatpush3.bf16.msra.mxu0 %v21182_v2  ;;  %15219 = vmatpush3.bf16.msra.mxu1 %v21183_v21  ;;  %v21264_v59 = vld [vmem:[#allocation42_spill] sm:$0xff] }
 0x5bb   : > { %v19567_v31 = vadd.f32 %v4904_v6, %v18914_v0  ;;  %v19570_v4 = vadd.f32 %v4905_v12, %v18916_v14  ;;  %15220 = vmatprep.subr.bf16.mxu0 %v21173_v33  ;;  %15244 = vmatprep.subr.bf16.mxu1 %v21173_v33  ;;  %v21265_v6 = vld [vmem:[#allocation40_spill] sm:$0xff]  ;;  %v21266_v44 = vld [vmem:[#allocation50_spill] sm:$0xff] }
 0x5bc   : > { %v21267_v32 = vld [vmem:[#allocation46_spill] sm:$0xff] }
 0x5bd   : > { %12353 = vmatmul.mubr.f32.vlgmr.msra.gmra.mrb[108].mxu0 %v19567_v31  ;;  %12388 = vmatmul.mubr.f32.vlgmr.msra.gmra.mrb[108].mxu1 %v19570_v4 }
 0x5be   : > { %15222 = vmatpush3.bf16.msra.mxu0 %v21184_v19  ;;  %15246 = vmatpush3.bf16.msra.mxu1 %v21185_v41 }
 0x5bf   : > { %15223 = vmatprep.subr.bf16.mxu0 %v21173_v33  ;;  %15247 = vmatprep.subr.bf16.mxu1 %v21173_v33 }
 0x5c0   : > { %12422 = vmatprep.mubr.msk.f32.mxu0 %vm16909_vm0, %v21166_v28  ;;  %12457 = vmatprep.mubr.msk.f32.mxu1 %vm16909_vm0, %v21166_v28 }
 0x5c2   : > { %15225 = vmatpush3.bf16.msra.mxu0 %v21186_v47  ;;  %15249 = vmatpush3.bf16.msra.mxu1 %v21187_v53 }
 0x5c3   : > { %15226 = vmatprep.subr.bf16.mxu0 %v21173_v33  ;;  %15250 = vmatprep.subr.bf16.mxu1 %v21173_v33 }
 0x5c6   : > { %15228 = vmatpush3.bf16.msra.mxu0 %v21188_v17  ;;  %15252 = vmatpush3.bf16.msra.mxu1 %v21189_v43 }
 0x5c7   : > { %15229 = vmatprep.subr.bf16.mxu0 %v21173_v33  ;;  %15253 = vmatprep.subr.bf16.mxu1 %v21173_v33 }
 0x5ca   : > { %15231 = vmatpush3.bf16.msra.mxu0 %v18804_v1  ;;  %15255 = vmatpush3.bf16.msra.mxu1 %v18806_v57 }
 0x5cb   : > { %15232 = vmatprep.subr.bf16.mxu0 %v21173_v33  ;;  %15256 = vmatprep.subr.bf16.mxu1 %v21173_v33 }
 0x5ce   : > { %15234 = vmatpush3.bf16.msra.mxu0 %v21262_v20  ;;  %15258 = vmatpush3.bf16.msra.mxu1 %v21263_v11 }
 0x5cf   : > { %15235 = vmatprep.subr.bf16.mxu0 %v21173_v33  ;;  %15259 = vmatprep.subr.bf16.mxu1 %v21173_v33 }
 0x5d2   : > { %15237 = vmatpush3.bf16.msra.mxu0 %v21264_v59  ;;  %15261 = vmatpush3.bf16.msra.mxu1 %v21265_v6 }
 0x5d3   : > { %15238 = vmatprep.subr.bf16.mxu0 %v21173_v33  ;;  %15262 = vmatprep.subr.bf16.mxu1 %v21173_v33 }
 0x5d6   : > { %15240 = vmatpush3.bf16.msra.mxu0 %v21266_v44  ;;  %15264 = vmatpush3.bf16.msra.mxu1 %v21267_v32 }
 0x5d7   : > { %15241 = vmatprep.subr.bf16.mxu0 %v21173_v33  ;;  %15265 = vmatprep.subr.bf16.mxu1 %v21173_v33 }
 0x5d8   : > { %v4826_v12 = vpop.f32.mrb[102].mxu0  ;;  %v4896_v51 = vpop.f32.mrb[102].mxu1 }
 0x5d9   : > { %v4906_v11 = vsub.f32 %v19429_v62, %v4826_v12  ;;  %v4907_v59 = vsub.f32 %v19432_v48, %v4896_v51  ;;  %v12144_v20 = vpop.f32.mrb[103].mxu0  ;;  %v12179_v6 = vpop.f32.mrb[103].mxu1  ;;  %v21268_v62 = vld [vmem:[#allocation81_spill] sm:$0xff]  ;;  %v21269_v48 = vld [vmem:[#allocation84_spill] sm:$0xff]  ;;  %v21274_v12 = vld [vmem:[#allocation115_spill] sm:$0xff] }
 0x5da   : > { %15243 = vmatpush3.bf16.msra.mxu0 %v18840_v60  ;;  %15267 = vmatpush3.bf16.msra.mxu1 %v18842_v49  ;;  %v21270_v20 = vld [vmem:[#allocation103_spill] sm:$0xff]  ;;  %v21273_v6 = vld [vmem:[#allocation110_spill] sm:$0xff]  ;;  %v21275_v51 = vld [vmem:[#allocation116_spill] sm:$0xff] }
 0x5db   : > { %v19613_v44 = vadd.f32 %v4906_v11, %v18918_v16  ;;  %v19616_v32 = vadd.f32 %v4907_v59, %v18920_v40  ;;  %15268 = vmatprep.subr.bf16.mxu0 %v21173_v33  ;;  %15292 = vmatprep.subr.bf16.mxu1 %v21173_v33  ;;  %v21271_v11 = vld [vmem:[#allocation104_spill] sm:$0xff]  ;;  %v21272_v59 = vld [vmem:[#allocation109_spill] sm:$0xff] }
 0x5dd   : > { %12423 = vmatmul.mubr.f32.vlgmr.msra.gmra.mrb[110].mxu0 %v19613_v44  ;;  %12458 = vmatmul.mubr.f32.vlgmr.msra.gmra.mrb[110].mxu1 %v19616_v32 }
 0x5de   : > { %15270 = vmatpush3.bf16.msra.mxu0 %v18481_v30  ;;  %15294 = vmatpush3.bf16.msra.mxu1 %v18483_v55 }
 0x5df   : > { %15271 = vmatprep.subr.bf16.mxu0 %v21173_v33  ;;  %15295 = vmatprep.subr.bf16.mxu1 %v21173_v33 }
 0x5e0   : > { %12492 = vmatprep.mubr.msk.f32.mxu0 %vm16909_vm0, %v21166_v28  ;;  %12527 = vmatprep.mubr.msk.f32.mxu1 %vm16909_vm0, %v21166_v28 }
 0x5e2   : > { %15273 = vmatpush3.bf16.msra.mxu0 %v21268_v62  ;;  %15297 = vmatpush3.bf16.msra.mxu1 %v21269_v48 }
 0x5e3   : > { %15274 = vmatprep.subr.bf16.mxu0 %v21173_v33  ;;  %15298 = vmatprep.subr.bf16.mxu1 %v21173_v33 }
 0x5e6   : > { %15276 = vmatpush3.bf16.msra.mxu0 %v21270_v20  ;;  %15300 = vmatpush3.bf16.msra.mxu1 %v21271_v11  ;;  %v21276_v11 = vld [vmem:[#allocation120_spill] sm:$0xff]  ;;  %v21277_v20 = vld [vmem:[#allocation121_spill] sm:$0xff] }
 0x5e7   : > { %15277 = vmatprep.subr.bf16.mxu0 %v21173_v33  ;;  %15301 = vmatprep.subr.bf16.mxu1 %v21173_v33 }
 0x5ea   : > { %15279 = vmatpush3.bf16.msra.mxu0 %v21272_v59  ;;  %15303 = vmatpush3.bf16.msra.mxu1 %v21273_v6  ;;  %v21278_v6 = vld [vmem:[#allocation14_spill] sm:$0xff]  ;;  %v21279_v59 = vld [vmem:[#allocation12_spill] sm:$0xff] }
 0x5eb   : > { %15280 = vmatprep.subr.bf16.mxu0 %v21173_v33  ;;  %15304 = vmatprep.subr.bf16.mxu1 %v21173_v33 }
 0x5ee   : > { %15282 = vmatpush3.bf16.msra.mxu0 %v21274_v12  ;;  %15306 = vmatpush3.bf16.msra.mxu1 %v21275_v51 }
 0x5ef   : > { %15283 = vmatprep.subr.bf16.mxu0 %v21173_v33  ;;  %15307 = vmatprep.subr.bf16.mxu1 %v21173_v33 }
 0x5f2   : > { %15285 = vmatpush3.bf16.msra.mxu0 %v21276_v11  ;;  %15309 = vmatpush3.bf16.msra.mxu1 %v21277_v20 }
 0x5f3   : > { %15286 = vmatprep.subr.bf16.mxu0 %v21173_v33  ;;  %15310 = vmatprep.subr.bf16.mxu1 %v21173_v33 }
 0x5f6   : > { %15288 = vmatpush3.bf16.msra.mxu0 %v21278_v6  ;;  %15312 = vmatpush3.bf16.msra.mxu1 %v21279_v59 }
 0x5f7   : > { %15289 = vmatprep.subr.bf16.mxu0 %v21173_v33  ;;  %15313 = vmatprep.subr.bf16.mxu1 %v21173_v33 }
 0x5fa   : > { %15291 = vmatpush3.bf16.msra.mxu0 %v21200_v50  ;;  %15315 = vmatpush3.bf16.msra.mxu1 %v21201_v9 }
 0x5fb   : > { %15316 = vmatprep.subr.bf16.mxu0 %v21173_v33  ;;  %15340 = vmatprep.subr.bf16.mxu1 %v21173_v33 }
 0x650   : > { %v4982_v20 = vpop.f32.mrb[104].mxu0  ;;  %v5052_v11 = vpop.f32.mrb[104].mxu1 }
 0x651   : > { %v5476_v51 = vsub.f32 %v19477_v42, %v4982_v20  ;;  %v5477_v6 = vsub.f32 %v19480_v46, %v5052_v11  ;;  %v12214_v12 = vpop.f32.mrb[105].mxu0  ;;  %v12249_v59 = vpop.f32.mrb[105].mxu1 }
 0x653   : > { %v19661_v48 = vadd.f32 %v5476_v51, %v18848_v37  ;;  %v19664_v62 = vadd.f32 %v5477_v6, %v18850_v45 }
 0x655   : > { %12493 = vmatmul.mubr.f32.vlgmr.msra.gmra.mrb[112].mxu0 %v19661_v48  ;;  %12528 = vmatmul.mubr.f32.vlgmr.msra.gmra.mrb[112].mxu1 %v19664_v62 }
 0x656   : > { %15318 = vmatpush3.bf16.msra.mxu0 %v18615_v10  ;;  %15342 = vmatpush3.bf16.msra.mxu1 %v18617_v8 }
 0x657   : > { %15319 = vmatprep.subr.bf16.mxu0 %v21173_v33  ;;  %15343 = vmatprep.subr.bf16.mxu1 %v21173_v33 }
 0x658   : > { %12562 = vmatprep.mubr.msk.f32.mxu0 %vm16909_vm0, %v21166_v28  ;;  %12597 = vmatprep.mubr.msk.f32.mxu1 %vm16909_vm0, %v21166_v28 }
 0x65a   : > { %15321 = vmatpush3.bf16.msra.mxu0 %v18623_v34  ;;  %15345 = vmatpush3.bf16.msra.mxu1 %v18625_v58 }
 0x65b   : > { %15322 = vmatprep.subr.bf16.mxu0 %v21173_v33  ;;  %15346 = vmatprep.subr.bf16.mxu1 %v21173_v33 }
 0x65e   : > { %15324 = vmatpush3.bf16.msra.mxu0 %v18637_v22  ;;  %15348 = vmatpush3.bf16.msra.mxu1 %v18639_v56 }
 0x65f   : > { %15325 = vmatprep.subr.bf16.mxu0 %v21173_v33  ;;  %15349 = vmatprep.subr.bf16.mxu1 %v21173_v33 }
 0x662   : > { %15327 = vmatpush3.bf16.msra.mxu0 %v18647_v39  ;;  %15351 = vmatpush3.bf16.msra.mxu1 %v18649_v27 }
 0x663   : > { %15328 = vmatprep.subr.bf16.mxu0 %v21173_v33  ;;  %15352 = vmatprep.subr.bf16.mxu1 %v21173_v33 }
 0x666   : > { %15330 = vmatpush3.bf16.msra.mxu0 %v18659_v18  ;;  %15354 = vmatpush3.bf16.msra.mxu1 %v18661_v38 }
 0x667   : > { %15331 = vmatprep.subr.bf16.mxu0 %v21173_v33  ;;  %15355 = vmatprep.subr.bf16.mxu1 %v21173_v33 }
 0x66a   : > { %15333 = vmatpush3.bf16.msra.mxu0 %v18667_v63  ;;  %15357 = vmatpush3.bf16.msra.mxu1 %v18669_v15 }
 0x66b   : > { %15334 = vmatprep.subr.bf16.mxu0 %v21173_v33  ;;  %15358 = vmatprep.subr.bf16.mxu1 %v21173_v33 }
 0x66e   : > { %15336 = vmatpush3.bf16.msra.mxu0 %v18675_v7  ;;  %15360 = vmatpush3.bf16.msra.mxu1 %v18677_v25 }
 0x66f   : > { %15337 = vmatprep.subr.bf16.mxu0 %v21173_v33  ;;  %15361 = vmatprep.subr.bf16.mxu1 %v21173_v33 }
 0x670   : > { %v5122_v46 = vpop.f32.mrb[106].mxu0  ;;  %v5192_v42 = vpop.f32.mrb[106].mxu1 }
 0x671   : > { %v5478_v20 = vsub.f32 %v19521_v5, %v5122_v46  ;;  %v5479_v11 = vsub.f32 %v19524_v24, %v5192_v42  ;;  %v12284_v59 = vpop.f32.mrb[107].mxu0  ;;  %v12319_v6 = vpop.f32.mrb[107].mxu1  ;;  %v21280_v5 = vld [vmem:[#allocation18_spill] sm:$0xff]  ;;  %v21281_v24 = vld [vmem:[#allocation16_spill] sm:$0xff]  ;;  %v21282_v46 = vld [vmem:[#allocation19_spill] sm:$0xff] }
 0x672   : > { %15339 = vmatpush3.bf16.msra.mxu0 %v18683_v61  ;;  %15363 = vmatpush3.bf16.msra.mxu1 %v18685_v26  ;;  %v21283_v42 = vld [vmem:[#allocation17_spill] sm:$0xff]  ;;  %v21286_v59 = vld [vmem:[#allocation23_spill] sm:$0xff] }
 0x673   : > { %v19705_v12 = vadd.f32 %v5478_v20, %v18898_v3  ;;  %v19708_v51 = vadd.f32 %v5479_v11, %v18900_v35  ;;  %15364 = vmatprep.subr.bf16.mxu0 %v21173_v33  ;;  %15388 = vmatprep.subr.bf16.mxu1 %v21173_v33  ;;  %v21284_v20 = vld [vmem:[#allocation22_spill] sm:$0xff]  ;;  %v21285_v11 = vld [vmem:[#allocation20_spill] sm:$0xff]  ;;  %v21287_v6 = vld [vmem:[#allocation21_spill] sm:$0xff] }
 0x675   : > { %12563 = vmatmul.mubr.f32.vlgmr.msra.gmra.mrb[114].mxu0 %v19705_v12  ;;  %12598 = vmatmul.mubr.f32.vlgmr.msra.gmra.mrb[114].mxu1 %v19708_v51 }
 0x676   : > { %15366 = vmatpush3.bf16.msra.mxu0 %v18691_v29  ;;  %15390 = vmatpush3.bf16.msra.mxu1 %v18693_v54 }
 0x677   : > { %15367 = vmatprep.subr.bf16.mxu0 %v21173_v33  ;;  %15391 = vmatprep.subr.bf16.mxu1 %v21173_v33 }
 0x678   : > { %12632 = vmatprep.mubr.msk.f32.mxu0 %vm16909_vm0, %v21166_v28  ;;  %12667 = vmatprep.mubr.msk.f32.mxu1 %vm16909_vm0, %v21166_v28 }
 0x67a   : > { %15369 = vmatpush3.bf16.msra.mxu0 %v18699_v13  ;;  %15393 = vmatpush3.bf16.msra.mxu1 %v18701_v23 }
 0x67b   : > { %15370 = vmatprep.subr.bf16.mxu0 %v21173_v33  ;;  %15394 = vmatprep.subr.bf16.mxu1 %v21173_v33 }
 0x67e   : > { %15372 = vmatpush3.bf16.msra.mxu0 %v18715_v52  ;;  %15396 = vmatpush3.bf16.msra.mxu1 %v18717_v36 }
 0x67f   : > { %15373 = vmatprep.subr.bf16.mxu0 %v21173_v33  ;;  %15397 = vmatprep.subr.bf16.mxu1 %v21173_v33 }
 0x682   : > { %15375 = vmatpush3.bf16.msra.mxu0 %v21280_v5  ;;  %15399 = vmatpush3.bf16.msra.mxu1 %v21281_v24 }
 0x683   : > { %15376 = vmatprep.subr.bf16.mxu0 %v21173_v33  ;;  %15400 = vmatprep.subr.bf16.mxu1 %v21173_v33 }
 0x686   : > { %15378 = vmatpush3.bf16.msra.mxu0 %v21282_v46  ;;  %15402 = vmatpush3.bf16.msra.mxu1 %v21283_v42 }
 0x687   : > { %15379 = vmatprep.subr.bf16.mxu0 %v21173_v33  ;;  %15403 = vmatprep.subr.bf16.mxu1 %v21173_v33 }
 0x68a   : > { %15381 = vmatpush3.bf16.msra.mxu0 %v21284_v20  ;;  %15405 = vmatpush3.bf16.msra.mxu1 %v21285_v11 }
 0x68b   : > { %15382 = vmatprep.subr.bf16.mxu0 %v21173_v33  ;;  %15406 = vmatprep.subr.bf16.mxu1 %v21173_v33 }
 0x68e   : > { %15384 = vmatpush3.bf16.msra.mxu0 %v21286_v59  ;;  %15408 = vmatpush3.bf16.msra.mxu1 %v21287_v6 }
 0x68f   : > { %15385 = vmatprep.subr.bf16.mxu0 %v21173_v33  ;;  %15409 = vmatprep.subr.bf16.mxu1 %v21173_v33 }
 0x690   : > { %v5262_v42 = vpop.f32.mrb[108].mxu0  ;;  %v5332_v46 = vpop.f32.mrb[108].mxu1 }
 0x691   : > { %v5480_v24 = vsub.f32 %v19567_v31, %v5262_v42  ;;  %v5481_v20 = vsub.f32 %v19570_v4, %v5332_v46  ;;  %v12354_v5 = vpop.f32.mrb[109].mxu0  ;;  %v12389_v11 = vpop.f32.mrb[109].mxu1  ;;  %v21288_v31 = vld [vmem:[#allocation43_spill] sm:$0xff]  ;;  %v21289_v4 = vld [vmem:[#allocation38_spill] sm:$0xff] }
 0x692   : > { %15387 = vmatpush3.bf16.msra.mxu0 %v21182_v2  ;;  %15411 = vmatpush3.bf16.msra.mxu1 %v21183_v21  ;;  %v21290_v5 = vld [vmem:[#allocation42_spill] sm:$0xff] }
 0x693   : > { %v19751_v59 = vadd.f32 %v5480_v24, %v18914_v0  ;;  %v19754_v6 = vadd.f32 %v5481_v20, %v18916_v14  ;;  %15412 = vmatprep.subr.bf16.mxu0 %v21173_v33  ;;  %15436 = vmatprep.subr.bf16.mxu1 %v21173_v33  ;;  %v21291_v24 = vld [vmem:[#allocation40_spill] sm:$0xff]  ;;  %v21292_v46 = vld [vmem:[#allocation50_spill] sm:$0xff] }
 0x694   : > { %v21293_v42 = vld [vmem:[#allocation46_spill] sm:$0xff] }
 0x695   : > { %12633 = vmatmul.mubr.f32.vlgmr.msra.gmra.mrb[116].mxu0 %v19751_v59  ;;  %12668 = vmatmul.mubr.f32.vlgmr.msra.gmra.mrb[116].mxu1 %v19754_v6 }
 0x696   : > { %15414 = vmatpush3.bf16.msra.mxu0 %v21184_v19  ;;  %15438 = vmatpush3.bf16.msra.mxu1 %v21185_v41 }
 0x697   : > { %15415 = vmatprep.subr.bf16.mxu0 %v21173_v33  ;;  %15439 = vmatprep.subr.bf16.mxu1 %v21173_v33 }
 0x698   : > { %12702 = vmatprep.mubr.msk.f32.mxu0 %vm16909_vm0, %v21166_v28  ;;  %12737 = vmatprep.mubr.msk.f32.mxu1 %vm16909_vm0, %v21166_v28 }
 0x69a   : > { %15417 = vmatpush3.bf16.msra.mxu0 %v21186_v47  ;;  %15441 = vmatpush3.bf16.msra.mxu1 %v21187_v53 }
 0x69b   : > { %15418 = vmatprep.subr.bf16.mxu0 %v21173_v33  ;;  %15442 = vmatprep.subr.bf16.mxu1 %v21173_v33 }
 0x69e   : > { %15420 = vmatpush3.bf16.msra.mxu0 %v21188_v17  ;;  %15444 = vmatpush3.bf16.msra.mxu1 %v21189_v43 }
 0x69f   : > { %15421 = vmatprep.subr.bf16.mxu0 %v21173_v33  ;;  %15445 = vmatprep.subr.bf16.mxu1 %v21173_v33 }
 0x6a2   : > { %15423 = vmatpush3.bf16.msra.mxu0 %v18804_v1  ;;  %15447 = vmatpush3.bf16.msra.mxu1 %v18806_v57 }
 0x6a3   : > { %15424 = vmatprep.subr.bf16.mxu0 %v21173_v33  ;;  %15448 = vmatprep.subr.bf16.mxu1 %v21173_v33 }
 0x6a6   : > { %15426 = vmatpush3.bf16.msra.mxu0 %v21288_v31  ;;  %15450 = vmatpush3.bf16.msra.mxu1 %v21289_v4 }
 0x6a7   : > { %15427 = vmatprep.subr.bf16.mxu0 %v21173_v33  ;;  %15451 = vmatprep.subr.bf16.mxu1 %v21173_v33 }
 0x6aa   : > { %15429 = vmatpush3.bf16.msra.mxu0 %v21290_v5  ;;  %15453 = vmatpush3.bf16.msra.mxu1 %v21291_v24 }
 0x6ab   : > { %15430 = vmatprep.subr.bf16.mxu0 %v21173_v33  ;;  %15454 = vmatprep.subr.bf16.mxu1 %v21173_v33 }
 0x6ae   : > { %15432 = vmatpush3.bf16.msra.mxu0 %v21292_v46  ;;  %15456 = vmatpush3.bf16.msra.mxu1 %v21293_v42 }
 0x6af   : > { %15433 = vmatprep.subr.bf16.mxu0 %v21173_v33  ;;  %15457 = vmatprep.subr.bf16.mxu1 %v21173_v33 }
 0x6b0   : > { %v5402_v20 = vpop.f32.mrb[110].mxu0  ;;  %v5472_v11 = vpop.f32.mrb[110].mxu1 }
 0x6b1   : > { %v5482_v4 = vsub.f32 %v19613_v44, %v5402_v20  ;;  %v5483_v5 = vsub.f32 %v19616_v32, %v5472_v11  ;;  %v12424_v31 = vpop.f32.mrb[111].mxu0  ;;  %v12459_v24 = vpop.f32.mrb[111].mxu1  ;;  %v21294_v44 = vld [vmem:[#allocation81_spill] sm:$0xff]  ;;  %v21295_v32 = vld [vmem:[#allocation84_spill] sm:$0xff]  ;;  %v21300_v20 = vld [vmem:[#allocation115_spill] sm:$0xff] }
 0x6b2   : > { %15435 = vmatpush3.bf16.msra.mxu0 %v18840_v60  ;;  %15459 = vmatpush3.bf16.msra.mxu1 %v18842_v49  ;;  %v21296_v31 = vld [vmem:[#allocation103_spill] sm:$0xff]  ;;  %v21299_v24 = vld [vmem:[#allocation110_spill] sm:$0xff]  ;;  %v21301_v11 = vld [vmem:[#allocation116_spill] sm:$0xff] }
 0x6b3   : > { %v19797_v46 = vadd.f32 %v5482_v4, %v18918_v16  ;;  %v19800_v42 = vadd.f32 %v5483_v5, %v18920_v40  ;;  %15460 = vmatprep.subr.bf16.mxu0 %v21173_v33  ;;  %15484 = vmatprep.subr.bf16.mxu1 %v21173_v33  ;;  %v21297_v4 = vld [vmem:[#allocation104_spill] sm:$0xff]  ;;  %v21298_v5 = vld [vmem:[#allocation109_spill] sm:$0xff] }
 0x6b5   : > { %12703 = vmatmul.mubr.f32.vlgmr.msra.gmra.mrb[118].mxu0 %v19797_v46  ;;  %12738 = vmatmul.mubr.f32.vlgmr.msra.gmra.mrb[118].mxu1 %v19800_v42 }
 0x6b6   : > { %15462 = vmatpush3.bf16.msra.mxu0 %v18481_v30  ;;  %15486 = vmatpush3.bf16.msra.mxu1 %v18483_v55 }
 0x6b7   : > { %15463 = vmatprep.subr.bf16.mxu0 %v21173_v33  ;;  %15487 = vmatprep.subr.bf16.mxu1 %v21173_v33 }
 0x6b8   : > { %12772 = vmatprep.mubr.msk.f32.mxu0 %vm16909_vm0, %v21166_v28  ;;  %12807 = vmatprep.mubr.msk.f32.mxu1 %vm16909_vm0, %v21166_v28 }
 0x6ba   : > { %15465 = vmatpush3.bf16.msra.mxu0 %v21294_v44  ;;  %15489 = vmatpush3.bf16.msra.mxu1 %v21295_v32 }
 0x6bb   : > { %15466 = vmatprep.subr.bf16.mxu0 %v21173_v33  ;;  %15490 = vmatprep.subr.bf16.mxu1 %v21173_v33 }
 0x6be   : > { %15468 = vmatpush3.bf16.msra.mxu0 %v21296_v31  ;;  %15492 = vmatpush3.bf16.msra.mxu1 %v21297_v4  ;;  %v21302_v4 = vld [vmem:[#allocation120_spill] sm:$0xff]  ;;  %v21303_v31 = vld [vmem:[#allocation121_spill] sm:$0xff] }
 0x6bf   : > { %15469 = vmatprep.subr.bf16.mxu0 %v21173_v33  ;;  %15493 = vmatprep.subr.bf16.mxu1 %v21173_v33 }
 0x6c2   : > { %15471 = vmatpush3.bf16.msra.mxu0 %v21298_v5  ;;  %15495 = vmatpush3.bf16.msra.mxu1 %v21299_v24  ;;  %v21304_v24 = vld [vmem:[#allocation14_spill] sm:$0xff]  ;;  %v21305_v5 = vld [vmem:[#allocation12_spill] sm:$0xff] }
 0x6c3   : > { %15472 = vmatprep.subr.bf16.mxu0 %v21173_v33  ;;  %15496 = vmatprep.subr.bf16.mxu1 %v21173_v33 }
 0x6c6   : > { %15474 = vmatpush3.bf16.msra.mxu0 %v21300_v20  ;;  %15498 = vmatpush3.bf16.msra.mxu1 %v21301_v11 }
 0x6c7   : > { %15475 = vmatprep.subr.bf16.mxu0 %v21173_v33  ;;  %15499 = vmatprep.subr.bf16.mxu1 %v21173_v33 }
 0x6ca   : > { %15477 = vmatpush3.bf16.msra.mxu0 %v21302_v4  ;;  %15501 = vmatpush3.bf16.msra.mxu1 %v21303_v31 }
 0x6cb   : > { %15478 = vmatprep.subr.bf16.mxu0 %v21173_v33  ;;  %15502 = vmatprep.subr.bf16.mxu1 %v21173_v33 }
 0x6ce   : > { %15480 = vmatpush3.bf16.msra.mxu0 %v21304_v24  ;;  %15504 = vmatpush3.bf16.msra.mxu1 %v21305_v5 }
 0x6cf   : > { %15481 = vmatprep.subr.bf16.mxu0 %v21173_v33  ;;  %15505 = vmatprep.subr.bf16.mxu1 %v21173_v33 }
 0x6d2   : > { %15483 = vmatpush3.bf16.msra.mxu0 %v21200_v50  ;;  %15507 = vmatpush3.bf16.msra.mxu1 %v21201_v9 }
 0x6d3   : > { %15508 = vmatprep.subr.bf16.mxu0 %v21173_v33  ;;  %15532 = vmatprep.subr.bf16.mxu1 %v21173_v33 }
 0x728   : > { %v5558_v31 = vpop.f32.mrb[112].mxu0  ;;  %v5628_v4 = vpop.f32.mrb[112].mxu1 }
 0x729   : > { %v6052_v11 = vsub.f32 %v19661_v48, %v5558_v31  ;;  %v6053_v24 = vsub.f32 %v19664_v62, %v5628_v4  ;;  %v12494_v20 = vpop.f32.mrb[113].mxu0  ;;  %v12529_v5 = vpop.f32.mrb[113].mxu1 }
 0x72b   : > { %v19845_v32 = vadd.f32 %v6052_v11, %v18848_v37  ;;  %v19848_v44 = vadd.f32 %v6053_v24, %v18850_v45 }
 0x72d   : > { %12773 = vmatmul.mubr.f32.vlgmr.msra.gmra.mrb[120].mxu0 %v19845_v32  ;;  %12808 = vmatmul.mubr.f32.vlgmr.msra.gmra.mrb[120].mxu1 %v19848_v44 }
 0x72e   : > { %15510 = vmatpush3.bf16.msra.mxu0 %v18615_v10  ;;  %15534 = vmatpush3.bf16.msra.mxu1 %v18617_v8 }
 0x72f   : > { %15511 = vmatprep.subr.bf16.mxu0 %v21173_v33  ;;  %15535 = vmatprep.subr.bf16.mxu1 %v21173_v33 }
 0x730   : > { %12842 = vmatprep.mubr.msk.f32.mxu0 %vm16909_vm0, %v21166_v28  ;;  %12877 = vmatprep.mubr.msk.f32.mxu1 %vm16909_vm0, %v21166_v28 }
 0x732   : > { %15513 = vmatpush3.bf16.msra.mxu0 %v18623_v34  ;;  %15537 = vmatpush3.bf16.msra.mxu1 %v18625_v58 }
 0x733   : > { %15514 = vmatprep.subr.bf16.mxu0 %v21173_v33  ;;  %15538 = vmatprep.subr.bf16.mxu1 %v21173_v33 }
 0x736   : > { %15516 = vmatpush3.bf16.msra.mxu0 %v18637_v22  ;;  %15540 = vmatpush3.bf16.msra.mxu1 %v18639_v56 }
 0x737   : > { %15517 = vmatprep.subr.bf16.mxu0 %v21173_v33  ;;  %15541 = vmatprep.subr.bf16.mxu1 %v21173_v33 }
 0x73a   : > { %15519 = vmatpush3.bf16.msra.mxu0 %v18647_v39  ;;  %15543 = vmatpush3.bf16.msra.mxu1 %v18649_v27 }
 0x73b   : > { %15520 = vmatprep.subr.bf16.mxu0 %v21173_v33  ;;  %15544 = vmatprep.subr.bf16.mxu1 %v21173_v33 }
 0x73e   : > { %15522 = vmatpush3.bf16.msra.mxu0 %v18659_v18  ;;  %15546 = vmatpush3.bf16.msra.mxu1 %v18661_v38 }
 0x73f   : > { %15523 = vmatprep.subr.bf16.mxu0 %v21173_v33  ;;  %15547 = vmatprep.subr.bf16.mxu1 %v21173_v33 }
 0x742   : > { %15525 = vmatpush3.bf16.msra.mxu0 %v18667_v63  ;;  %15549 = vmatpush3.bf16.msra.mxu1 %v18669_v15 }
 0x743   : > { %15526 = vmatprep.subr.bf16.mxu0 %v21173_v33  ;;  %15550 = vmatprep.subr.bf16.mxu1 %v21173_v33 }
 0x746   : > { %15528 = vmatpush3.bf16.msra.mxu0 %v18675_v7  ;;  %15552 = vmatpush3.bf16.msra.mxu1 %v18677_v25 }
 0x747   : > { %15529 = vmatprep.subr.bf16.mxu0 %v21173_v33  ;;  %15553 = vmatprep.subr.bf16.mxu1 %v21173_v33 }
 0x748   : > { %v5698_v62 = vpop.f32.mrb[114].mxu0  ;;  %v5768_v48 = vpop.f32.mrb[114].mxu1 }
 0x749   : > { %v6054_v31 = vsub.f32 %v19705_v12, %v5698_v62  ;;  %v6055_v4 = vsub.f32 %v19708_v51, %v5768_v48  ;;  %v12564_v5 = vpop.f32.mrb[115].mxu0  ;;  %v12599_v24 = vpop.f32.mrb[115].mxu1  ;;  %v21306_v12 = vld [vmem:[#allocation18_spill] sm:$0xff]  ;;  %v21307_v51 = vld [vmem:[#allocation16_spill] sm:$0xff]  ;;  %v21308_v62 = vld [vmem:[#allocation19_spill] sm:$0xff] }
 0x74a   : > { %15531 = vmatpush3.bf16.msra.mxu0 %v18683_v61  ;;  %15555 = vmatpush3.bf16.msra.mxu1 %v18685_v26  ;;  %v21309_v48 = vld [vmem:[#allocation17_spill] sm:$0xff]  ;;  %v21312_v5 = vld [vmem:[#allocation23_spill] sm:$0xff] }
 0x74b   : > { %v19889_v20 = vadd.f32 %v6054_v31, %v18898_v3  ;;  %v19892_v11 = vadd.f32 %v6055_v4, %v18900_v35  ;;  %15556 = vmatprep.subr.bf16.mxu0 %v21173_v33  ;;  %15580 = vmatprep.subr.bf16.mxu1 %v21173_v33  ;;  %v21310_v31 = vld [vmem:[#allocation22_spill] sm:$0xff]  ;;  %v21311_v4 = vld [vmem:[#allocation20_spill] sm:$0xff]  ;;  %v21313_v24 = vld [vmem:[#allocation21_spill] sm:$0xff] }
 0x74d   : > { %12843 = vmatmul.mubr.f32.vlgmr.msra.gmra.mrb[122].mxu0 %v19889_v20  ;;  %12878 = vmatmul.mubr.f32.vlgmr.msra.gmra.mrb[122].mxu1 %v19892_v11 }
 0x74e   : > { %15558 = vmatpush3.bf16.msra.mxu0 %v18691_v29  ;;  %15582 = vmatpush3.bf16.msra.mxu1 %v18693_v54 }
 0x74f   : > { %15559 = vmatprep.subr.bf16.mxu0 %v21173_v33  ;;  %15583 = vmatprep.subr.bf16.mxu1 %v21173_v33 }
 0x750   : > { %12912 = vmatprep.mubr.msk.f32.mxu0 %vm16909_vm0, %v21166_v28  ;;  %12947 = vmatprep.mubr.msk.f32.mxu1 %vm16909_vm0, %v21166_v28 }
 0x752   : > { %15561 = vmatpush3.bf16.msra.mxu0 %v18699_v13  ;;  %15585 = vmatpush3.bf16.msra.mxu1 %v18701_v23 }
 0x753   : > { %15562 = vmatprep.subr.bf16.mxu0 %v21173_v33  ;;  %15586 = vmatprep.subr.bf16.mxu1 %v21173_v33 }
 0x756   : > { %15564 = vmatpush3.bf16.msra.mxu0 %v18715_v52  ;;  %15588 = vmatpush3.bf16.msra.mxu1 %v18717_v36 }
 0x757   : > { %15565 = vmatprep.subr.bf16.mxu0 %v21173_v33  ;;  %15589 = vmatprep.subr.bf16.mxu1 %v21173_v33 }
 0x75a   : > { %15567 = vmatpush3.bf16.msra.mxu0 %v21306_v12  ;;  %15591 = vmatpush3.bf16.msra.mxu1 %v21307_v51 }
 0x75b   : > { %15568 = vmatprep.subr.bf16.mxu0 %v21173_v33  ;;  %15592 = vmatprep.subr.bf16.mxu1 %v21173_v33 }
 0x75e   : > { %15570 = vmatpush3.bf16.msra.mxu0 %v21308_v62  ;;  %15594 = vmatpush3.bf16.msra.mxu1 %v21309_v48 }
 0x75f   : > { %15571 = vmatprep.subr.bf16.mxu0 %v21173_v33  ;;  %15595 = vmatprep.subr.bf16.mxu1 %v21173_v33 }
 0x762   : > { %15573 = vmatpush3.bf16.msra.mxu0 %v21310_v31  ;;  %15597 = vmatpush3.bf16.msra.mxu1 %v21311_v4 }
 0x763   : > { %15574 = vmatprep.subr.bf16.mxu0 %v21173_v33  ;;  %15598 = vmatprep.subr.bf16.mxu1 %v21173_v33 }
 0x766   : > { %15576 = vmatpush3.bf16.msra.mxu0 %v21312_v5  ;;  %15600 = vmatpush3.bf16.msra.mxu1 %v21313_v24 }
 0x767   : > { %15577 = vmatprep.subr.bf16.mxu0 %v21173_v33  ;;  %15601 = vmatprep.subr.bf16.mxu1 %v21173_v33 }
 0x768   : > { %v5838_v48 = vpop.f32.mrb[116].mxu0  ;;  %v5908_v62 = vpop.f32.mrb[116].mxu1 }
 0x769   : > { %v6056_v51 = vsub.f32 %v19751_v59, %v5838_v48  ;;  %v6057_v31 = vsub.f32 %v19754_v6, %v5908_v62  ;;  %v12634_v12 = vpop.f32.mrb[117].mxu0  ;;  %v12669_v4 = vpop.f32.mrb[117].mxu1  ;;  %v21314_v59 = vld [vmem:[#allocation43_spill] sm:$0xff]  ;;  %v21315_v6 = vld [vmem:[#allocation38_spill] sm:$0xff] }
 0x76a   : > { %15579 = vmatpush3.bf16.msra.mxu0 %v21182_v2  ;;  %15603 = vmatpush3.bf16.msra.mxu1 %v21183_v21  ;;  %v21316_v12 = vld [vmem:[#allocation42_spill] sm:$0xff] }
 0x76b   : > { %v19935_v5 = vadd.f32 %v6056_v51, %v18914_v0  ;;  %v19938_v24 = vadd.f32 %v6057_v31, %v18916_v14  ;;  %15604 = vmatprep.subr.bf16.mxu0 %v21173_v33  ;;  %15628 = vmatprep.subr.bf16.mxu1 %v21173_v33  ;;  %v21317_v51 = vld [vmem:[#allocation40_spill] sm:$0xff]  ;;  %v21318_v62 = vld [vmem:[#allocation50_spill] sm:$0xff] }
 0x76c   : > { %v21319_v48 = vld [vmem:[#allocation46_spill] sm:$0xff] }
 0x76d   : > { %12913 = vmatmul.mubr.f32.vlgmr.msra.gmra.mrb[124].mxu0 %v19935_v5  ;;  %12948 = vmatmul.mubr.f32.vlgmr.msra.gmra.mrb[124].mxu1 %v19938_v24 }
 0x76e   : > { %15606 = vmatpush3.bf16.msra.mxu0 %v21184_v19  ;;  %15630 = vmatpush3.bf16.msra.mxu1 %v21185_v41 }
 0x76f   : > { %15607 = vmatprep.subr.bf16.mxu0 %v21173_v33  ;;  %15631 = vmatprep.subr.bf16.mxu1 %v21173_v33 }
 0x770   : > { %12982 = vmatprep.mubr.msk.f32.mxu0 %vm16909_vm0, %v21166_v28  ;;  %13017 = vmatprep.mubr.msk.f32.mxu1 %vm16909_vm0, %v21166_v28 }
 0x772   : > { %15609 = vmatpush3.bf16.msra.mxu0 %v21186_v47  ;;  %15633 = vmatpush3.bf16.msra.mxu1 %v21187_v53 }
 0x773   : > { %15610 = vmatprep.subr.bf16.mxu0 %v21173_v33  ;;  %15634 = vmatprep.subr.bf16.mxu1 %v21173_v33 }
 0x776   : > { %15612 = vmatpush3.bf16.msra.mxu0 %v21188_v17  ;;  %15636 = vmatpush3.bf16.msra.mxu1 %v21189_v43 }
 0x777   : > { %15613 = vmatprep.subr.bf16.mxu0 %v21173_v33  ;;  %15637 = vmatprep.subr.bf16.mxu1 %v21173_v33 }
 0x77a   : > { %15615 = vmatpush3.bf16.msra.mxu0 %v18804_v1  ;;  %15639 = vmatpush3.bf16.msra.mxu1 %v18806_v57 }
 0x77b   : > { %15616 = vmatprep.subr.bf16.mxu0 %v21173_v33  ;;  %15640 = vmatprep.subr.bf16.mxu1 %v21173_v33 }
 0x77e   : > { %15618 = vmatpush3.bf16.msra.mxu0 %v21314_v59  ;;  %15642 = vmatpush3.bf16.msra.mxu1 %v21315_v6 }
 0x77f   : > { %15619 = vmatprep.subr.bf16.mxu0 %v21173_v33  ;;  %15643 = vmatprep.subr.bf16.mxu1 %v21173_v33 }
 0x782   : > { %15621 = vmatpush3.bf16.msra.mxu0 %v21316_v12  ;;  %15645 = vmatpush3.bf16.msra.mxu1 %v21317_v51 }
 0x783   : > { %15622 = vmatprep.subr.bf16.mxu0 %v21173_v33  ;;  %15646 = vmatprep.subr.bf16.mxu1 %v21173_v33 }
 0x786   : > { %15624 = vmatpush3.bf16.msra.mxu0 %v21318_v62  ;;  %15648 = vmatpush3.bf16.msra.mxu1 %v21319_v48 }
 0x787   : > { %15625 = vmatprep.subr.bf16.mxu0 %v21173_v33  ;;  %15649 = vmatprep.subr.bf16.mxu1 %v21173_v33 }
 0x788   : > { %v5978_v31 = vpop.f32.mrb[118].mxu0  ;;  %v6048_v4 = vpop.f32.mrb[118].mxu1 }
 0x789   : > { %v6058_v6 = vsub.f32 %v19797_v46, %v5978_v31  ;;  %v6059_v12 = vsub.f32 %v19800_v42, %v6048_v4  ;;  %v12704_v59 = vpop.f32.mrb[119].mxu0  ;;  %v12739_v51 = vpop.f32.mrb[119].mxu1  ;;  %v21320_v46 = vld [vmem:[#allocation81_spill] sm:$0xff]  ;;  %v21321_v42 = vld [vmem:[#allocation84_spill] sm:$0xff]  ;;  %v21326_v31 = vld [vmem:[#allocation115_spill] sm:$0xff] }
 0x78a   : > { %15627 = vmatpush3.bf16.msra.mxu0 %v18840_v60  ;;  %15651 = vmatpush3.bf16.msra.mxu1 %v18842_v49  ;;  %v21322_v59 = vld [vmem:[#allocation103_spill] sm:$0xff]  ;;  %v21325_v51 = vld [vmem:[#allocation110_spill] sm:$0xff]  ;;  %v21327_v4 = vld [vmem:[#allocation116_spill] sm:$0xff] }
 0x78b   : > { %v19981_v62 = vadd.f32 %v6058_v6, %v18918_v16  ;;  %v19984_v48 = vadd.f32 %v6059_v12, %v18920_v40  ;;  %15652 = vmatprep.subr.bf16.mxu0 %v21173_v33  ;;  %15676 = vmatprep.subr.bf16.mxu1 %v21173_v33  ;;  %v21323_v6 = vld [vmem:[#allocation104_spill] sm:$0xff]  ;;  %v21324_v12 = vld [vmem:[#allocation109_spill] sm:$0xff] }
 0x78d   : > { %12983 = vmatmul.mubr.f32.vlgmr.msra.gmra.mrb[126].mxu0 %v19981_v62  ;;  %13018 = vmatmul.mubr.f32.vlgmr.msra.gmra.mrb[126].mxu1 %v19984_v48 }
 0x78e   : > { %15654 = vmatpush3.bf16.msra.mxu0 %v18481_v30  ;;  %15678 = vmatpush3.bf16.msra.mxu1 %v18483_v55 }
 0x78f   : > { %15655 = vmatprep.subr.bf16.mxu0 %v21173_v33  ;;  %15679 = vmatprep.subr.bf16.mxu1 %v21173_v33 }
 0x790   : > { %13052 = vmatprep.mubr.msk.f32.mxu0 %vm16909_vm0, %v21166_v28  ;;  %13087 = vmatprep.mubr.msk.f32.mxu1 %vm16909_vm0, %v21166_v28 }
 0x792   : > { %15657 = vmatpush3.bf16.msra.mxu0 %v21320_v46  ;;  %15681 = vmatpush3.bf16.msra.mxu1 %v21321_v42 }
 0x793   : > { %15658 = vmatprep.subr.bf16.mxu0 %v21173_v33  ;;  %15682 = vmatprep.subr.bf16.mxu1 %v21173_v33 }
 0x796   : > { %15660 = vmatpush3.bf16.msra.mxu0 %v21322_v59  ;;  %15684 = vmatpush3.bf16.msra.mxu1 %v21323_v6  ;;  %v21328_v6 = vld [vmem:[#allocation120_spill] sm:$0xff]  ;;  %v21329_v59 = vld [vmem:[#allocation121_spill] sm:$0xff] }
 0x797   : > { %15661 = vmatprep.subr.bf16.mxu0 %v21173_v33  ;;  %15685 = vmatprep.subr.bf16.mxu1 %v21173_v33 }
 0x79a   : > { %15663 = vmatpush3.bf16.msra.mxu0 %v21324_v12  ;;  %15687 = vmatpush3.bf16.msra.mxu1 %v21325_v51  ;;  %v21330_v51 = vld [vmem:[#allocation14_spill] sm:$0xff]  ;;  %v21331_v12 = vld [vmem:[#allocation12_spill] sm:$0xff] }
 0x79b   : > { %15664 = vmatprep.subr.bf16.mxu0 %v21173_v33  ;;  %15688 = vmatprep.subr.bf16.mxu1 %v21173_v33 }
 0x79e   : > { %15666 = vmatpush3.bf16.msra.mxu0 %v21326_v31  ;;  %15690 = vmatpush3.bf16.msra.mxu1 %v21327_v4 }
 0x79f   : > { %15667 = vmatprep.subr.bf16.mxu0 %v21173_v33  ;;  %15691 = vmatprep.subr.bf16.mxu1 %v21173_v33 }
 0x7a2   : > { %15669 = vmatpush3.bf16.msra.mxu0 %v21328_v6  ;;  %15693 = vmatpush3.bf16.msra.mxu1 %v21329_v59 }
 0x7a3   : > { %15670 = vmatprep.subr.bf16.mxu0 %v21173_v33  ;;  %15694 = vmatprep.subr.bf16.mxu1 %v21173_v33 }
 0x7a6   : > { %15672 = vmatpush3.bf16.msra.mxu0 %v21330_v51  ;;  %15696 = vmatpush3.bf16.msra.mxu1 %v21331_v12 }
 0x7a7   : > { %15673 = vmatprep.subr.bf16.mxu0 %v21173_v33  ;;  %15697 = vmatprep.subr.bf16.mxu1 %v21173_v33 }
 0x7aa   : > { %15675 = vmatpush3.bf16.msra.mxu0 %v21200_v50  ;;  %15699 = vmatpush3.bf16.msra.mxu1 %v21201_v9 }
 0x7ab   : > { %15700 = vmatprep.subr.bf16.mxu0 %v21173_v33  ;;  %15724 = vmatprep.subr.bf16.mxu1 %v21173_v33 }
 0x800   : > { %v6134_v59 = vpop.f32.mrb[120].mxu0  ;;  %v6204_v6 = vpop.f32.mrb[120].mxu1 }
 0x801   : > { %v6628_v4 = vsub.f32 %v19845_v32, %v6134_v59  ;;  %v6629_v51 = vsub.f32 %v19848_v44, %v6204_v6  ;;  %v12774_v31 = vpop.f32.mrb[121].mxu0  ;;  %v12809_v12 = vpop.f32.mrb[121].mxu1 }
 0x803   : > { %v20029_v42 = vadd.f32 %v6628_v4, %v18848_v37  ;;  %v20032_v46 = vadd.f32 %v6629_v51, %v18850_v45 }
 0x805   : > { %13053 = vmatmul.mubr.f32.vlgmr.msra.gmra.mrb[128].mxu0 %v20029_v42  ;;  %13088 = vmatmul.mubr.f32.vlgmr.msra.gmra.mrb[128].mxu1 %v20032_v46 }
 0x806   : > { %15702 = vmatpush3.bf16.msra.mxu0 %v18615_v10  ;;  %15726 = vmatpush3.bf16.msra.mxu1 %v18617_v8 }
 0x807   : > { %15703 = vmatprep.subr.bf16.mxu0 %v21173_v33  ;;  %15727 = vmatprep.subr.bf16.mxu1 %v21173_v33 }
 0x808   : > { %13122 = vmatprep.mubr.msk.f32.mxu0 %vm16909_vm0, %v21166_v28  ;;  %13157 = vmatprep.mubr.msk.f32.mxu1 %vm16909_vm0, %v21166_v28 }
 0x80a   : > { %15705 = vmatpush3.bf16.msra.mxu0 %v18623_v34  ;;  %15729 = vmatpush3.bf16.msra.mxu1 %v18625_v58 }
 0x80b   : > { %15706 = vmatprep.subr.bf16.mxu0 %v21173_v33  ;;  %15730 = vmatprep.subr.bf16.mxu1 %v21173_v33 }
 0x80e   : > { %15708 = vmatpush3.bf16.msra.mxu0 %v18637_v22  ;;  %15732 = vmatpush3.bf16.msra.mxu1 %v18639_v56 }
 0x80f   : > { %15709 = vmatprep.subr.bf16.mxu0 %v21173_v33  ;;  %15733 = vmatprep.subr.bf16.mxu1 %v21173_v33 }
 0x812   : > { %15711 = vmatpush3.bf16.msra.mxu0 %v18647_v39  ;;  %15735 = vmatpush3.bf16.msra.mxu1 %v18649_v27 }
 0x813   : > { %15712 = vmatprep.subr.bf16.mxu0 %v21173_v33  ;;  %15736 = vmatprep.subr.bf16.mxu1 %v21173_v33 }
 0x816   : > { %15714 = vmatpush3.bf16.msra.mxu0 %v18659_v18  ;;  %15738 = vmatpush3.bf16.msra.mxu1 %v18661_v38 }
 0x817   : > { %15715 = vmatprep.subr.bf16.mxu0 %v21173_v33  ;;  %15739 = vmatprep.subr.bf16.mxu1 %v21173_v33 }
 0x81a   : > { %15717 = vmatpush3.bf16.msra.mxu0 %v18667_v63  ;;  %15741 = vmatpush3.bf16.msra.mxu1 %v18669_v15 }
 0x81b   : > { %15718 = vmatprep.subr.bf16.mxu0 %v21173_v33  ;;  %15742 = vmatprep.subr.bf16.mxu1 %v21173_v33 }
 0x81e   : > { %15720 = vmatpush3.bf16.msra.mxu0 %v18675_v7  ;;  %15744 = vmatpush3.bf16.msra.mxu1 %v18677_v25 }
 0x81f   : > { %15721 = vmatprep.subr.bf16.mxu0 %v21173_v33  ;;  %15745 = vmatprep.subr.bf16.mxu1 %v21173_v33 }
 0x820   : > { %v6274_v44 = vpop.f32.mrb[122].mxu0  ;;  %v6344_v32 = vpop.f32.mrb[122].mxu1 }
 0x821   : > { %v6630_v59 = vsub.f32 %v19889_v20, %v6274_v44  ;;  %v6631_v6 = vsub.f32 %v19892_v11, %v6344_v32  ;;  %v12844_v12 = vpop.f32.mrb[123].mxu0  ;;  %v12879_v51 = vpop.f32.mrb[123].mxu1  ;;  %v21332_v20 = vld [vmem:[#allocation18_spill] sm:$0xff]  ;;  %v21333_v11 = vld [vmem:[#allocation16_spill] sm:$0xff]  ;;  %v21334_v44 = vld [vmem:[#allocation19_spill] sm:$0xff] }
 0x822   : > { %15723 = vmatpush3.bf16.msra.mxu0 %v18683_v61  ;;  %15747 = vmatpush3.bf16.msra.mxu1 %v18685_v26  ;;  %v21335_v32 = vld [vmem:[#allocation17_spill] sm:$0xff]  ;;  %v21338_v12 = vld [vmem:[#allocation23_spill] sm:$0xff] }
 0x823   : > { %v20073_v31 = vadd.f32 %v6630_v59, %v18898_v3  ;;  %v20076_v4 = vadd.f32 %v6631_v6, %v18900_v35  ;;  %15748 = vmatprep.subr.bf16.mxu0 %v21173_v33  ;;  %15772 = vmatprep.subr.bf16.mxu1 %v21173_v33  ;;  %v21336_v59 = vld [vmem:[#allocation22_spill] sm:$0xff]  ;;  %v21337_v6 = vld [vmem:[#allocation20_spill] sm:$0xff]  ;;  %v21339_v51 = vld [vmem:[#allocation21_spill] sm:$0xff] }
 0x825   : > { %13123 = vmatmul.mubr.f32.vlgmr.msra.gmra.mrb[130].mxu0 %v20073_v31  ;;  %13158 = vmatmul.mubr.f32.vlgmr.msra.gmra.mrb[130].mxu1 %v20076_v4 }
 0x826   : > { %15750 = vmatpush3.bf16.msra.mxu0 %v18691_v29  ;;  %15774 = vmatpush3.bf16.msra.mxu1 %v18693_v54 }
 0x827   : > { %15751 = vmatprep.subr.bf16.mxu0 %v21173_v33  ;;  %15775 = vmatprep.subr.bf16.mxu1 %v21173_v33 }
 0x828   : > { %13192 = vmatprep.mubr.msk.f32.mxu0 %vm16909_vm0, %v21166_v28  ;;  %13227 = vmatprep.mubr.msk.f32.mxu1 %vm16909_vm0, %v21166_v28 }
 0x82a   : > { %15753 = vmatpush3.bf16.msra.mxu0 %v18699_v13  ;;  %15777 = vmatpush3.bf16.msra.mxu1 %v18701_v23 }
 0x82b   : > { %15754 = vmatprep.subr.bf16.mxu0 %v21173_v33  ;;  %15778 = vmatprep.subr.bf16.mxu1 %v21173_v33 }
 0x82e   : > { %15756 = vmatpush3.bf16.msra.mxu0 %v18715_v52  ;;  %15780 = vmatpush3.bf16.msra.mxu1 %v18717_v36 }
 0x82f   : > { %15757 = vmatprep.subr.bf16.mxu0 %v21173_v33  ;;  %15781 = vmatprep.subr.bf16.mxu1 %v21173_v33 }
 0x832   : > { %15759 = vmatpush3.bf16.msra.mxu0 %v21332_v20  ;;  %15783 = vmatpush3.bf16.msra.mxu1 %v21333_v11 }
 0x833   : > { %15760 = vmatprep.subr.bf16.mxu0 %v21173_v33  ;;  %15784 = vmatprep.subr.bf16.mxu1 %v21173_v33 }
 0x836   : > { %15762 = vmatpush3.bf16.msra.mxu0 %v21334_v44  ;;  %15786 = vmatpush3.bf16.msra.mxu1 %v21335_v32 }
 0x837   : > { %15763 = vmatprep.subr.bf16.mxu0 %v21173_v33  ;;  %15787 = vmatprep.subr.bf16.mxu1 %v21173_v33 }
 0x83a   : > { %15765 = vmatpush3.bf16.msra.mxu0 %v21336_v59  ;;  %15789 = vmatpush3.bf16.msra.mxu1 %v21337_v6 }
 0x83b   : > { %15766 = vmatprep.subr.bf16.mxu0 %v21173_v33  ;;  %15790 = vmatprep.subr.bf16.mxu1 %v21173_v33 }
 0x83e   : > { %15768 = vmatpush3.bf16.msra.mxu0 %v21338_v12  ;;  %15792 = vmatpush3.bf16.msra.mxu1 %v21339_v51 }
 0x83f   : > { %15769 = vmatprep.subr.bf16.mxu0 %v21173_v33  ;;  %15793 = vmatprep.subr.bf16.mxu1 %v21173_v33 }
 0x840   : > { %v6414_v32 = vpop.f32.mrb[124].mxu0  ;;  %v6484_v44 = vpop.f32.mrb[124].mxu1 }
 0x841   : > { %v6632_v11 = vsub.f32 %v19935_v5, %v6414_v32  ;;  %v6633_v59 = vsub.f32 %v19938_v24, %v6484_v44  ;;  %v12914_v20 = vpop.f32.mrb[125].mxu0  ;;  %v12949_v6 = vpop.f32.mrb[125].mxu1  ;;  %v21340_v5 = vld [vmem:[#allocation43_spill] sm:$0xff]  ;;  %v21341_v24 = vld [vmem:[#allocation38_spill] sm:$0xff] }
 0x842   : > { %15771 = vmatpush3.bf16.msra.mxu0 %v21182_v2  ;;  %15795 = vmatpush3.bf16.msra.mxu1 %v21183_v21  ;;  %v21342_v20 = vld [vmem:[#allocation42_spill] sm:$0xff] }
 0x843   : > { %v20119_v12 = vadd.f32 %v6632_v11, %v18914_v0  ;;  %v20122_v51 = vadd.f32 %v6633_v59, %v18916_v14  ;;  %15796 = vmatprep.subr.bf16.mxu0 %v21173_v33  ;;  %15820 = vmatprep.subr.bf16.mxu1 %v21173_v33  ;;  %v21343_v11 = vld [vmem:[#allocation40_spill] sm:$0xff]  ;;  %v21344_v44 = vld [vmem:[#allocation50_spill] sm:$0xff] }
 0x844   : > { %v21345_v32 = vld [vmem:[#allocation46_spill] sm:$0xff] }
 0x845   : > { %13193 = vmatmul.mubr.f32.vlgmr.msra.gmra.mrb[132].mxu0 %v20119_v12  ;;  %13228 = vmatmul.mubr.f32.vlgmr.msra.gmra.mrb[132].mxu1 %v20122_v51 }
 0x846   : > { %15798 = vmatpush3.bf16.msra.mxu0 %v21184_v19  ;;  %15822 = vmatpush3.bf16.msra.mxu1 %v21185_v41 }
 0x847   : > { %15799 = vmatprep.subr.bf16.mxu0 %v21173_v33  ;;  %15823 = vmatprep.subr.bf16.mxu1 %v21173_v33 }
 0x848   : > { %13262 = vmatprep.mubr.msk.f32.mxu0 %vm16909_vm0, %v21166_v28  ;;  %13297 = vmatprep.mubr.msk.f32.mxu1 %vm16909_vm0, %v21166_v28 }
 0x84a   : > { %15801 = vmatpush3.bf16.msra.mxu0 %v21186_v47  ;;  %15825 = vmatpush3.bf16.msra.mxu1 %v21187_v53 }
 0x84b   : > { %15802 = vmatprep.subr.bf16.mxu0 %v21173_v33  ;;  %15826 = vmatprep.subr.bf16.mxu1 %v21173_v33 }
 0x84e   : > { %15804 = vmatpush3.bf16.msra.mxu0 %v21188_v17  ;;  %15828 = vmatpush3.bf16.msra.mxu1 %v21189_v43 }
 0x84f   : > { %15805 = vmatprep.subr.bf16.mxu0 %v21173_v33  ;;  %15829 = vmatprep.subr.bf16.mxu1 %v21173_v33 }
 0x852   : > { %15807 = vmatpush3.bf16.msra.mxu0 %v18804_v1  ;;  %15831 = vmatpush3.bf16.msra.mxu1 %v18806_v57 }
 0x853   : > { %15808 = vmatprep.subr.bf16.mxu0 %v21173_v33  ;;  %15832 = vmatprep.subr.bf16.mxu1 %v21173_v33 }
 0x856   : > { %15810 = vmatpush3.bf16.msra.mxu0 %v21340_v5  ;;  %15834 = vmatpush3.bf16.msra.mxu1 %v21341_v24 }
 0x857   : > { %15811 = vmatprep.subr.bf16.mxu0 %v21173_v33  ;;  %15835 = vmatprep.subr.bf16.mxu1 %v21173_v33 }
 0x85a   : > { %15813 = vmatpush3.bf16.msra.mxu0 %v21342_v20  ;;  %15837 = vmatpush3.bf16.msra.mxu1 %v21343_v11 }
 0x85b   : > { %15814 = vmatprep.subr.bf16.mxu0 %v21173_v33  ;;  %15838 = vmatprep.subr.bf16.mxu1 %v21173_v33 }
 0x85e   : > { %15816 = vmatpush3.bf16.msra.mxu0 %v21344_v44  ;;  %15840 = vmatpush3.bf16.msra.mxu1 %v21345_v32 }
 0x85f   : > { %15817 = vmatprep.subr.bf16.mxu0 %v21173_v33  ;;  %15841 = vmatprep.subr.bf16.mxu1 %v21173_v33 }
 0x860   : > { %v6554_v59 = vpop.f32.mrb[126].mxu0  ;;  %v6624_v6 = vpop.f32.mrb[126].mxu1 }
 0x861   : > { %v6634_v24 = vsub.f32 %v19981_v62, %v6554_v59  ;;  %v6635_v20 = vsub.f32 %v19984_v48, %v6624_v6  ;;  %v12984_v5 = vpop.f32.mrb[127].mxu0  ;;  %v13019_v11 = vpop.f32.mrb[127].mxu1  ;;  %v21346_v62 = vld [vmem:[#allocation81_spill] sm:$0xff]  ;;  %v21347_v48 = vld [vmem:[#allocation84_spill] sm:$0xff]  ;;  %v21352_v59 = vld [vmem:[#allocation115_spill] sm:$0xff] }
 0x862   : > { %15819 = vmatpush3.bf16.msra.mxu0 %v18840_v60  ;;  %15843 = vmatpush3.bf16.msra.mxu1 %v18842_v49  ;;  %v21348_v5 = vld [vmem:[#allocation103_spill] sm:$0xff]  ;;  %v21351_v11 = vld [vmem:[#allocation110_spill] sm:$0xff]  ;;  %v21353_v6 = vld [vmem:[#allocation116_spill] sm:$0xff] }
 0x863   : > { %v20165_v44 = vadd.f32 %v6634_v24, %v18918_v16  ;;  %v20168_v32 = vadd.f32 %v6635_v20, %v18920_v40  ;;  %15844 = vmatprep.subr.bf16.mxu0 %v21173_v33  ;;  %15868 = vmatprep.subr.bf16.mxu1 %v21173_v33  ;;  %v21349_v24 = vld [vmem:[#allocation104_spill] sm:$0xff]  ;;  %v21350_v20 = vld [vmem:[#allocation109_spill] sm:$0xff] }
 0x865   : > { %13263 = vmatmul.mubr.f32.vlgmr.msra.gmra.mrb[134].mxu0 %v20165_v44  ;;  %13298 = vmatmul.mubr.f32.vlgmr.msra.gmra.mrb[134].mxu1 %v20168_v32 }
 0x866   : > { %15846 = vmatpush3.bf16.msra.mxu0 %v18481_v30  ;;  %15870 = vmatpush3.bf16.msra.mxu1 %v18483_v55 }
 0x867   : > { %15847 = vmatprep.subr.bf16.mxu0 %v21173_v33  ;;  %15871 = vmatprep.subr.bf16.mxu1 %v21173_v33 }
 0x868   : > { %13332 = vmatprep.mubr.msk.f32.mxu0 %vm16909_vm0, %v21166_v28  ;;  %13367 = vmatprep.mubr.msk.f32.mxu1 %vm16909_vm0, %v21166_v28 }
 0x86a   : > { %15849 = vmatpush3.bf16.msra.mxu0 %v21346_v62  ;;  %15873 = vmatpush3.bf16.msra.mxu1 %v21347_v48 }
 0x86b   : > { %15850 = vmatprep.subr.bf16.mxu0 %v21173_v33  ;;  %15874 = vmatprep.subr.bf16.mxu1 %v21173_v33 }
 0x86e   : > { %15852 = vmatpush3.bf16.msra.mxu0 %v21348_v5  ;;  %15876 = vmatpush3.bf16.msra.mxu1 %v21349_v24  ;;  %v21354_v24 = vld [vmem:[#allocation120_spill] sm:$0xff]  ;;  %v21355_v5 = vld [vmem:[#allocation121_spill] sm:$0xff] }
 0x86f   : > { %15853 = vmatprep.subr.bf16.mxu0 %v21173_v33  ;;  %15877 = vmatprep.subr.bf16.mxu1 %v21173_v33 }
 0x872   : > { %15855 = vmatpush3.bf16.msra.mxu0 %v21350_v20  ;;  %15879 = vmatpush3.bf16.msra.mxu1 %v21351_v11  ;;  %v21356_v11 = vld [vmem:[#allocation14_spill] sm:$0xff]  ;;  %v21357_v20 = vld [vmem:[#allocation12_spill] sm:$0xff] }
 0x873   : > { %15856 = vmatprep.subr.bf16.mxu0 %v21173_v33  ;;  %15880 = vmatprep.subr.bf16.mxu1 %v21173_v33 }
 0x876   : > { %15858 = vmatpush3.bf16.msra.mxu0 %v21352_v59  ;;  %15882 = vmatpush3.bf16.msra.mxu1 %v21353_v6 }
 0x877   : > { %15859 = vmatprep.subr.bf16.mxu0 %v21173_v33  ;;  %15883 = vmatprep.subr.bf16.mxu1 %v21173_v33 }
 0x87a   : > { %15861 = vmatpush3.bf16.msra.mxu0 %v21354_v24  ;;  %15885 = vmatpush3.bf16.msra.mxu1 %v21355_v5 }
 0x87b   : > { %15862 = vmatprep.subr.bf16.mxu0 %v21173_v33  ;;  %15886 = vmatprep.subr.bf16.mxu1 %v21173_v33 }
 0x87e   : > { %15864 = vmatpush3.bf16.msra.mxu0 %v21356_v11  ;;  %15888 = vmatpush3.bf16.msra.mxu1 %v21357_v20 }
 0x87f   : > { %15865 = vmatprep.subr.bf16.mxu0 %v21173_v33  ;;  %15889 = vmatprep.subr.bf16.mxu1 %v21173_v33 }
 0x882   : > { %15867 = vmatpush3.bf16.msra.mxu0 %v21200_v50  ;;  %15891 = vmatpush3.bf16.msra.mxu1 %v21201_v9 }
 0x883   : > { %15892 = vmatprep.subr.bf16.mxu0 %v21173_v33  ;;  %15916 = vmatprep.subr.bf16.mxu1 %v21173_v33 }
 0x8d8   : > { %v6710_v5 = vpop.f32.mrb[128].mxu0  ;;  %v6780_v24 = vpop.f32.mrb[128].mxu1 }
 0x8d9   : > { %v7204_v6 = vsub.f32 %v20029_v42, %v6710_v5  ;;  %v7205_v11 = vsub.f32 %v20032_v46, %v6780_v24  ;;  %v13054_v59 = vpop.f32.mrb[129].mxu0  ;;  %v13089_v20 = vpop.f32.mrb[129].mxu1 }
 0x8db   : > { %v20213_v48 = vadd.f32 %v7204_v6, %v18848_v37  ;;  %v20216_v62 = vadd.f32 %v7205_v11, %v18850_v45 }
 0x8dd   : > { %13333 = vmatmul.mubr.f32.vlgmr.msra.gmra.mrb[136].mxu0 %v20213_v48  ;;  %13368 = vmatmul.mubr.f32.vlgmr.msra.gmra.mrb[136].mxu1 %v20216_v62 }
 0x8de   : > { %15894 = vmatpush3.bf16.msra.mxu0 %v18615_v10  ;;  %15918 = vmatpush3.bf16.msra.mxu1 %v18617_v8 }
 0x8df   : > { %15895 = vmatprep.subr.bf16.mxu0 %v21173_v33  ;;  %15919 = vmatprep.subr.bf16.mxu1 %v21173_v33 }
 0x8e0   : > { %13402 = vmatprep.mubr.msk.f32.mxu0 %vm16909_vm0, %v21166_v28  ;;  %13437 = vmatprep.mubr.msk.f32.mxu1 %vm16909_vm0, %v21166_v28 }
 0x8e2   : > { %15897 = vmatpush3.bf16.msra.mxu0 %v18623_v34  ;;  %15921 = vmatpush3.bf16.msra.mxu1 %v18625_v58 }
 0x8e3   : > { %15898 = vmatprep.subr.bf16.mxu0 %v21173_v33  ;;  %15922 = vmatprep.subr.bf16.mxu1 %v21173_v33 }
 0x8e6   : > { %15900 = vmatpush3.bf16.msra.mxu0 %v18637_v22  ;;  %15924 = vmatpush3.bf16.msra.mxu1 %v18639_v56 }
 0x8e7   : > { %15901 = vmatprep.subr.bf16.mxu0 %v21173_v33  ;;  %15925 = vmatprep.subr.bf16.mxu1 %v21173_v33 }
 0x8ea   : > { %15903 = vmatpush3.bf16.msra.mxu0 %v18647_v39  ;;  %15927 = vmatpush3.bf16.msra.mxu1 %v18649_v27 }
 0x8eb   : > { %15904 = vmatprep.subr.bf16.mxu0 %v21173_v33  ;;  %15928 = vmatprep.subr.bf16.mxu1 %v21173_v33 }
 0x8ee   : > { %15906 = vmatpush3.bf16.msra.mxu0 %v18659_v18  ;;  %15930 = vmatpush3.bf16.msra.mxu1 %v18661_v38 }
 0x8ef   : > { %15907 = vmatprep.subr.bf16.mxu0 %v21173_v33  ;;  %15931 = vmatprep.subr.bf16.mxu1 %v21173_v33 }
 0x8f2   : > { %15909 = vmatpush3.bf16.msra.mxu0 %v18667_v63  ;;  %15933 = vmatpush3.bf16.msra.mxu1 %v18669_v15 }
 0x8f3   : > { %15910 = vmatprep.subr.bf16.mxu0 %v21173_v33  ;;  %15934 = vmatprep.subr.bf16.mxu1 %v21173_v33 }
 0x8f6   : > { %15912 = vmatpush3.bf16.msra.mxu0 %v18675_v7  ;;  %15936 = vmatpush3.bf16.msra.mxu1 %v18677_v25 }
 0x8f7   : > { %15913 = vmatprep.subr.bf16.mxu0 %v21173_v33  ;;  %15937 = vmatprep.subr.bf16.mxu1 %v21173_v33 }
 0x8f8   : > { %v6850_v46 = vpop.f32.mrb[130].mxu0  ;;  %v6920_v42 = vpop.f32.mrb[130].mxu1 }
 0x8f9   : > { %v7206_v5 = vsub.f32 %v20073_v31, %v6850_v46  ;;  %v7207_v24 = vsub.f32 %v20076_v4, %v6920_v42  ;;  %v13124_v20 = vpop.f32.mrb[131].mxu0  ;;  %v13159_v11 = vpop.f32.mrb[131].mxu1  ;;  %v21358_v31 = vld [vmem:[#allocation18_spill] sm:$0xff]  ;;  %v21359_v4 = vld [vmem:[#allocation16_spill] sm:$0xff]  ;;  %v21360_v46 = vld [vmem:[#allocation19_spill] sm:$0xff] }
 0x8fa   : > { %15915 = vmatpush3.bf16.msra.mxu0 %v18683_v61  ;;  %15939 = vmatpush3.bf16.msra.mxu1 %v18685_v26  ;;  %v21361_v42 = vld [vmem:[#allocation17_spill] sm:$0xff]  ;;  %v21364_v20 = vld [vmem:[#allocation23_spill] sm:$0xff] }
 0x8fb   : > { %v20257_v59 = vadd.f32 %v7206_v5, %v18898_v3  ;;  %v20260_v6 = vadd.f32 %v7207_v24, %v18900_v35  ;;  %15940 = vmatprep.subr.bf16.mxu0 %v21173_v33  ;;  %15964 = vmatprep.subr.bf16.mxu1 %v21173_v33  ;;  %v21362_v5 = vld [vmem:[#allocation22_spill] sm:$0xff]  ;;  %v21363_v24 = vld [vmem:[#allocation20_spill] sm:$0xff]  ;;  %v21365_v11 = vld [vmem:[#allocation21_spill] sm:$0xff] }
 0x8fd   : > { %13403 = vmatmul.mubr.f32.vlgmr.msra.gmra.mrb[138].mxu0 %v20257_v59  ;;  %13438 = vmatmul.mubr.f32.vlgmr.msra.gmra.mrb[138].mxu1 %v20260_v6 }
 0x8fe   : > { %15942 = vmatpush3.bf16.msra.mxu0 %v18691_v29  ;;  %15966 = vmatpush3.bf16.msra.mxu1 %v18693_v54 }
 0x8ff   : > { %15943 = vmatprep.subr.bf16.mxu0 %v21173_v33  ;;  %15967 = vmatprep.subr.bf16.mxu1 %v21173_v33 }
 0x900   : > { %13472 = vmatprep.mubr.msk.f32.mxu0 %vm16909_vm0, %v21166_v28  ;;  %13507 = vmatprep.mubr.msk.f32.mxu1 %vm16909_vm0, %v21166_v28 }
 0x902   : > { %15945 = vmatpush3.bf16.msra.mxu0 %v18699_v13  ;;  %15969 = vmatpush3.bf16.msra.mxu1 %v18701_v23 }
 0x903   : > { %15946 = vmatprep.subr.bf16.mxu0 %v21173_v33  ;;  %15970 = vmatprep.subr.bf16.mxu1 %v21173_v33 }
 0x906   : > { %15948 = vmatpush3.bf16.msra.mxu0 %v18715_v52  ;;  %15972 = vmatpush3.bf16.msra.mxu1 %v18717_v36 }
 0x907   : > { %15949 = vmatprep.subr.bf16.mxu0 %v21173_v33  ;;  %15973 = vmatprep.subr.bf16.mxu1 %v21173_v33 }
 0x90a   : > { %15951 = vmatpush3.bf16.msra.mxu0 %v21358_v31  ;;  %15975 = vmatpush3.bf16.msra.mxu1 %v21359_v4 }
 0x90b   : > { %15952 = vmatprep.subr.bf16.mxu0 %v21173_v33  ;;  %15976 = vmatprep.subr.bf16.mxu1 %v21173_v33 }
 0x90e   : > { %15954 = vmatpush3.bf16.msra.mxu0 %v21360_v46  ;;  %15978 = vmatpush3.bf16.msra.mxu1 %v21361_v42 }
 0x90f   : > { %15955 = vmatprep.subr.bf16.mxu0 %v21173_v33  ;;  %15979 = vmatprep.subr.bf16.mxu1 %v21173_v33 }
 0x912   : > { %15957 = vmatpush3.bf16.msra.mxu0 %v21362_v5  ;;  %15981 = vmatpush3.bf16.msra.mxu1 %v21363_v24 }
 0x913   : > { %15958 = vmatprep.subr.bf16.mxu0 %v21173_v33  ;;  %15982 = vmatprep.subr.bf16.mxu1 %v21173_v33 }
 0x916   : > { %15960 = vmatpush3.bf16.msra.mxu0 %v21364_v20  ;;  %15984 = vmatpush3.bf16.msra.mxu1 %v21365_v11 }
 0x917   : > { %15961 = vmatprep.subr.bf16.mxu0 %v21173_v33  ;;  %15985 = vmatprep.subr.bf16.mxu1 %v21173_v33 }
 0x918   : > { %v6990_v42 = vpop.f32.mrb[132].mxu0  ;;  %v7060_v46 = vpop.f32.mrb[132].mxu1 }
 0x919   : > { %v7208_v4 = vsub.f32 %v20119_v12, %v6990_v42  ;;  %v7209_v5 = vsub.f32 %v20122_v51, %v7060_v46  ;;  %v13194_v31 = vpop.f32.mrb[133].mxu0  ;;  %v13229_v24 = vpop.f32.mrb[133].mxu1  ;;  %v21366_v12 = vld [vmem:[#allocation43_spill] sm:$0xff]  ;;  %v21367_v51 = vld [vmem:[#allocation38_spill] sm:$0xff] }
 0x91a   : > { %15963 = vmatpush3.bf16.msra.mxu0 %v21182_v2  ;;  %15987 = vmatpush3.bf16.msra.mxu1 %v21183_v21  ;;  %v21368_v31 = vld [vmem:[#allocation42_spill] sm:$0xff] }
 0x91b   : > { %v20303_v20 = vadd.f32 %v7208_v4, %v18914_v0  ;;  %v20306_v11 = vadd.f32 %v7209_v5, %v18916_v14  ;;  %15988 = vmatprep.subr.bf16.mxu0 %v21173_v33  ;;  %16012 = vmatprep.subr.bf16.mxu1 %v21173_v33  ;;  %v21369_v4 = vld [vmem:[#allocation40_spill] sm:$0xff]  ;;  %v21370_v46 = vld [vmem:[#allocation50_spill] sm:$0xff] }
 0x91c   : > { %v21371_v42 = vld [vmem:[#allocation46_spill] sm:$0xff] }
 0x91d   : > { %13473 = vmatmul.mubr.f32.vlgmr.msra.gmra.mrb[140].mxu0 %v20303_v20  ;;  %13508 = vmatmul.mubr.f32.vlgmr.msra.gmra.mrb[140].mxu1 %v20306_v11 }
 0x91e   : > { %15990 = vmatpush3.bf16.msra.mxu0 %v21184_v19  ;;  %16014 = vmatpush3.bf16.msra.mxu1 %v21185_v41 }
 0x91f   : > { %15991 = vmatprep.subr.bf16.mxu0 %v21173_v33  ;;  %16015 = vmatprep.subr.bf16.mxu1 %v21173_v33 }
 0x920   : > { %13542 = vmatprep.mubr.msk.f32.mxu0 %vm16909_vm0, %v21166_v28  ;;  %13577 = vmatprep.mubr.msk.f32.mxu1 %vm16909_vm0, %v21166_v28 }
 0x922   : > { %15993 = vmatpush3.bf16.msra.mxu0 %v21186_v47  ;;  %16017 = vmatpush3.bf16.msra.mxu1 %v21187_v53 }
 0x923   : > { %15994 = vmatprep.subr.bf16.mxu0 %v21173_v33  ;;  %16018 = vmatprep.subr.bf16.mxu1 %v21173_v33 }
 0x926   : > { %15996 = vmatpush3.bf16.msra.mxu0 %v21188_v17  ;;  %16020 = vmatpush3.bf16.msra.mxu1 %v21189_v43 }
 0x927   : > { %15997 = vmatprep.subr.bf16.mxu0 %v21173_v33  ;;  %16021 = vmatprep.subr.bf16.mxu1 %v21173_v33 }
 0x92a   : > { %15999 = vmatpush3.bf16.msra.mxu0 %v18804_v1  ;;  %16023 = vmatpush3.bf16.msra.mxu1 %v18806_v57 }
 0x92b   : > { %16000 = vmatprep.subr.bf16.mxu0 %v21173_v33  ;;  %16024 = vmatprep.subr.bf16.mxu1 %v21173_v33 }
 0x92e   : > { %16002 = vmatpush3.bf16.msra.mxu0 %v21366_v12  ;;  %16026 = vmatpush3.bf16.msra.mxu1 %v21367_v51 }
 0x92f   : > { %16003 = vmatprep.subr.bf16.mxu0 %v21173_v33  ;;  %16027 = vmatprep.subr.bf16.mxu1 %v21173_v33 }
 0x932   : > { %16005 = vmatpush3.bf16.msra.mxu0 %v21368_v31  ;;  %16029 = vmatpush3.bf16.msra.mxu1 %v21369_v4 }
 0x933   : > { %16006 = vmatprep.subr.bf16.mxu0 %v21173_v33  ;;  %16030 = vmatprep.subr.bf16.mxu1 %v21173_v33 }
 0x936   : > { %16008 = vmatpush3.bf16.msra.mxu0 %v21370_v46  ;;  %16032 = vmatpush3.bf16.msra.mxu1 %v21371_v42 }
 0x937   : > { %16009 = vmatprep.subr.bf16.mxu0 %v21173_v33  ;;  %16033 = vmatprep.subr.bf16.mxu1 %v21173_v33 }
 0x938   : > { %v7130_v5 = vpop.f32.mrb[134].mxu0  ;;  %v7200_v24 = vpop.f32.mrb[134].mxu1 }
 0x939   : > { %v7210_v51 = vsub.f32 %v20165_v44, %v7130_v5  ;;  %v7211_v31 = vsub.f32 %v20168_v32, %v7200_v24  ;;  %v13264_v12 = vpop.f32.mrb[135].mxu0  ;;  %v13299_v4 = vpop.f32.mrb[135].mxu1  ;;  %v21372_v44 = vld [vmem:[#allocation81_spill] sm:$0xff]  ;;  %v21373_v32 = vld [vmem:[#allocation84_spill] sm:$0xff] }
 0x93a   : > { %16011 = vmatpush3.bf16.msra.mxu0 %v18840_v60  ;;  %16035 = vmatpush3.bf16.msra.mxu1 %v18842_v49  ;;  %v21376_v12 = vld [vmem:[#allocation109_spill] sm:$0xff]  ;;  %v21379_v4 = vld [vmem:[#allocation116_spill] sm:$0xff] }
 0x93b   : > { %v20349_v46 = vadd.f32 %v7210_v51, %v18918_v16  ;;  %v20352_v42 = vadd.f32 %v7211_v31, %v18920_v40  ;;  %16036 = vmatprep.subr.bf16.mxu0 %v21173_v33  ;;  %16060 = vmatprep.subr.bf16.mxu1 %v21173_v33  ;;  %v21377_v51 = vld [vmem:[#allocation110_spill] sm:$0xff]  ;;  %v21378_v31 = vld [vmem:[#allocation115_spill] sm:$0xff]  ;;  %v21380_v5 = vld [vmem:[#allocation120_spill] sm:$0xff] }
 0x93c   : > { %v21381_v24 = vld [vmem:[#allocation121_spill] sm:$0xff] }
 0x93d   : > { %13543 = vmatmul.mubr.f32.vlgmr.msra.gmra.mrb[142].mxu0 %v20349_v46  ;;  %13578 = vmatmul.mubr.f32.vlgmr.msra.gmra.mrb[142].mxu1 %v20352_v42 }
 0x93e   : > { %16038 = vmatpush3.bf16.msra.mxu0 %v18481_v30  ;;  %16062 = vmatpush3.bf16.msra.mxu1 %v18483_v55  ;;  %v21374_v30 = vld [vmem:[#allocation103_spill] sm:$0xff]  ;;  %v21375_v55 = vld [vmem:[#allocation104_spill] sm:$0xff] }
 0x93f   : > { %16039 = vmatprep.subr.bf16.mxu0 %v21173_v33  ;;  %16063 = vmatprep.subr.bf16.mxu1 %v21173_v33 }
 0x940   : > { %13612 = vmatprep.mubr.msk.f32.mxu0 %vm16909_vm0, %v21166_v28  ;;  %13647 = vmatprep.mubr.msk.f32.mxu1 %vm16909_vm0, %v21166_v28 }
 0x942   : > { %16041 = vmatpush3.bf16.msra.mxu0 %v21372_v44  ;;  %16065 = vmatpush3.bf16.msra.mxu1 %v21373_v32  ;;  %v21382_v44 = vld [vmem:[#allocation14_spill] sm:$0xff]  ;;  %v21383_v32 = vld [vmem:[#allocation12_spill] sm:$0xff] }
 0x943   : > { %16042 = vmatprep.subr.bf16.mxu0 %v21173_v33  ;;  %16066 = vmatprep.subr.bf16.mxu1 %v21173_v33 }
 0x946   : > { %16044 = vmatpush3.bf16.msra.mxu0 %v21374_v30  ;;  %16068 = vmatpush3.bf16.msra.mxu1 %v21375_v55 }
 0x947   : > { %16045 = vmatprep.subr.bf16.mxu0 %v21173_v33  ;;  %16069 = vmatprep.subr.bf16.mxu1 %v21173_v33 }
 0x94a   : > { %16047 = vmatpush3.bf16.msra.mxu0 %v21376_v12  ;;  %16071 = vmatpush3.bf16.msra.mxu1 %v21377_v51 }
 0x94b   : > { %16048 = vmatprep.subr.bf16.mxu0 %v21173_v33  ;;  %16072 = vmatprep.subr.bf16.mxu1 %v21173_v33 }
 0x94e   : > { %16050 = vmatpush3.bf16.msra.mxu0 %v21378_v31  ;;  %16074 = vmatpush3.bf16.msra.mxu1 %v21379_v4 }
 0x94f   : > { %16051 = vmatprep.subr.bf16.mxu0 %v21173_v33  ;;  %16075 = vmatprep.subr.bf16.mxu1 %v21173_v33 }
 0x952   : > { %16053 = vmatpush3.bf16.msra.mxu0 %v21380_v5  ;;  %16077 = vmatpush3.bf16.msra.mxu1 %v21381_v24 }
 0x953   : > { %16054 = vmatprep.subr.bf16.mxu0 %v21173_v33  ;;  %16078 = vmatprep.subr.bf16.mxu1 %v21173_v33 }
 0x956   : > { %16056 = vmatpush3.bf16.msra.mxu0 %v21382_v44  ;;  %16080 = vmatpush3.bf16.msra.mxu1 %v21383_v32 }
 0x957   : > { %16057 = vmatprep.subr.bf16.mxu0 %v21173_v33  ;;  %16081 = vmatprep.subr.bf16.mxu1 %v21173_v33 }
 0x95a   : > { %16059 = vmatpush3.bf16.msra.mxu0 %v21200_v50  ;;  %16083 = vmatpush3.bf16.msra.mxu1 %v21201_v9 }
 0x95b   : > { %16084 = vmatprep.subr.bf16.mxu0 %v21173_v33  ;;  %16108 = vmatprep.subr.bf16.mxu1 %v21173_v33 }
 0x9b0   : > { %v7286_v30 = vpop.f32.mrb[136].mxu0  ;;  %v7356_v55 = vpop.f32.mrb[136].mxu1 }
 0x9b1   : > { %v7780_v12 = vsub.f32 %v20213_v48, %v7286_v30  ;;  %v7781_v51 = vsub.f32 %v20216_v62, %v7356_v55  ;;  %v13334_v31 = vpop.f32.mrb[137].mxu0  ;;  %v13369_v4 = vpop.f32.mrb[137].mxu1 }
 0x9b3   : > { %v20397_v5 = vadd.f32 %v7780_v12, %v18848_v37  ;;  %v20400_v24 = vadd.f32 %v7781_v51, %v18850_v45 }
 0x9b5   : > { %13613 = vmatmul.mubr.f32.vlgmr.msra.gmra.mrb[144].mxu0 %v20397_v5  ;;  %13648 = vmatmul.mubr.f32.vlgmr.msra.gmra.mrb[144].mxu1 %v20400_v24 }
 0x9b6   : > { %16086 = vmatpush3.bf16.msra.mxu0 %v18615_v10  ;;  %16110 = vmatpush3.bf16.msra.mxu1 %v18617_v8 }
 0x9b7   : > { %16087 = vmatprep.subr.bf16.mxu0 %v21173_v33  ;;  %16111 = vmatprep.subr.bf16.mxu1 %v21173_v33 }
 0x9b8   : > { %13682 = vmatprep.mubr.msk.f32.mxu0 %vm16909_vm0, %v21166_v28  ;;  %13717 = vmatprep.mubr.msk.f32.mxu1 %vm16909_vm0, %v21166_v28 }
 0x9ba   : > { %16089 = vmatpush3.bf16.msra.mxu0 %v18623_v34  ;;  %16113 = vmatpush3.bf16.msra.mxu1 %v18625_v58 }
 0x9bb   : > { %16090 = vmatprep.subr.bf16.mxu0 %v21173_v33  ;;  %16114 = vmatprep.subr.bf16.mxu1 %v21173_v33 }
 0x9be   : > { %16092 = vmatpush3.bf16.msra.mxu0 %v18637_v22  ;;  %16116 = vmatpush3.bf16.msra.mxu1 %v18639_v56 }
 0x9bf   : > { %16093 = vmatprep.subr.bf16.mxu0 %v21173_v33  ;;  %16117 = vmatprep.subr.bf16.mxu1 %v21173_v33 }
 0x9c2   : > { %16095 = vmatpush3.bf16.msra.mxu0 %v18647_v39  ;;  %16119 = vmatpush3.bf16.msra.mxu1 %v18649_v27 }
 0x9c3   : > { %16096 = vmatprep.subr.bf16.mxu0 %v21173_v33  ;;  %16120 = vmatprep.subr.bf16.mxu1 %v21173_v33 }
 0x9c6   : > { %16098 = vmatpush3.bf16.msra.mxu0 %v18659_v18  ;;  %16122 = vmatpush3.bf16.msra.mxu1 %v18661_v38  ;;  %v21384_v18 = vld [vmem:[#allocation18_spill] sm:$0xff]  ;;  %v21385_v38 = vld [vmem:[#allocation16_spill] sm:$0xff] }
 0x9c7   : > { %16099 = vmatprep.subr.bf16.mxu0 %v21173_v33  ;;  %16123 = vmatprep.subr.bf16.mxu1 %v21173_v33 }
 0x9ca   : > { %16101 = vmatpush3.bf16.msra.mxu0 %v18667_v63  ;;  %16125 = vmatpush3.bf16.msra.mxu1 %v18669_v15  ;;  %v21386_v63 = vld [vmem:[#allocation19_spill] sm:$0xff]  ;;  %v21387_v15 = vld [vmem:[#allocation17_spill] sm:$0xff] }
 0x9cb   : > { %16102 = vmatprep.subr.bf16.mxu0 %v21173_v33  ;;  %16126 = vmatprep.subr.bf16.mxu1 %v21173_v33 }
 0x9ce   : > { %16104 = vmatpush3.bf16.msra.mxu0 %v18675_v7  ;;  %16128 = vmatpush3.bf16.msra.mxu1 %v18677_v25  ;;  %v21388_v7 = vld [vmem:[#allocation22_spill] sm:$0xff]  ;;  %v21389_v25 = vld [vmem:[#allocation20_spill] sm:$0xff] }
 0x9cf   : > { %16105 = vmatprep.subr.bf16.mxu0 %v21173_v33  ;;  %16129 = vmatprep.subr.bf16.mxu1 %v21173_v33 }
 0x9d0   : > { %v7426_v10 = vpop.f32.mrb[138].mxu0  ;;  %v7496_v8 = vpop.f32.mrb[138].mxu1 }
 0x9d1   : > { %v7782_v34 = vsub.f32 %v20257_v59, %v7426_v10  ;;  %v7783_v58 = vsub.f32 %v20260_v6, %v7496_v8  ;;  %v13404_v22 = vpop.f32.mrb[139].mxu0  ;;  %v13439_v56 = vpop.f32.mrb[139].mxu1  ;;  %v21398_v10 = vld [vmem:[#allocation78_spill] sm:$0xff] }
 0x9d2   : > { %16107 = vmatpush3.bf16.msra.mxu0 %v18683_v61  ;;  %16131 = vmatpush3.bf16.msra.mxu1 %v18685_v26  ;;  %v21390_v61 = vld [vmem:[#allocation23_spill] sm:$0xff]  ;;  %v21391_v26 = vld [vmem:[#allocation21_spill] sm:$0xff] }
 0x9d3   : > { %v20441_v39 = vadd.f32 %v7782_v34, %v18898_v3  ;;  %v20444_v27 = vadd.f32 %v7783_v58, %v18900_v35  ;;  %16132 = vmatprep.subr.bf16.mxu0 %v21173_v33  ;;  %16156 = vmatprep.subr.bf16.mxu1 %v21173_v33 }
 0x9d5   : > { %13683 = vmatmul.mubr.f32.vlgmr.msra.gmra.mrb[146].mxu0 %v20441_v39  ;;  %13718 = vmatmul.mubr.f32.vlgmr.msra.gmra.mrb[146].mxu1 %v20444_v27 }
 0x9d6   : > { %16134 = vmatpush3.bf16.msra.mxu0 %v18691_v29  ;;  %16158 = vmatpush3.bf16.msra.mxu1 %v18693_v54 }
 0x9d7   : > { %16135 = vmatprep.subr.bf16.mxu0 %v21173_v33  ;;  %16159 = vmatprep.subr.bf16.mxu1 %v21173_v33 }
 0x9d8   : > { %13752 = vmatprep.mubr.msk.f32.mxu0 %vm16909_vm0, %v21166_v28  ;;  %13787 = vmatprep.mubr.msk.f32.mxu1 %vm16909_vm0, %v21166_v28 }
 0x9da   : > { %16137 = vmatpush3.bf16.msra.mxu0 %v18699_v13  ;;  %16161 = vmatpush3.bf16.msra.mxu1 %v18701_v23 }
 0x9db   : > { %16138 = vmatprep.subr.bf16.mxu0 %v21173_v33  ;;  %16162 = vmatprep.subr.bf16.mxu1 %v21173_v33 }
 0x9de   : > { %16140 = vmatpush3.bf16.msra.mxu0 %v18715_v52  ;;  %16164 = vmatpush3.bf16.msra.mxu1 %v18717_v36 }
 0x9df   : > { %16141 = vmatprep.subr.bf16.mxu0 %v21173_v33  ;;  %16165 = vmatprep.subr.bf16.mxu1 %v21173_v33 }
 0x9e2   : > { %16143 = vmatpush3.bf16.msra.mxu0 %v21384_v18  ;;  %16167 = vmatpush3.bf16.msra.mxu1 %v21385_v38 }
 0x9e3   : > { %16144 = vmatprep.subr.bf16.mxu0 %v21173_v33  ;;  %16168 = vmatprep.subr.bf16.mxu1 %v21173_v33 }
 0x9e6   : > { %16146 = vmatpush3.bf16.msra.mxu0 %v21386_v63  ;;  %16170 = vmatpush3.bf16.msra.mxu1 %v21387_v15 }
 0x9e7   : > { %16147 = vmatprep.subr.bf16.mxu0 %v21173_v33  ;;  %16171 = vmatprep.subr.bf16.mxu1 %v21173_v33 }
 0x9ea   : > { %16149 = vmatpush3.bf16.msra.mxu0 %v21388_v7  ;;  %16173 = vmatpush3.bf16.msra.mxu1 %v21389_v25 }
 0x9eb   : > { %16150 = vmatprep.subr.bf16.mxu0 %v21173_v33  ;;  %16174 = vmatprep.subr.bf16.mxu1 %v21173_v33 }
 0x9ee   : > { %16152 = vmatpush3.bf16.msra.mxu0 %v21390_v61  ;;  %16176 = vmatpush3.bf16.msra.mxu1 %v21391_v26 }
 0x9ef   : > { %16153 = vmatprep.subr.bf16.mxu0 %v21173_v33  ;;  %16177 = vmatprep.subr.bf16.mxu1 %v21173_v33 }
 0x9f0   : > { %v7566_v29 = vpop.f32.mrb[140].mxu0  ;;  %v7636_v54 = vpop.f32.mrb[140].mxu1 }
 0x9f1   : > { %v7784_v13 = vsub.f32 %v20303_v20, %v7566_v29  ;;  %v7785_v23 = vsub.f32 %v20306_v11, %v7636_v54  ;;  %v13474_v52 = vpop.f32.mrb[141].mxu0  ;;  %v13509_v36 = vpop.f32.mrb[141].mxu1 }
 0x9f2   : > { %16155 = vmatpush3.bf16.msra.mxu0 %v21182_v2  ;;  %16179 = vmatpush3.bf16.msra.mxu1 %v21183_v21  ;;  %v21393_v21 = vld [vmem:[#allocation38_spill] sm:$0xff] }
 0x9f3   : > { %v20487_v9 = vadd.f32 %v7784_v13, %v18914_v0  ;;  %v20490_v50 = vadd.f32 %v7785_v23, %v18916_v14  ;;  %16180 = vmatprep.subr.bf16.mxu0 %v21173_v33  ;;  %16204 = vmatprep.subr.bf16.mxu1 %v21173_v33  ;;  %v21394_v2 = vld [vmem:[#allocation42_spill] sm:$0xff] }
 0x9f5   : > { %13753 = vmatmul.mubr.f32.vlgmr.msra.gmra.mrb[148].mxu0 %v20487_v9  ;;  %13788 = vmatmul.mubr.f32.vlgmr.msra.gmra.mrb[148].mxu1 %v20490_v50 }
 0x9f6   : > { %16182 = vmatpush3.bf16.msra.mxu0 %v21184_v19  ;;  %16206 = vmatpush3.bf16.msra.mxu1 %v21185_v41  ;;  %v21395_v19 = vld [vmem:[#allocation40_spill] sm:$0xff] }
 0x9f7   : > { %16183 = vmatprep.subr.bf16.mxu0 %v21173_v33  ;;  %16207 = vmatprep.subr.bf16.mxu1 %v21173_v33 }
 0x9f8   : > { %13822 = vmatprep.mubr.msk.f32.mxu0 %vm16909_vm0, %v21166_v28  ;;  %13857 = vmatprep.mubr.msk.f32.mxu1 %vm16909_vm0, %v21166_v28  ;;  %v21392_v28 = vld [vmem:[#allocation43_spill] sm:$0xff] }
 0x9fa   : > { %16185 = vmatpush3.bf16.msra.mxu0 %v21186_v47  ;;  %16209 = vmatpush3.bf16.msra.mxu1 %v21187_v53 }
 0x9fb   : > { %16186 = vmatprep.subr.bf16.mxu0 %v21173_v33  ;;  %16210 = vmatprep.subr.bf16.mxu1 %v21173_v33 }
 0x9fe   : > { %16188 = vmatpush3.bf16.msra.mxu0 %v21188_v17  ;;  %16212 = vmatpush3.bf16.msra.mxu1 %v21189_v43 }
 0x9ff   : > { %16189 = vmatprep.subr.bf16.mxu0 %v21173_v33  ;;  %16213 = vmatprep.subr.bf16.mxu1 %v21173_v33 }
 0xa02   : > { %16191 = vmatpush3.bf16.msra.mxu0 %v18804_v1  ;;  %16215 = vmatpush3.bf16.msra.mxu1 %v18806_v57  ;;  %v21396_v1 = vld [vmem:[#allocation50_spill] sm:$0xff] }
 0xa03   : > { %16192 = vmatprep.subr.bf16.mxu0 %v21173_v33  ;;  %16216 = vmatprep.subr.bf16.mxu1 %v21173_v33  ;;  %v21397_v57 = vld [vmem:[#allocation46_spill] sm:$0xff] }
 0xa06   : > { %16194 = vmatpush3.bf16.msra.mxu0 %v21392_v28  ;;  %16218 = vmatpush3.bf16.msra.mxu1 %v21393_v21 }
 0xa07   : > { %16195 = vmatprep.subr.bf16.mxu0 %v21173_v33  ;;  %16219 = vmatprep.subr.bf16.mxu1 %v21173_v33 }
 0xa0a   : > { %16197 = vmatpush3.bf16.msra.mxu0 %v21394_v2  ;;  %16221 = vmatpush3.bf16.msra.mxu1 %v21395_v19 }
 0xa0b   : > { %16198 = vmatprep.subr.bf16.mxu0 %v21173_v33  ;;  %16222 = vmatprep.subr.bf16.mxu1 %v21173_v33 }
 0xa0e   : > { %16200 = vmatpush3.bf16.msra.mxu0 %v21396_v1  ;;  %16224 = vmatpush3.bf16.msra.mxu1 %v21397_v57 }
 0xa0f   : > { %16201 = vmatprep.subr.bf16.mxu0 %v21173_v33  ;;  %16225 = vmatprep.subr.bf16.mxu1 %v21173_v33 }
 0xa10   : > { %v7706_v41 = vpop.f32.mrb[142].mxu0  ;;  %v7776_v47 = vpop.f32.mrb[142].mxu1 }
 0xa11   : > { %v7786_v53 = vsub.f32 %v20349_v46, %v7706_v41  ;;  %v7787_v17 = vsub.f32 %v20352_v42, %v7776_v47  ;;  %v13544_v43 = vpop.f32.mrb[143].mxu0  ;;  %v13579_v62 = vpop.f32.mrb[143].mxu1 }
 0xa12   : > { %16203 = vmatpush3.bf16.msra.mxu0 %v18840_v60  ;;  %16227 = vmatpush3.bf16.msra.mxu1 %v18842_v49 }
 0xa13   : > { %v7794_v48 = vadd.f32 %v7786_v53, %v18918_v16  ;;  %v7795_v59 = vadd.f32 %v7787_v17, %v18920_v40 }
 0xa15   : > { %13823 = vmatmul.mubr.f32.vlgmr.msra.gmra.mrb[150].mxu0 %v7794_v48  ;;  %13858 = vmatmul.mubr.f32.vlgmr.msra.gmra.mrb[150].mxu1 %v7795_v59 }
 0xa88   : > { %v7862_v6 = vpop.f32.mrb[144].mxu0  ;;  %v7932_v33 = vpop.f32.mrb[144].mxu1 }
 0xa89   : > { %v8356_v20 = vsub.f32 %v20397_v5, %v7862_v6  ;;  %v8357_v11 = vsub.f32 %v20400_v24, %v7932_v33  ;;  %v13614_v46 = vpop.f32.mrb[145].mxu0  ;;  %v13649_v42 = vpop.f32.mrb[145].mxu1 }
 0xa8b   : > { %v8364_v44 = vadd.f32 %v8356_v20, %v18848_v37  ;;  %v8365_v60 = vadd.f32 %v8357_v11, %v18850_v45 }
 0xa8d   : > { %v8380_v32 = vcombine.low %v8364_v44, %v8365_v60 }
 0xa8f   : > { %v8390_v8 = vrot.slane %v8380_v32, %v21398_v10 }
 0xaa8   : > { %v8002_v49 = vpop.f32.mrb[146].mxu0  ;;  %v8072_v30 = vpop.f32.mrb[146].mxu1 }
 0xaa9   : > { %v8358_v55 = vsub.f32 %v20441_v39, %v8002_v49  ;;  %v8359_v12 = vsub.f32 %v20444_v27, %v8072_v30  ;;  %v13684_v51 = vpop.f32.mrb[147].mxu0  ;;  %v13719_v31 = vpop.f32.mrb[147].mxu1 }
 0xaab   : > { %v8366_v4 = vadd.f32 %v8358_v55, %v18898_v3  ;;  %v8367_v5 = vadd.f32 %v8359_v12, %v18900_v35 }
 0xaad   : > { %v8381_v24 = vcombine.low %v8366_v4, %v8367_v5 }
 0xaaf   : > { %v8397_v37 = vrot.slane %v8381_v24, %v21398_v10 }
 0xab1   : > { %v8412_v34 = vcombine.low %v8390_v8, %v8397_v37 }
 0xac8   : > { %v8142_v45 = vpop.f32.mrb[148].mxu0  ;;  %v8212_v58 = vpop.f32.mrb[148].mxu1 }
 0xac9   : > { %v8360_v22 = vsub.f32 %v20487_v9, %v8142_v45  ;;  %v8361_v56 = vsub.f32 %v20490_v50, %v8212_v58  ;;  %v13754_v39 = vpop.f32.mrb[149].mxu0  ;;  %v13789_v27 = vpop.f32.mrb[149].mxu1 }
 0xacb   : > { %v8368_v18 = vadd.f32 %v8360_v22, %v18914_v0  ;;  %v8369_v3 = vadd.f32 %v8361_v56, %v18916_v14  ;;  %v8420_v14 = vrot.slane %v8412_v34, %v21398_v10 }
 0xacd   : > { %v8382_v35 = vcombine.low %v8368_v18, %v8369_v3 }
 0xacf   : > { %v8404_v13 = vrot.slane %v8382_v35, %v21398_v10 }
 0xae8   : > { %v8282_v38 = vpop.f32.mrb[150].mxu0  ;;  %v8352_v63 = vpop.f32.mrb[150].mxu1 }
 0xae9   : > { %v8362_v15 = vsub.f32 %v7794_v48, %v8282_v38  ;;  %v8363_v7 = vsub.f32 %v7795_v59, %v8352_v63  ;;  %v13824_v25 = vpop.f32.mrb[151].mxu0  ;;  %v13859_v61 = vpop.f32.mrb[151].mxu1 }
 0xaeb   : > { %v8370_v26 = vadd.f32 %v8362_v15, %v18918_v16  ;;  %v8371_v29 = vadd.f32 %v8363_v7, %v18920_v40 }
 0xaed   : > { %v8383_v54 = vcombine.low %v8370_v26, %v8371_v29 }
 0xaef   : > { %v8411_v0 = vrot.slane %v8383_v54, %v21398_v10 }
 0xaf1   : > { %v8413_v23 = vcombine.low %v8404_v13, %v8411_v0 }
 0xaf3   : > { %v8427_v52 = vrot.slane %v8413_v23, %v21398_v10 }
 0xaf5   : > { %v8428_v36 = vcombine.low %v8420_v14, %v8427_v52 }
 0xaf7   : > { %8430 = vst [vmem:[%s260_s7] sm:$0xff] %v8428_v36 }
 0xaf8   : > { %16843 = shalt.err (!%p16840_p8)
}
 0xaf9   : > { %s16844_s10 = scalar_lea.hbm %s20559_s25, 128  ;;  %s16848_s26 = scalar_lea.hbm %s20606_s3, 256 }
 0xafa   : > { %p16845_p13 = scmp.ne.s32.totalorder %s20559_s25, %s16844_s10  ;;  %p16849_p3 = scmp.lt.u32.totalorder %s20559_s25, %s20606_s3 }
 0xafb   : > { %p16850_p4 = scmp.lt.u32.totalorder %s16848_s26, %s16844_s10  ;;  %p16852_p10 = scmp.lt.u32.totalorder %s16844_s10, %s20559_s25 }
 0xafc   : > { %p16846_p11 = pnand %p16845_p13, %p21399_p5 }
 0xafd   : > { %p16851_p2 = por %p16850_p4, %p16849_p3 }
 0xafe   : > { %p16847_p1 = pneg %p16846_p11 }
 0xaff   : > { %p16853_p7 = por %p16852_p10, %p16851_p2 }
 0xb01   : > { %p16854_p9 = pnand %p16853_p7, %p16847_p1 }
 0xb03   : > { %16857 = shalt.err (!%p16854_p9)
}
 0xb04   : > { %16234 = dma.vmem_to_hbm [thread:$0]  (%p21399_p5), %s20561_s29, 128, %s20559_s25, %s8432_s6  }
 0xb05 PF: > { %s8457_s20 = sand.u32 1, %s16888_s12   ;;  %p21400_p6 = scmp.ne.s32.totalorder %s20825_s24, 0 }
 0xb06   : > { %p21401_p12 = scmp.ge.s32.totalorder %s16900_s15, 2  ;;  %s8458_s22 = scalar_lea.sflag [#allocation4], %s8457_s20 }
 0xb08   : > { %p16247_p0 = pnand %p21401_p12, %p21400_p6 }
 0xb0a   : > { %16883 = dma.done.wait (!%p16247_p0), %s8458_s22, 128  }
 0xb0b   : > { %16885 = vsyncadd (!%p16247_p0), %s8458_s22, 4294967168  ;;  %p19_p8 = scmp.ge.s32.totalorder %s16957_s18, 4   ;;  %s21402_s12 = smov %s16892_s13 }
 0xb0c   : > { %s21403_s13 = smov %s16896_s14  ;;  %s21404_s14 = smov %s16969_s21 }
 0xb0d   : > { %s21405_s15 = smov %s16957_s18  ;;  %21 = sbr.rel (!%p19_p8) target bundleno = 7 (0x7), region = 101 }
 0xb14   :  { %8463 = vsyncpa [#allocation3], 1 }
 0xb15   :  { %8465 = vsyncpa [#allocation3 + $0x1], 1 }
 0xb16   :  { %8466 = vsyncpa [#allocation6], 1 }
 0xb17   :  { %8468 = vsyncpa [#allocation6 + $0x1], 1 }
 0xb18   :  { %8469 = vsyncpa [#allocation4], 1 }
 0xb19   :  { %8471 = vsyncpa [#allocation4 + $0x1], 1 }

</bundles_post_ra>
